<compile_context>
chip_gen: v5e
topology: v5e:2x2
jax: 0.10.0
libtpu: 0.0.40
codegen_flags: <defaults>
</compile_context>

<pallas_src>
import functools

import jax
import jax.numpy as jnp
from jax.experimental import pallas as pl
from jax.experimental.pallas import tpu as pltpu

# ----------------------------- synthetic config -----------------------------
VOCAB = 128
HID = 32              # hidden_size == embedding_size
N_LAYERS = 2
N_HEADS = 2
HEAD_DIM = HID // N_HEADS
FFN = 64
MAX_POS = 64
TYPE_VOCAB = 2
PROMPT_LEN = 1        # module's prompt_length; prompt rows = 2 * PROMPT_LEN
PROMPT_ROWS = 2 * PROMPT_LEN
LN_EPS = 1e-12
NEG_INF = -1e9

# bf16 MXU operands with f32 accumulation: native on v5e/v6e/v7x MXUs.
# Elementwise / LN / softmax math stays f32 (v5e has no bf16 VPU).
MXU_DTYPE = jnp.bfloat16


def _mm(a, b):
    """Matmul with bf16 MXU operands and f32 accumulation."""
    return jnp.dot(a.astype(MXU_DTYPE), b.astype(MXU_DTYPE),
                   preferred_element_type=jnp.float32)


def _mm_exact(a, b):
    """f32 matmul for exact selection dots (one-hot gathers, scatters, counts)."""
    return jnp.dot(a, b, preferred_element_type=jnp.float32)


def _ln(x, g, b):
    mu = jnp.mean(x, axis=-1, keepdims=True)
    xc = x - mu
    var = jnp.mean(xc * xc, axis=-1, keepdims=True)
    return xc * jax.lax.rsqrt(var + LN_EPS) * g + b


# ----------------------- prompt encoder (in-kernel helper) -------------------
# prompt_embeddings -> 2-layer bidirectional LSTM -> Linear+ReLU -> Linear.
# Runs as a preamble inside the fused kernel (rep is only (2P, H)); time
# reversal is done by static index order, no reverse copies.


def _prompt_encoder(pemb, lstm_weights, pl1w, pl1b, pl2w, pl2b, hidden,
                    t_steps):
    def run_dir(rows, wih, whh, bias, reverse):
        h = jnp.zeros((1, hidden), jnp.float32)
        c = jnp.zeros((1, hidden), jnp.float32)
        outs = [None] * t_steps
        order = range(t_steps - 1, -1, -1) if reverse else range(t_steps)
        for t in order:                      # static & tiny (2*prompt_length)
            gates = _mm_exact(rows[t], wih) + _mm_exact(h, whh) + bias
            i = jax.nn.sigmoid(gates[:, 0:hidden])
            f = jax.nn.sigmoid(gates[:, hidden:2 * hidden])
            g = jnp.tanh(gates[:, 2 * hidden:3 * hidden])
            o = jax.nn.sigmoid(gates[:, 3 * hidden:4 * hidden])
            c = f * c + i * g
            h = o * jnp.tanh(c)
            outs[t] = h                      # time-aligned (PyTorch bi-LSTM)
        return outs

    rows = [pemb[t:t + 1, :] for t in range(t_steps)]
    for fw, bw in lstm_weights:
        fwd = run_dir(rows, *fw, reverse=False)
        bwd = run_dir(rows, *bw, reverse=True)
        rows = [jnp.concatenate([fwd[t], bwd[t]], axis=-1)
                for t in range(t_steps)]
    y = jnp.concatenate(rows, axis=0)        # (T, 2H)
    y = jnp.maximum(_mm_exact(y, pl1w) + pl1b, 0.0)
    return _mm_exact(y, pl2w) + pl2b         # (T, H)


# --------------------------- the single fused kernel -------------------------


def _fused_forward_kernel(
        # data
        ids_ref, tt_ref, pmask_ref, amask_ref, labels_ref,
        # embedding tables / LN
        word_ref, tok_ref, pos_ref, embg_ref, embb_ref,
        # prompt encoder weights (unused when apply_prompt=False)
        pemb_ref,
        wih0f_ref, whh0f_ref, b0f_ref, wih0b_ref, whh0b_ref, b0b_ref,
        wih1f_ref, whh1f_ref, b1f_ref, wih1b_ref, whh1b_ref, b1b_ref,
        pl1w_ref, pl1b_ref, pl2w_ref, pl2b_ref,
        # transformer layer weights, stacked along a leading (N_LAYERS,...) axis
        wqkv_ref, bqkv_ref, wo_ref, bo_ref, g1_ref, be1_ref,
        wfi_ref, bfi_ref, wfo_ref, bfo_ref, g2_ref, be2_ref,
        # MLM head
        wt_ref, bt_ref, mlng_ref, mlnb_ref, db_ref,
        # outputs
        logits_ref, loss_ref,
        *, batch, seq, hidden, n_layers, n_heads, head_dim, prompt_rows,
        apply_prompt):
    n = batch * seq
    v = word_ref.shape[0]

    # ---- 1) word-embedding gather (exact one-hot matmul, V = 128 lanes) ----
    # TODO(synk): for a realistic vocab (30k) replace the one-hot gather with a
    # scalar-prefetch DMA row gather; at V=128 the one-hot matmul is cheaper.
    ids = ids_ref[...]                                     # (N, 1) i32
    iota_v = jax.lax.broadcasted_iota(jnp.int32, (n, v), 1)
    onehot = (iota_v == ids).astype(jnp.float32)
    emb = _mm_exact(onehot, word_ref[...])                 # (N, H)

    # ---- 2) p-tuning prompt encoder + scatter (static flag) ----
    if apply_prompt:
        lstm_weights = [
            ((wih0f_ref[...], whh0f_ref[...], b0f_ref[...]),
             (wih0b_ref[...], whh0b_ref[...], b0b_ref[...])),
            ((wih1f_ref[...], whh1f_ref[...], b1f_ref[...]),
             (wih1b_ref[...], whh1b_ref[...], b1b_ref[...])),
        ]
        rep = _prompt_encoder(pemb_ref[...], lstm_weights,
                              pl1w_ref[...], pl1b_ref[...],
                              pl2w_ref[...], pl2b_ref[...],
                              hidden, prompt_rows)          # (2P, H)
        # j-th masked position (in order, per batch row) receives rep[j].
        # rank = per-row cumsum(mask) - 1, via a lower-triangular (S,S) matmul
        # per batch row (static loop; avoids int division on the VPU).
        # TODO(synk): assumes exactly 2*prompt_length masked positions per row
        # (same assumption as the torch .nonzero().reshape).
        mask = pmask_ref[...]                               # (N, 1) f32
        row_s = jax.lax.broadcasted_iota(jnp.int32, (seq, seq), 0)
        col_s = jax.lax.broadcasted_iota(jnp.int32, (seq, seq), 1)
        tri_s = (col_s <= row_s).astype(jnp.float32)        # (S, S)
        ranks = []
        for bi in range(batch):                             # static, tiny
            mb = mask[bi * seq:(bi + 1) * seq, :]
            ranks.append(_mm_exact(tri_s, mb) - 1.0)        # exact small ints
        rank = jnp.concatenate(ranks, axis=0)               # (N, 1)
        iota_p = jax.lax.broadcasted_iota(
            jnp.int32, (n, prompt_rows), 1).astype(jnp.float32)
        sel = jnp.logical_and(iota_p == rank, mask > 0.5).astype(jnp.float32)
        replaced = _mm_exact(sel, rep)                      # (N, H)
        emb = mask * replaced + (1.0 - mask) * emb

    # ---- 3) position / token-type embeddings + embedding LayerNorm ----
    # token-type: TYPE_VOCAB == 2 -> exact arithmetic select (no MXU).
    tt = tt_ref[...].astype(jnp.float32)                    # (N, 1)
    tok = (1.0 - tt) * tok_ref[0:1, :] + tt * tok_ref[1:2, :]
    pos = jnp.concatenate([pos_ref[0:seq, :]] * batch, axis=0)   # (N, H)
    x = _ln(emb + pos + tok, embg_ref[...], embb_ref[...])  # (N, H)

    h = n_heads * head_dim
    scale = 1.0 / (head_dim ** 0.5)

    # ---- 4) transformer layers: static loop, all weights VMEM-resident ----
    for lyr in range(n_layers):
        qkv = _mm(x, wqkv_ref[lyr]) + bqkv_ref[lyr]          # (N, 3H)
        q = qkv[:, 0:h]
        k = qkv[:, h:2 * h]
        vv = qkv[:, 2 * h:3 * h]
        wo = wo_ref[lyr]                                     # (H, H)
        chunks = []
        for bi in range(batch):                              # static, tiny
            r0, r1 = bi * seq, (bi + 1) * seq
            bias = (1.0 - amask_ref[bi]) * NEG_INF           # (1, S) key mask
            acc = bo_ref[lyr]                                # (1, H) broadcasts
            for hh in range(n_heads):                        # static, tiny
                c0, c1 = hh * head_dim, (hh + 1) * head_dim
                qh = q[r0:r1, c0:c1]
                kh = k[r0:r1, c0:c1]
                vh = vv[r0:r1, c0:c1]
                sc = _mm(qh, kh.T) * scale + bias            # (S, S)
                sc = sc - jnp.max(sc, axis=-1, keepdims=True)
                p = jnp.exp(sc)
                p = p / jnp.sum(p, axis=-1, keepdims=True)   # exact reciprocal
                ctx = _mm(p, vh)                             # (S, head_dim)
                # accumulate the per-head slice of the output projection
                acc = acc + _mm(ctx, wo[c0:c1, :])
            chunks.append(acc)                               # (S, H)
        attn_out = jnp.concatenate(chunks, axis=0)           # (N, H)
        x1 = _ln(x + attn_out, g1_ref[lyr], be1_ref[lyr])
        # TODO(synk): BERT reference GELU is erf-based; tanh approximation used
        # for robust Mosaic lowering.
        ff = jax.nn.gelu(_mm(x1, wfi_ref[lyr]) + bfi_ref[lyr],
                         approximate=True)
        x = _ln(x1 + (_mm(ff, wfo_ref[lyr]) + bfo_ref[lyr]),
                g2_ref[lyr], be2_ref[lyr])

    # ---- 5) MLM head: transform + GELU + LN + tied decoder (lane-dense V) ----
    hdn = jax.nn.gelu(_mm(x, wt_ref[...]) + bt_ref[...], approximate=True)
    hdn = _ln(hdn, mlng_ref[...], mlnb_ref[...])
    # decoder tied to the word-embedding table already resident in VMEM;
    # transpose happens in-kernel (no per-call XLA transpose HLO of word_emb).
    logits = _mm(hdn, word_ref[...].T) + db_ref[...]         # (N, V)
    logits_ref[...] = logits

    # ---- 6) masked cross-entropy fully reduced in-kernel ----
    labels = labels_ref[...]                                 # (N, 1) i32
    onehot_l = (iota_v == labels).astype(jnp.float32)
    picked = jnp.sum(onehot_l * logits, axis=-1, keepdims=True)
    m = jnp.max(logits, axis=-1, keepdims=True)
    lse = m + jnp.log(jnp.sum(jnp.exp(logits - m), axis=-1, keepdims=True))
    valid = (labels >= 0).astype(jnp.float32)                # ignore_index=-100
    per_tok = (lse - picked) * valid                         # (N, 1)
    ones = jnp.ones((1, n), jnp.float32)
    loss_sum = _mm_exact(ones, per_tok)                      # (1, 1)
    valid_sum = _mm_exact(ones, valid)                       # (1, 1)
    # TODO(synk): PyTorch CE returns NaN when every label is ignore_index; the
    # clamped denominator returns 0.0 instead.
    loss_ref[...] = loss_sum / jnp.maximum(valid_sum, 1.0)


# ------------------------------ parameters -----------------------------------


def _linear(key, fan_in, fan_out):
    return (0.02 * jax.random.normal(key, (fan_in, fan_out), jnp.float32),
            jnp.zeros((1, fan_out), jnp.float32))


def init_params(key):
    keys = iter(jax.random.split(key, 64))
    p = {}
    p["word_emb"] = 0.02 * jax.random.normal(next(keys), (VOCAB, HID), jnp.float32)
    p["pos_emb"] = 0.02 * jax.random.normal(next(keys), (MAX_POS, HID), jnp.float32)
    p["tok_emb"] = 0.02 * jax.random.normal(next(keys), (TYPE_VOCAB, HID), jnp.float32)
    p["emb_ln"] = (jnp.ones((1, HID), jnp.float32), jnp.zeros((1, HID), jnp.float32))

    per_layer = []
    for _ in range(N_LAYERS):
        wq, bq = _linear(next(keys), HID, HID)
        wk, bk = _linear(next(keys), HID, HID)
        wv, bv = _linear(next(keys), HID, HID)
        wo, bo = _linear(next(keys), HID, HID)
        wfi, bfi = _linear(next(keys), HID, FFN)
        wfo, bfo = _linear(next(keys), FFN, HID)
        per_layer.append({
            # Q/K/V fused into one (H, 3H) weight for a single MXU pass.
            "wqkv": jnp.concatenate([wq, wk, wv], axis=1),
            "bqkv": jnp.concatenate([bq, bk, bv], axis=1),
            "wo": wo, "bo": bo,
            "g1": jnp.ones((1, HID), jnp.float32),
            "be1": jnp.zeros((1, HID), jnp.float32),
            "wfi": wfi, "bfi": bfi, "wfo": wfo, "bfo": bfo,
            "g2": jnp.ones((1, HID), jnp.float32),
            "be2": jnp.zeros((1, HID), jnp.float32),
        })
    # Stack per-layer weights along a leading layer axis once at init time so
    # the single fused kernel receives them in one shot (static in-kernel loop).
    p["layers"] = {name: jnp.stack([d[name] for d in per_layer], axis=0)
                   for name in per_layer[0]}

    p["mlm_transform"] = _linear(next(keys), HID, HID)
    p["mlm_ln"] = (jnp.ones((1, HID), jnp.float32), jnp.zeros((1, HID), jnp.float32))
    p["mlm_bias"] = jnp.zeros((1, VOCAB), jnp.float32)

    # p-tuning specific params (prompt_embeddings, prompt_lstm, prompt_linear)
    p["prompt_emb"] = 0.02 * jax.random.normal(
        next(keys), (PROMPT_ROWS, HID), jnp.float32)
    lstm = []
    in_size = HID
    for _ in range(2):                      # num_layers = 2, bidirectional
        lyr = {}
        for d in ("fwd", "bwd"):
            wih = 0.1 * jax.random.normal(next(keys), (in_size, 4 * HID), jnp.float32)
            whh = 0.1 * jax.random.normal(next(keys), (HID, 4 * HID), jnp.float32)
            # TODO(synk): b_ih + b_hh folded into one bias; real checkpoints
            # must be loaded as their sum.
            b = jnp.zeros((1, 4 * HID), jnp.float32)
            lyr[d] = (wih, whh, b)
        lstm.append(lyr)
        in_size = 2 * HID
    p["lstm"] = lstm
    p["plin1"] = _linear(next(keys), 2 * HID, HID)
    p["plin2"] = _linear(next(keys), HID, HID)
    return p


# ------------------------------ forward pass ----------------------------------


def relm_ptuning_forward(params, input_ids, attention_mask=None,
                         token_type_ids=None, prompt_mask=None, labels=None,
                         apply_prompt=False):
    b, s = input_ids.shape
    n = b * s
    if attention_mask is None:
        attention_mask = jnp.ones((b, s), jnp.int32)
    if token_type_ids is None:
        token_type_ids = jnp.zeros((b, s), jnp.int32)
    if (prompt_mask is None) or (not apply_prompt):
        pmask_f = jnp.zeros((n, 1), jnp.float32)
    else:
        pmask_f = prompt_mask.astype(jnp.float32).reshape(n, 1)
    have_labels = labels is not None
    if have_labels:
        lbl = labels.astype(jnp.int32).reshape(n, 1)
    else:
        lbl = jnp.full((n, 1), -100, jnp.int32)

    ids2 = input_ids.astype(jnp.int32).reshape(n, 1)
    tt2 = token_type_ids.astype(jnp.int32).reshape(n, 1)
    amask3 = attention_mask.astype(jnp.float32).reshape(b, 1, s)

    kernel = functools.partial(
        _fused_forward_kernel,
        batch=b, seq=s, hidden=HID, n_layers=N_LAYERS, n_heads=N_HEADS,
        head_dim=HEAD_DIM, prompt_rows=PROMPT_ROWS,
        apply_prompt=bool(apply_prompt))

    lw = params["lstm"]
    ly = params["layers"]
    args = (
        ids2, tt2, pmask_f, amask3, lbl,
        params["word_emb"], params["tok_emb"], params["pos_emb"],
        params["emb_ln"][0], params["emb_ln"][1],
        params["prompt_emb"],
        lw[0]["fwd"][0], lw[0]["fwd"][1], lw[0]["fwd"][2],
        lw[0]["bwd"][0], lw[0]["bwd"][1], lw[0]["bwd"][2],
        lw[1]["fwd"][0], lw[1]["fwd"][1], lw[1]["fwd"][2],
        lw[1]["bwd"][0], lw[1]["bwd"][1], lw[1]["bwd"][2],
        params["plin1"][0], params["plin1"][1],
        params["plin2"][0], params["plin2"][1],
        ly["wqkv"], ly["bqkv"], ly["wo"], ly["bo"], ly["g1"], ly["be1"],
        ly["wfi"], ly["bfi"], ly["wfo"], ly["bfo"], ly["g2"], ly["be2"],
        params["mlm_transform"][0], params["mlm_transform"][1],
        params["mlm_ln"][0], params["mlm_ln"][1], params["mlm_bias"],
    )

    vmem_spec = pl.BlockSpec(memory_space=pltpu.MemorySpace.VMEM)
    logits, loss = pl.pallas_call(
        kernel,
        in_specs=[vmem_spec] * len(args),
        out_specs=(vmem_spec, vmem_spec),
        out_shape=(jax.ShapeDtypeStruct((n, VOCAB), jnp.float32),
                   jax.ShapeDtypeStruct((1, 1), jnp.float32)),
    )(*args)

    logits = logits.reshape(b, s, VOCAB)
    return {"loss": (loss[0, 0] if have_labels else None), "logits": logits}


# ------------------------------ demo ------------------------------------------

if __name__ == "__main__":
    key = jax.random.PRNGKey(0)
    pkey, dkey = jax.random.split(key)
    params = init_params(pkey)

    B, S = 2, 8
    input_ids = jax.random.randint(dkey, (B, S), 0, VOCAB, dtype=jnp.int32)
    attention_mask = jnp.ones((B, S), jnp.int32)
    token_type_ids = jnp.zeros((B, S), jnp.int32)
    # exactly 2*prompt_length prompt positions per row (the .nonzero().reshape
    # in the torch code requires this)
    prompt_mask = jnp.zeros((B, S), jnp.int32).at[:, 1:1 + PROMPT_ROWS].set(1)
    labels = jnp.where(attention_mask == 1, input_ids, -100)

    fwd = jax.jit(relm_ptuning_forward, static_argnames=("apply_prompt",))
    out = fwd(params, input_ids, attention_mask, token_type_ids,
              prompt_mask, labels, apply_prompt=True)
    jax.block_until_ready(out["logits"])
    jax.block_until_ready(out["loss"])
    print("KERNEL_OK")
</pallas_src>

<mosaic_0001>
module attributes {stable_mosaic.version = 11 : i64} {
  func.func @_fused_forward_kernel(%arg0: memref<16x1xi32, #tpu.memory_space<vmem>>, %arg1: memref<16x1xi32, #tpu.memory_space<vmem>>, %arg2: memref<16x1xf32, #tpu.memory_space<vmem>>, %arg3: memref<2x1x8xf32, #tpu.memory_space<vmem>>, %arg4: memref<16x1xi32, #tpu.memory_space<vmem>>, %arg5: memref<128x32xf32, #tpu.memory_space<vmem>>, %arg6: memref<2x32xf32, #tpu.memory_space<vmem>>, %arg7: memref<64x32xf32, #tpu.memory_space<vmem>>, %arg8: memref<1x32xf32, #tpu.memory_space<vmem>>, %arg9: memref<1x32xf32, #tpu.memory_space<vmem>>, %arg10: memref<2x32xf32, #tpu.memory_space<vmem>>, %arg11: memref<32x128xf32, #tpu.memory_space<vmem>>, %arg12: memref<32x128xf32, #tpu.memory_space<vmem>>, %arg13: memref<1x128xf32, #tpu.memory_space<vmem>>, %arg14: memref<32x128xf32, #tpu.memory_space<vmem>>, %arg15: memref<32x128xf32, #tpu.memory_space<vmem>>, %arg16: memref<1x128xf32, #tpu.memory_space<vmem>>, %arg17: memref<64x128xf32, #tpu.memory_space<vmem>>, %arg18: memref<32x128xf32, #tpu.memory_space<vmem>>, %arg19: memref<1x128xf32, #tpu.memory_space<vmem>>, %arg20: memref<64x128xf32, #tpu.memory_space<vmem>>, %arg21: memref<32x128xf32, #tpu.memory_space<vmem>>, %arg22: memref<1x128xf32, #tpu.memory_space<vmem>>, %arg23: memref<64x32xf32, #tpu.memory_space<vmem>>, %arg24: memref<1x32xf32, #tpu.memory_space<vmem>>, %arg25: memref<32x32xf32, #tpu.memory_space<vmem>>, %arg26: memref<1x32xf32, #tpu.memory_space<vmem>>, %arg27: memref<2x32x96xf32, #tpu.memory_space<vmem>>, %arg28: memref<2x1x96xf32, #tpu.memory_space<vmem>>, %arg29: memref<2x32x32xf32, #tpu.memory_space<vmem>>, %arg30: memref<2x1x32xf32, #tpu.memory_space<vmem>>, %arg31: memref<2x1x32xf32, #tpu.memory_space<vmem>>, %arg32: memref<2x1x32xf32, #tpu.memory_space<vmem>>, %arg33: memref<2x32x64xf32, #tpu.memory_space<vmem>>, %arg34: memref<2x1x64xf32, #tpu.memory_space<vmem>>, %arg35: memref<2x64x32xf32, #tpu.memory_space<vmem>>, %arg36: memref<2x1x32xf32, #tpu.memory_space<vmem>>, %arg37: memref<2x1x32xf32, #tpu.memory_space<vmem>>, %arg38: memref<2x1x32xf32, #tpu.memory_space<vmem>>, %arg39: memref<32x32xf32, #tpu.memory_space<vmem>>, %arg40: memref<1x32xf32, #tpu.memory_space<vmem>>, %arg41: memref<1x32xf32, #tpu.memory_space<vmem>>, %arg42: memref<1x32xf32, #tpu.memory_space<vmem>>, %arg43: memref<1x128xf32, #tpu.memory_space<vmem>>, %arg44: memref<16x128xf32, #tpu.memory_space<vmem>>, %arg45: memref<1x1xf32, #tpu.memory_space<vmem>>) attributes {dimension_semantics = [], scalar_prefetch = 0 : i64, scratch_operands = 0 : i64, tpu.core_type = #tpu.core_type<tc>} {
    %c0 = arith.constant 0 : index
    %c0_0 = arith.constant 0 : index
    %0 = vector.load %arg0[%c0, %c0_0] : memref<16x1xi32, #tpu.memory_space<vmem>>, vector<16x1xi32>
    %1 = tpu.iota {dimensions = array<i32: 1>} : vector<16x128xi32>
    %2 = vector.broadcast %0 : vector<16x1xi32> to vector<16x128xi32>
    %3 = arith.cmpi eq, %1, %2 : vector<16x128xi32>
    %4 = arith.extui %3 : vector<16x128xi1> to vector<16x128xi32>
    %5 = arith.sitofp %4 : vector<16x128xi32> to vector<16x128xf32>
    %c0_1 = arith.constant 0 : index
    %c0_2 = arith.constant 0 : index
    %6 = vector.load %arg5[%c0_1, %c0_2] : memref<128x32xf32, #tpu.memory_space<vmem>>, vector<128x32xf32>
    %cst = arith.constant dense<0.000000e+00> : vector<16x32xf32>
    %7 = tpu.matmul %5, %6, %cst {dimension_numbers = #tpu.dot_dimension_numbers<[1], [0], [0], [1], [0, 0, 1, 1], [], []>} : vector<16x128xf32>, vector<128x32xf32>, vector<16x32xf32> -> vector<16x32xf32>
    %c0_3 = arith.constant 0 : index
    %c0_4 = arith.constant 0 : index
    %8 = vector.load %arg11[%c0_3, %c0_4] : memref<32x128xf32, #tpu.memory_space<vmem>>, vector<32x128xf32>
    %c0_5 = arith.constant 0 : index
    %c0_6 = arith.constant 0 : index
    %9 = vector.load %arg12[%c0_5, %c0_6] : memref<32x128xf32, #tpu.memory_space<vmem>>, vector<32x128xf32>
    %c0_7 = arith.constant 0 : index
    %c0_8 = arith.constant 0 : index
    %10 = vector.load %arg13[%c0_7, %c0_8] : memref<1x128xf32, #tpu.memory_space<vmem>>, vector<1x128xf32>
    %c0_9 = arith.constant 0 : index
    %c0_10 = arith.constant 0 : index
    %11 = vector.load %arg14[%c0_9, %c0_10] : memref<32x128xf32, #tpu.memory_space<vmem>>, vector<32x128xf32>
    %c0_11 = arith.constant 0 : index
    %c0_12 = arith.constant 0 : index
    %12 = vector.load %arg15[%c0_11, %c0_12] : memref<32x128xf32, #tpu.memory_space<vmem>>, vector<32x128xf32>
    %c0_13 = arith.constant 0 : index
    %c0_14 = arith.constant 0 : index
    %13 = vector.load %arg16[%c0_13, %c0_14] : memref<1x128xf32, #tpu.memory_space<vmem>>, vector<1x128xf32>
    %c0_15 = arith.constant 0 : index
    %c0_16 = arith.constant 0 : index
    %14 = vector.load %arg17[%c0_15, %c0_16] : memref<64x128xf32, #tpu.memory_space<vmem>>, vector<64x128xf32>
    %c0_17 = arith.constant 0 : index
    %c0_18 = arith.constant 0 : index
    %15 = vector.load %arg18[%c0_17, %c0_18] : memref<32x128xf32, #tpu.memory_space<vmem>>, vector<32x128xf32>
    %c0_19 = arith.constant 0 : index
    %c0_20 = arith.constant 0 : index
    %16 = vector.load %arg19[%c0_19, %c0_20] : memref<1x128xf32, #tpu.memory_space<vmem>>, vector<1x128xf32>
    %c0_21 = arith.constant 0 : index
    %c0_22 = arith.constant 0 : index
    %17 = vector.load %arg20[%c0_21, %c0_22] : memref<64x128xf32, #tpu.memory_space<vmem>>, vector<64x128xf32>
    %c0_23 = arith.constant 0 : index
    %c0_24 = arith.constant 0 : index
    %18 = vector.load %arg21[%c0_23, %c0_24] : memref<32x128xf32, #tpu.memory_space<vmem>>, vector<32x128xf32>
    %c0_25 = arith.constant 0 : index
    %c0_26 = arith.constant 0 : index
    %19 = vector.load %arg22[%c0_25, %c0_26] : memref<1x128xf32, #tpu.memory_space<vmem>>, vector<1x128xf32>
    %c0_27 = arith.constant 0 : index
    %c0_28 = arith.constant 0 : index
    %20 = vector.load %arg10[%c0_27, %c0_28] : memref<2x32xf32, #tpu.memory_space<vmem>>, vector<2x32xf32>
    %c0_29 = arith.constant 0 : index
    %c0_30 = arith.constant 0 : index
    %21 = vector.load %arg23[%c0_29, %c0_30] : memref<64x32xf32, #tpu.memory_space<vmem>>, vector<64x32xf32>
    %c0_31 = arith.constant 0 : index
    %c0_32 = arith.constant 0 : index
    %22 = vector.load %arg24[%c0_31, %c0_32] : memref<1x32xf32, #tpu.memory_space<vmem>>, vector<1x32xf32>
    %c0_33 = arith.constant 0 : index
    %c0_34 = arith.constant 0 : index
    %23 = vector.load %arg25[%c0_33, %c0_34] : memref<32x32xf32, #tpu.memory_space<vmem>>, vector<32x32xf32>
    %c0_35 = arith.constant 0 : index
    %c0_36 = arith.constant 0 : index
    %24 = vector.load %arg26[%c0_35, %c0_36] : memref<1x32xf32, #tpu.memory_space<vmem>>, vector<1x32xf32>
    %25 = vector.extract_strided_slice %20 {offsets = [0, 0], sizes = [1, 32], strides = [1, 1]} : vector<2x32xf32> to vector<1x32xf32>
    %26 = vector.extract_strided_slice %20 {offsets = [1, 0], sizes = [1, 32], strides = [1, 1]} : vector<2x32xf32> to vector<1x32xf32>
    %cst_37 = arith.constant 0.000000e+00 : f32
    %27 = vector.broadcast %cst_37 : f32 to vector<1x32xf32>
    %cst_38 = arith.constant 0.000000e+00 : f32
    %28 = vector.broadcast %cst_38 : f32 to vector<1x32xf32>
    %cst_39 = arith.constant dense<0.000000e+00> : vector<1x128xf32>
    %29 = tpu.matmul %25, %8, %cst_39 {dimension_numbers = #tpu.dot_dimension_numbers<[1], [0], [0], [1], [0, 0, 1, 1], [], []>} : vector<1x32xf32>, vector<32x128xf32>, vector<1x128xf32> -> vector<1x128xf32>
    %cst_40 = arith.constant dense<0.000000e+00> : vector<1x128xf32>
    %30 = tpu.matmul %27, %9, %cst_40 {dimension_numbers = #tpu.dot_dimension_numbers<[1], [0], [0], [1], [0, 0, 1, 1], [], []>} : vector<1x32xf32>, vector<32x128xf32>, vector<1x128xf32> -> vector<1x128xf32>
    %31 = arith.addf %29, %30 : vector<1x128xf32>
    %32 = arith.addf %31, %10 : vector<1x128xf32>
    %33 = vector.extract_strided_slice %32 {offsets = [0, 0], sizes = [1, 32], strides = [1, 1]} : vector<1x128xf32> to vector<1x32xf32>
    %34 = arith.negf %33 : vector<1x32xf32>
    %35 = math.exp %34 : vector<1x32xf32>
    %cst_41 = arith.constant 1.000000e+00 : f32
    %36 = vector.broadcast %cst_41 : f32 to vector<1x32xf32>
    %37 = arith.addf %36, %35 : vector<1x32xf32>
    %38 = arith.divf %36, %37 : vector<1x32xf32>
    %39 = vector.extract_strided_slice %32 {offsets = [0, 32], sizes = [1, 32], strides = [1, 1]} : vector<1x128xf32> to vector<1x32xf32>
    %40 = arith.negf %39 : vector<1x32xf32>
    %41 = math.exp %40 : vector<1x32xf32>
    %cst_42 = arith.constant 1.000000e+00 : f32
    %42 = vector.broadcast %cst_42 : f32 to vector<1x32xf32>
    %43 = arith.addf %42, %41 : vector<1x32xf32>
    %44 = arith.divf %42, %43 : vector<1x32xf32>
    %45 = vector.extract_strided_slice %32 {offsets = [0, 64], sizes = [1, 32], strides = [1, 1]} : vector<1x128xf32> to vector<1x32xf32>
    %46 = math.tanh %45 : vector<1x32xf32>
    %47 = vector.extract_strided_slice %32 {offsets = [0, 96], sizes = [1, 32], strides = [1, 1]} : vector<1x128xf32> to vector<1x32xf32>
    %48 = arith.negf %47 : vector<1x32xf32>
    %49 = math.exp %48 : vector<1x32xf32>
    %cst_43 = arith.constant 1.000000e+00 : f32
    %50 = vector.broadcast %cst_43 : f32 to vector<1x32xf32>
    %51 = arith.addf %50, %49 : vector<1x32xf32>
    %52 = arith.divf %50, %51 : vector<1x32xf32>
    %53 = arith.mulf %44, %28 : vector<1x32xf32>
    %54 = arith.mulf %38, %46 : vector<1x32xf32>
    %55 = arith.addf %53, %54 : vector<1x32xf32>
    %56 = math.tanh %55 : vector<1x32xf32>
    %57 = arith.mulf %52, %56 : vector<1x32xf32>
    %cst_44 = arith.constant dense<0.000000e+00> : vector<1x128xf32>
    %58 = tpu.matmul %26, %8, %cst_44 {dimension_numbers = #tpu.dot_dimension_numbers<[1], [0], [0], [1], [0, 0, 1, 1], [], []>} : vector<1x32xf32>, vector<32x128xf32>, vector<1x128xf32> -> vector<1x128xf32>
    %cst_45 = arith.constant dense<0.000000e+00> : vector<1x128xf32>
    %59 = tpu.matmul %57, %9, %cst_45 {dimension_numbers = #tpu.dot_dimension_numbers<[1], [0], [0], [1], [0, 0, 1, 1], [], []>} : vector<1x32xf32>, vector<32x128xf32>, vector<1x128xf32> -> vector<1x128xf32>
    %60 = arith.addf %58, %59 : vector<1x128xf32>
    %61 = arith.addf %60, %10 : vector<1x128xf32>
    %62 = vector.extract_strided_slice %61 {offsets = [0, 0], sizes = [1, 32], strides = [1, 1]} : vector<1x128xf32> to vector<1x32xf32>
    %63 = arith.negf %62 : vector<1x32xf32>
    %64 = math.exp %63 : vector<1x32xf32>
    %cst_46 = arith.constant 1.000000e+00 : f32
    %65 = vector.broadcast %cst_46 : f32 to vector<1x32xf32>
    %66 = arith.addf %65, %64 : vector<1x32xf32>
    %67 = arith.divf %65, %66 : vector<1x32xf32>
    %68 = vector.extract_strided_slice %61 {offsets = [0, 32], sizes = [1, 32], strides = [1, 1]} : vector<1x128xf32> to vector<1x32xf32>
    %69 = arith.negf %68 : vector<1x32xf32>
    %70 = math.exp %69 : vector<1x32xf32>
    %cst_47 = arith.constant 1.000000e+00 : f32
    %71 = vector.broadcast %cst_47 : f32 to vector<1x32xf32>
    %72 = arith.addf %71, %70 : vector<1x32xf32>
    %73 = arith.divf %71, %72 : vector<1x32xf32>
    %74 = vector.extract_strided_slice %61 {offsets = [0, 64], sizes = [1, 32], strides = [1, 1]} : vector<1x128xf32> to vector<1x32xf32>
    %75 = math.tanh %74 : vector<1x32xf32>
    %76 = vector.extract_strided_slice %61 {offsets = [0, 96], sizes = [1, 32], strides = [1, 1]} : vector<1x128xf32> to vector<1x32xf32>
    %77 = arith.negf %76 : vector<1x32xf32>
    %78 = math.exp %77 : vector<1x32xf32>
    %cst_48 = arith.constant 1.000000e+00 : f32
    %79 = vector.broadcast %cst_48 : f32 to vector<1x32xf32>
    %80 = arith.addf %79, %78 : vector<1x32xf32>
    %81 = arith.divf %79, %80 : vector<1x32xf32>
    %82 = arith.mulf %73, %55 : vector<1x32xf32>
    %83 = arith.mulf %67, %75 : vector<1x32xf32>
    %84 = arith.addf %82, %83 : vector<1x32xf32>
    %85 = math.tanh %84 : vector<1x32xf32>
    %86 = arith.mulf %81, %85 : vector<1x32xf32>
    %cst_49 = arith.constant 0.000000e+00 : f32
    %87 = vector.broadcast %cst_49 : f32 to vector<1x32xf32>
    %cst_50 = arith.constant 0.000000e+00 : f32
    %88 = vector.broadcast %cst_50 : f32 to vector<1x32xf32>
    %cst_51 = arith.constant dense<0.000000e+00> : vector<1x128xf32>
    %89 = tpu.matmul %26, %11, %cst_51 {dimension_numbers = #tpu.dot_dimension_numbers<[1], [0], [0], [1], [0, 0, 1, 1], [], []>} : vector<1x32xf32>, vector<32x128xf32>, vector<1x128xf32> -> vector<1x128xf32>
    %cst_52 = arith.constant dense<0.000000e+00> : vector<1x128xf32>
    %90 = tpu.matmul %87, %12, %cst_52 {dimension_numbers = #tpu.dot_dimension_numbers<[1], [0], [0], [1], [0, 0, 1, 1], [], []>} : vector<1x32xf32>, vector<32x128xf32>, vector<1x128xf32> -> vector<1x128xf32>
    %91 = arith.addf %89, %90 : vector<1x128xf32>
    %92 = arith.addf %91, %13 : vector<1x128xf32>
    %93 = vector.extract_strided_slice %92 {offsets = [0, 0], sizes = [1, 32], strides = [1, 1]} : vector<1x128xf32> to vector<1x32xf32>
    %94 = arith.negf %93 : vector<1x32xf32>
    %95 = math.exp %94 : vector<1x32xf32>
    %cst_53 = arith.constant 1.000000e+00 : f32
    %96 = vector.broadcast %cst_53 : f32 to vector<1x32xf32>
    %97 = arith.addf %96, %95 : vector<1x32xf32>
    %98 = arith.divf %96, %97 : vector<1x32xf32>
    %99 = vector.extract_strided_slice %92 {offsets = [0, 32], sizes = [1, 32], strides = [1, 1]} : vector<1x128xf32> to vector<1x32xf32>
    %100 = arith.negf %99 : vector<1x32xf32>
    %101 = math.exp %100 : vector<1x32xf32>
    %cst_54 = arith.constant 1.000000e+00 : f32
    %102 = vector.broadcast %cst_54 : f32 to vector<1x32xf32>
    %103 = arith.addf %102, %101 : vector<1x32xf32>
    %104 = arith.divf %102, %103 : vector<1x32xf32>
    %105 = vector.extract_strided_slice %92 {offsets = [0, 64], sizes = [1, 32], strides = [1, 1]} : vector<1x128xf32> to vector<1x32xf32>
    %106 = math.tanh %105 : vector<1x32xf32>
    %107 = vector.extract_strided_slice %92 {offsets = [0, 96], sizes = [1, 32], strides = [1, 1]} : vector<1x128xf32> to vector<1x32xf32>
    %108 = arith.negf %107 : vector<1x32xf32>
    %109 = math.exp %108 : vector<1x32xf32>
    %cst_55 = arith.constant 1.000000e+00 : f32
    %110 = vector.broadcast %cst_55 : f32 to vector<1x32xf32>
    %111 = arith.addf %110, %109 : vector<1x32xf32>
    %112 = arith.divf %110, %111 : vector<1x32xf32>
    %113 = arith.mulf %104, %88 : vector<1x32xf32>
    %114 = arith.mulf %98, %106 : vector<1x32xf32>
    %115 = arith.addf %113, %114 : vector<1x32xf32>
    %116 = math.tanh %115 : vector<1x32xf32>
    %117 = arith.mulf %112, %116 : vector<1x32xf32>
    %cst_56 = arith.constant dense<0.000000e+00> : vector<1x128xf32>
    %118 = tpu.matmul %25, %11, %cst_56 {dimension_numbers = #tpu.dot_dimension_numbers<[1], [0], [0], [1], [0, 0, 1, 1], [], []>} : vector<1x32xf32>, vector<32x128xf32>, vector<1x128xf32> -> vector<1x128xf32>
    %cst_57 = arith.constant dense<0.000000e+00> : vector<1x128xf32>
    %119 = tpu.matmul %117, %12, %cst_57 {dimension_numbers = #tpu.dot_dimension_numbers<[1], [0], [0], [1], [0, 0, 1, 1], [], []>} : vector<1x32xf32>, vector<32x128xf32>, vector<1x128xf32> -> vector<1x128xf32>
    %120 = arith.addf %118, %119 : vector<1x128xf32>
    %121 = arith.addf %120, %13 : vector<1x128xf32>
    %122 = vector.extract_strided_slice %121 {offsets = [0, 0], sizes = [1, 32], strides = [1, 1]} : vector<1x128xf32> to vector<1x32xf32>
    %123 = arith.negf %122 : vector<1x32xf32>
    %124 = math.exp %123 : vector<1x32xf32>
    %cst_58 = arith.constant 1.000000e+00 : f32
    %125 = vector.broadcast %cst_58 : f32 to vector<1x32xf32>
    %126 = arith.addf %125, %124 : vector<1x32xf32>
    %127 = arith.divf %125, %126 : vector<1x32xf32>
    %128 = vector.extract_strided_slice %121 {offsets = [0, 32], sizes = [1, 32], strides = [1, 1]} : vector<1x128xf32> to vector<1x32xf32>
    %129 = arith.negf %128 : vector<1x32xf32>
    %130 = math.exp %129 : vector<1x32xf32>
    %cst_59 = arith.constant 1.000000e+00 : f32
    %131 = vector.broadcast %cst_59 : f32 to vector<1x32xf32>
    %132 = arith.addf %131, %130 : vector<1x32xf32>
    %133 = arith.divf %131, %132 : vector<1x32xf32>
    %134 = vector.extract_strided_slice %121 {offsets = [0, 64], sizes = [1, 32], strides = [1, 1]} : vector<1x128xf32> to vector<1x32xf32>
    %135 = math.tanh %134 : vector<1x32xf32>
    %136 = vector.extract_strided_slice %121 {offsets = [0, 96], sizes = [1, 32], strides = [1, 1]} : vector<1x128xf32> to vector<1x32xf32>
    %137 = arith.negf %136 : vector<1x32xf32>
    %138 = math.exp %137 : vector<1x32xf32>
    %cst_60 = arith.constant 1.000000e+00 : f32
    %139 = vector.broadcast %cst_60 : f32 to vector<1x32xf32>
    %140 = arith.addf %139, %138 : vector<1x32xf32>
    %141 = arith.divf %139, %140 : vector<1x32xf32>
    %142 = arith.mulf %133, %115 : vector<1x32xf32>
    %143 = arith.mulf %127, %135 : vector<1x32xf32>
    %144 = arith.addf %142, %143 : vector<1x32xf32>
    %145 = math.tanh %144 : vector<1x32xf32>
    %146 = arith.mulf %141, %145 : vector<1x32xf32>
    %147 = tpu.concatenate %57, %146 in 1 : vector<1x32xf32>, vector<1x32xf32> -> vector<1x64xf32>
    %148 = tpu.concatenate %86, %117 in 1 : vector<1x32xf32>, vector<1x32xf32> -> vector<1x64xf32>
    %cst_61 = arith.constant 0.000000e+00 : f32
    %149 = vector.broadcast %cst_61 : f32 to vector<1x32xf32>
    %cst_62 = arith.constant 0.000000e+00 : f32
    %150 = vector.broadcast %cst_62 : f32 to vector<1x32xf32>
    %cst_63 = arith.constant dense<0.000000e+00> : vector<1x128xf32>
    %151 = tpu.matmul %147, %14, %cst_63 {dimension_numbers = #tpu.dot_dimension_numbers<[1], [0], [0], [1], [0, 0, 1, 1], [], []>} : vector<1x64xf32>, vector<64x128xf32>, vector<1x128xf32> -> vector<1x128xf32>
    %cst_64 = arith.constant dense<0.000000e+00> : vector<1x128xf32>
    %152 = tpu.matmul %149, %15, %cst_64 {dimension_numbers = #tpu.dot_dimension_numbers<[1], [0], [0], [1], [0, 0, 1, 1], [], []>} : vector<1x32xf32>, vector<32x128xf32>, vector<1x128xf32> -> vector<1x128xf32>
    %153 = arith.addf %151, %152 : vector<1x128xf32>
    %154 = arith.addf %153, %16 : vector<1x128xf32>
    %155 = vector.extract_strided_slice %154 {offsets = [0, 0], sizes = [1, 32], strides = [1, 1]} : vector<1x128xf32> to vector<1x32xf32>
    %156 = arith.negf %155 : vector<1x32xf32>
    %157 = math.exp %156 : vector<1x32xf32>
    %cst_65 = arith.constant 1.000000e+00 : f32
    %158 = vector.broadcast %cst_65 : f32 to vector<1x32xf32>
    %159 = arith.addf %158, %157 : vector<1x32xf32>
    %160 = arith.divf %158, %159 : vector<1x32xf32>
    %161 = vector.extract_strided_slice %154 {offsets = [0, 32], sizes = [1, 32], strides = [1, 1]} : vector<1x128xf32> to vector<1x32xf32>
    %162 = arith.negf %161 : vector<1x32xf32>
    %163 = math.exp %162 : vector<1x32xf32>
    %cst_66 = arith.constant 1.000000e+00 : f32
    %164 = vector.broadcast %cst_66 : f32 to vector<1x32xf32>
    %165 = arith.addf %164, %163 : vector<1x32xf32>
    %166 = arith.divf %164, %165 : vector<1x32xf32>
    %167 = vector.extract_strided_slice %154 {offsets = [0, 64], sizes = [1, 32], strides = [1, 1]} : vector<1x128xf32> to vector<1x32xf32>
    %168 = math.tanh %167 : vector<1x32xf32>
    %169 = vector.extract_strided_slice %154 {offsets = [0, 96], sizes = [1, 32], strides = [1, 1]} : vector<1x128xf32> to vector<1x32xf32>
    %170 = arith.negf %169 : vector<1x32xf32>
    %171 = math.exp %170 : vector<1x32xf32>
    %cst_67 = arith.constant 1.000000e+00 : f32
    %172 = vector.broadcast %cst_67 : f32 to vector<1x32xf32>
    %173 = arith.addf %172, %171 : vector<1x32xf32>
    %174 = arith.divf %172, %173 : vector<1x32xf32>
    %175 = arith.mulf %166, %150 : vector<1x32xf32>
    %176 = arith.mulf %160, %168 : vector<1x32xf32>
    %177 = arith.addf %175, %176 : vector<1x32xf32>
    %178 = math.tanh %177 : vector<1x32xf32>
    %179 = arith.mulf %174, %178 : vector<1x32xf32>
    %cst_68 = arith.constant dense<0.000000e+00> : vector<1x128xf32>
    %180 = tpu.matmul %148, %14, %cst_68 {dimension_numbers = #tpu.dot_dimension_numbers<[1], [0], [0], [1], [0, 0, 1, 1], [], []>} : vector<1x64xf32>, vector<64x128xf32>, vector<1x128xf32> -> vector<1x128xf32>
    %cst_69 = arith.constant dense<0.000000e+00> : vector<1x128xf32>
    %181 = tpu.matmul %179, %15, %cst_69 {dimension_numbers = #tpu.dot_dimension_numbers<[1], [0], [0], [1], [0, 0, 1, 1], [], []>} : vector<1x32xf32>, vector<32x128xf32>, vector<1x128xf32> -> vector<1x128xf32>
    %182 = arith.addf %180, %181 : vector<1x128xf32>
    %183 = arith.addf %182, %16 : vector<1x128xf32>
    %184 = vector.extract_strided_slice %183 {offsets = [0, 0], sizes = [1, 32], strides = [1, 1]} : vector<1x128xf32> to vector<1x32xf32>
    %185 = arith.negf %184 : vector<1x32xf32>
    %186 = math.exp %185 : vector<1x32xf32>
    %cst_70 = arith.constant 1.000000e+00 : f32
    %187 = vector.broadcast %cst_70 : f32 to vector<1x32xf32>
    %188 = arith.addf %187, %186 : vector<1x32xf32>
    %189 = arith.divf %187, %188 : vector<1x32xf32>
    %190 = vector.extract_strided_slice %183 {offsets = [0, 32], sizes = [1, 32], strides = [1, 1]} : vector<1x128xf32> to vector<1x32xf32>
    %191 = arith.negf %190 : vector<1x32xf32>
    %192 = math.exp %191 : vector<1x32xf32>
    %cst_71 = arith.constant 1.000000e+00 : f32
    %193 = vector.broadcast %cst_71 : f32 to vector<1x32xf32>
    %194 = arith.addf %193, %192 : vector<1x32xf32>
    %195 = arith.divf %193, %194 : vector<1x32xf32>
    %196 = vector.extract_strided_slice %183 {offsets = [0, 64], sizes = [1, 32], strides = [1, 1]} : vector<1x128xf32> to vector<1x32xf32>
    %197 = math.tanh %196 : vector<1x32xf32>
    %198 = vector.extract_strided_slice %183 {offsets = [0, 96], sizes = [1, 32], strides = [1, 1]} : vector<1x128xf32> to vector<1x32xf32>
    %199 = arith.negf %198 : vector<1x32xf32>
    %200 = math.exp %199 : vector<1x32xf32>
    %cst_72 = arith.constant 1.000000e+00 : f32
    %201 = vector.broadcast %cst_72 : f32 to vector<1x32xf32>
    %202 = arith.addf %201, %200 : vector<1x32xf32>
    %203 = arith.divf %201, %202 : vector<1x32xf32>
    %204 = arith.mulf %195, %177 : vector<1x32xf32>
    %205 = arith.mulf %189, %197 : vector<1x32xf32>
    %206 = arith.addf %204, %205 : vector<1x32xf32>
    %207 = math.tanh %206 : vector<1x32xf32>
    %208 = arith.mulf %203, %207 : vector<1x32xf32>
    %cst_73 = arith.constant 0.000000e+00 : f32
    %209 = vector.broadcast %cst_73 : f32 to vector<1x32xf32>
    %cst_74 = arith.constant 0.000000e+00 : f32
    %210 = vector.broadcast %cst_74 : f32 to vector<1x32xf32>
    %cst_75 = arith.constant dense<0.000000e+00> : vector<1x128xf32>
    %211 = tpu.matmul %148, %17, %cst_75 {dimension_numbers = #tpu.dot_dimension_numbers<[1], [0], [0], [1], [0, 0, 1, 1], [], []>} : vector<1x64xf32>, vector<64x128xf32>, vector<1x128xf32> -> vector<1x128xf32>
    %cst_76 = arith.constant dense<0.000000e+00> : vector<1x128xf32>
    %212 = tpu.matmul %209, %18, %cst_76 {dimension_numbers = #tpu.dot_dimension_numbers<[1], [0], [0], [1], [0, 0, 1, 1], [], []>} : vector<1x32xf32>, vector<32x128xf32>, vector<1x128xf32> -> vector<1x128xf32>
    %213 = arith.addf %211, %212 : vector<1x128xf32>
    %214 = arith.addf %213, %19 : vector<1x128xf32>
    %215 = vector.extract_strided_slice %214 {offsets = [0, 0], sizes = [1, 32], strides = [1, 1]} : vector<1x128xf32> to vector<1x32xf32>
    %216 = arith.negf %215 : vector<1x32xf32>
    %217 = math.exp %216 : vector<1x32xf32>
    %cst_77 = arith.constant 1.000000e+00 : f32
    %218 = vector.broadcast %cst_77 : f32 to vector<1x32xf32>
    %219 = arith.addf %218, %217 : vector<1x32xf32>
    %220 = arith.divf %218, %219 : vector<1x32xf32>
    %221 = vector.extract_strided_slice %214 {offsets = [0, 32], sizes = [1, 32], strides = [1, 1]} : vector<1x128xf32> to vector<1x32xf32>
    %222 = arith.negf %221 : vector<1x32xf32>
    %223 = math.exp %222 : vector<1x32xf32>
    %cst_78 = arith.constant 1.000000e+00 : f32
    %224 = vector.broadcast %cst_78 : f32 to vector<1x32xf32>
    %225 = arith.addf %224, %223 : vector<1x32xf32>
    %226 = arith.divf %224, %225 : vector<1x32xf32>
    %227 = vector.extract_strided_slice %214 {offsets = [0, 64], sizes = [1, 32], strides = [1, 1]} : vector<1x128xf32> to vector<1x32xf32>
    %228 = math.tanh %227 : vector<1x32xf32>
    %229 = vector.extract_strided_slice %214 {offsets = [0, 96], sizes = [1, 32], strides = [1, 1]} : vector<1x128xf32> to vector<1x32xf32>
    %230 = arith.negf %229 : vector<1x32xf32>
    %231 = math.exp %230 : vector<1x32xf32>
    %cst_79 = arith.constant 1.000000e+00 : f32
    %232 = vector.broadcast %cst_79 : f32 to vector<1x32xf32>
    %233 = arith.addf %232, %231 : vector<1x32xf32>
    %234 = arith.divf %232, %233 : vector<1x32xf32>
    %235 = arith.mulf %226, %210 : vector<1x32xf32>
    %236 = arith.mulf %220, %228 : vector<1x32xf32>
    %237 = arith.addf %235, %236 : vector<1x32xf32>
    %238 = math.tanh %237 : vector<1x32xf32>
    %239 = arith.mulf %234, %238 : vector<1x32xf32>
    %cst_80 = arith.constant dense<0.000000e+00> : vector<1x128xf32>
    %240 = tpu.matmul %147, %17, %cst_80 {dimension_numbers = #tpu.dot_dimension_numbers<[1], [0], [0], [1], [0, 0, 1, 1], [], []>} : vector<1x64xf32>, vector<64x128xf32>, vector<1x128xf32> -> vector<1x128xf32>
    %cst_81 = arith.constant dense<0.000000e+00> : vector<1x128xf32>
    %241 = tpu.matmul %239, %18, %cst_81 {dimension_numbers = #tpu.dot_dimension_numbers<[1], [0], [0], [1], [0, 0, 1, 1], [], []>} : vector<1x32xf32>, vector<32x128xf32>, vector<1x128xf32> -> vector<1x128xf32>
    %242 = arith.addf %240, %241 : vector<1x128xf32>
    %243 = arith.addf %242, %19 : vector<1x128xf32>
    %244 = vector.extract_strided_slice %243 {offsets = [0, 0], sizes = [1, 32], strides = [1, 1]} : vector<1x128xf32> to vector<1x32xf32>
    %245 = arith.negf %244 : vector<1x32xf32>
    %246 = math.exp %245 : vector<1x32xf32>
    %cst_82 = arith.constant 1.000000e+00 : f32
    %247 = vector.broadcast %cst_82 : f32 to vector<1x32xf32>
    %248 = arith.addf %247, %246 : vector<1x32xf32>
    %249 = arith.divf %247, %248 : vector<1x32xf32>
    %250 = vector.extract_strided_slice %243 {offsets = [0, 32], sizes = [1, 32], strides = [1, 1]} : vector<1x128xf32> to vector<1x32xf32>
    %251 = arith.negf %250 : vector<1x32xf32>
    %252 = math.exp %251 : vector<1x32xf32>
    %cst_83 = arith.constant 1.000000e+00 : f32
    %253 = vector.broadcast %cst_83 : f32 to vector<1x32xf32>
    %254 = arith.addf %253, %252 : vector<1x32xf32>
    %255 = arith.divf %253, %254 : vector<1x32xf32>
    %256 = vector.extract_strided_slice %243 {offsets = [0, 64], sizes = [1, 32], strides = [1, 1]} : vector<1x128xf32> to vector<1x32xf32>
    %257 = math.tanh %256 : vector<1x32xf32>
    %258 = vector.extract_strided_slice %243 {offsets = [0, 96], sizes = [1, 32], strides = [1, 1]} : vector<1x128xf32> to vector<1x32xf32>
    %259 = arith.negf %258 : vector<1x32xf32>
    %260 = math.exp %259 : vector<1x32xf32>
    %cst_84 = arith.constant 1.000000e+00 : f32
    %261 = vector.broadcast %cst_84 : f32 to vector<1x32xf32>
    %262 = arith.addf %261, %260 : vector<1x32xf32>
    %263 = arith.divf %261, %262 : vector<1x32xf32>
    %264 = arith.mulf %255, %237 : vector<1x32xf32>
    %265 = arith.mulf %249, %257 : vector<1x32xf32>
    %266 = arith.addf %264, %265 : vector<1x32xf32>
    %267 = math.tanh %266 : vector<1x32xf32>
    %268 = arith.mulf %263, %267 : vector<1x32xf32>
    %269 = tpu.concatenate %179, %268 in 1 : vector<1x32xf32>, vector<1x32xf32> -> vector<1x64xf32>
    %270 = tpu.concatenate %208, %239 in 1 : vector<1x32xf32>, vector<1x32xf32> -> vector<1x64xf32>
    %271 = tpu.concatenate %269, %270 in 0 : vector<1x64xf32>, vector<1x64xf32> -> vector<2x64xf32>
    %cst_85 = arith.constant dense<0.000000e+00> : vector<2x32xf32>
    %272 = tpu.matmul %271, %21, %cst_85 {dimension_numbers = #tpu.dot_dimension_numbers<[1], [0], [0], [1], [0, 0, 1, 1], [], []>} : vector<2x64xf32>, vector<64x32xf32>, vector<2x32xf32> -> vector<2x32xf32>
    %273 = vector.broadcast %22 : vector<1x32xf32> to vector<2x32xf32>
    %274 = arith.addf %272, %273 : vector<2x32xf32>
    %cst_86 = arith.constant 0.000000e+00 : f32
    %275 = vector.broadcast %cst_86 : f32 to vector<2x32xf32>
    %276 = arith.maximumf %274, %275 : vector<2x32xf32>
    %cst_87 = arith.constant dense<0.000000e+00> : vector<2x32xf32>
    %277 = tpu.matmul %276, %23, %cst_87 {dimension_numbers = #tpu.dot_dimension_numbers<[1], [0], [0], [1], [0, 0, 1, 1], [], []>} : vector<2x32xf32>, vector<32x32xf32>, vector<2x32xf32> -> vector<2x32xf32>
    %278 = vector.broadcast %24 : vector<1x32xf32> to vector<2x32xf32>
    %279 = arith.addf %277, %278 : vector<2x32xf32>
    %c0_88 = arith.constant 0 : index
    %c0_89 = arith.constant 0 : index
    %280 = vector.load %arg2[%c0_88, %c0_89] : memref<16x1xf32, #tpu.memory_space<vmem>>, vector<16x1xf32>
    %281 = tpu.iota {dimensions = array<i32: 0>} : vector<8x8xi32>
    %282 = tpu.iota {dimensions = array<i32: 1>} : vector<8x8xi32>
    %283 = arith.cmpi sle, %282, %281 : vector<8x8xi32>
    %284 = arith.extui %283 : vector<8x8xi1> to vector<8x8xi32>
    %285 = arith.sitofp %284 : vector<8x8xi32> to vector<8x8xf32>
    %286 = vector.extract_strided_slice %280 {offsets = [0, 0], sizes = [8, 1], strides = [1, 1]} : vector<16x1xf32> to vector<8x1xf32>
    %cst_90 = arith.constant dense<0.000000e+00> : vector<8x1xf32>
    %287 = tpu.matmul %285, %286, %cst_90 {dimension_numbers = #tpu.dot_dimension_numbers<[1], [0], [0], [1], [0, 0, 1, 1], [], []>} : vector<8x8xf32>, vector<8x1xf32>, vector<8x1xf32> -> vector<8x1xf32>
    %cst_91 = arith.constant 1.000000e+00 : f32
    %288 = vector.broadcast %cst_91 : f32 to vector<8x1xf32>
    %289 = arith.subf %287, %288 : vector<8x1xf32>
    %290 = vector.extract_strided_slice %280 {offsets = [8, 0], sizes = [8, 1], strides = [1, 1]} : vector<16x1xf32> to vector<8x1xf32>
    %cst_92 = arith.constant dense<0.000000e+00> : vector<8x1xf32>
    %291 = tpu.matmul %285, %290, %cst_92 {dimension_numbers = #tpu.dot_dimension_numbers<[1], [0], [0], [1], [0, 0, 1, 1], [], []>} : vector<8x8xf32>, vector<8x1xf32>, vector<8x1xf32> -> vector<8x1xf32>
    %cst_93 = arith.constant 1.000000e+00 : f32
    %292 = vector.broadcast %cst_93 : f32 to vector<8x1xf32>
    %293 = arith.subf %291, %292 : vector<8x1xf32>
    %294 = tpu.concatenate %289, %293 in 0 : vector<8x1xf32>, vector<8x1xf32> -> vector<16x1xf32>
    %295 = tpu.iota {dimensions = array<i32: 1>} : vector<16x2xi32>
    %296 = arith.sitofp %295 : vector<16x2xi32> to vector<16x2xf32>
    %297 = vector.broadcast %294 : vector<16x1xf32> to vector<16x2xf32>
    %298 = arith.cmpf oeq, %296, %297 : vector<16x2xf32>
    %cst_94 = arith.constant 5.000000e-01 : f32
    %299 = vector.broadcast %cst_94 : f32 to vector<16x1xf32>
    %300 = arith.cmpf ogt, %280, %299 : vector<16x1xf32>
    %301 = vector.broadcast %300 : vector<16x1xi1> to vector<16x2xi1>
    %302 = arith.andi %298, %301 : vector<16x2xi1>
    %303 = arith.extui %302 : vector<16x2xi1> to vector<16x2xi32>
    %304 = arith.sitofp %303 : vector<16x2xi32> to vector<16x2xf32>
    %cst_95 = arith.constant dense<0.000000e+00> : vector<16x32xf32>
    %305 = tpu.matmul %304, %279, %cst_95 {dimension_numbers = #tpu.dot_dimension_numbers<[1], [0], [0], [1], [0, 0, 1, 1], [], []>} : vector<16x2xf32>, vector<2x32xf32>, vector<16x32xf32> -> vector<16x32xf32>
    %306 = vector.broadcast %280 : vector<16x1xf32> to vector<16x32xf32>
    %307 = arith.mulf %306, %305 : vector<16x32xf32>
    %cst_96 = arith.constant 1.000000e+00 : f32
    %308 = vector.broadcast %cst_96 : f32 to vector<16x1xf32>
    %309 = arith.subf %308, %280 : vector<16x1xf32>
    %310 = vector.broadcast %309 : vector<16x1xf32> to vector<16x32xf32>
    %311 = arith.mulf %310, %7 : vector<16x32xf32>
    %312 = arith.addf %307, %311 : vector<16x32xf32>
    %c0_97 = arith.constant 0 : index
    %c0_98 = arith.constant 0 : index
    %313 = vector.load %arg1[%c0_97, %c0_98] : memref<16x1xi32, #tpu.memory_space<vmem>>, vector<16x1xi32>
    %314 = arith.sitofp %313 : vector<16x1xi32> to vector<16x1xf32>
    %cst_99 = arith.constant 1.000000e+00 : f32
    %315 = vector.broadcast %cst_99 : f32 to vector<16x1xf32>
    %316 = arith.subf %315, %314 : vector<16x1xf32>
    %c0_100 = arith.constant 0 : index
    %c0_101 = arith.constant 0 : index
    %317 = vector.load %arg6[%c0_100, %c0_101] : memref<2x32xf32, #tpu.memory_space<vmem>>, vector<1x32xf32>
    %318 = vector.broadcast %316 : vector<16x1xf32> to vector<16x32xf32>
    %319 = vector.broadcast %317 : vector<1x32xf32> to vector<16x32xf32>
    %320 = arith.mulf %318, %319 : vector<16x32xf32>
    %c1 = arith.constant 1 : index
    %c0_102 = arith.constant 0 : index
    %321 = vector.load %arg6[%c1, %c0_102] : memref<2x32xf32, #tpu.memory_space<vmem>>, vector<1x32xf32>
    %322 = vector.broadcast %314 : vector<16x1xf32> to vector<16x32xf32>
    %323 = vector.broadcast %321 : vector<1x32xf32> to vector<16x32xf32>
    %324 = arith.mulf %322, %323 : vector<16x32xf32>
    %325 = arith.addf %320, %324 : vector<16x32xf32>
    %c0_103 = arith.constant 0 : index
    %c0_104 = arith.constant 0 : index
    %326 = vector.load %arg7[%c0_103, %c0_104] : memref<64x32xf32, #tpu.memory_space<vmem>>, vector<8x32xf32>
    %327 = tpu.concatenate %326, %326 in 0 : vector<8x32xf32>, vector<8x32xf32> -> vector<16x32xf32>
    %328 = arith.addf %312, %327 : vector<16x32xf32>
    %329 = arith.addf %328, %325 : vector<16x32xf32>
    %c0_105 = arith.constant 0 : index
    %c0_106 = arith.constant 0 : index
    %330 = vector.load %arg8[%c0_105, %c0_106] : memref<1x32xf32, #tpu.memory_space<vmem>>, vector<1x32xf32>
    %c0_107 = arith.constant 0 : index
    %c0_108 = arith.constant 0 : index
    %331 = vector.load %arg9[%c0_107, %c0_108] : memref<1x32xf32, #tpu.memory_space<vmem>>, vector<1x32xf32>
    %cst_109 = arith.constant dense<0.000000e+00> : vector<16xf32>
    %332 = vector.multi_reduction <add>, %329, %cst_109 [1] : vector<16x32xf32> to vector<16xf32>
    %333 = vector.shape_cast %332 : vector<16xf32> to vector<16x1xf32>
    %cst_110 = arith.constant 3.200000e+01 : f32
    %334 = vector.broadcast %cst_110 : f32 to vector<16x1xf32>
    %335 = arith.divf %333, %334 : vector<16x1xf32>
    %336 = vector.broadcast %335 : vector<16x1xf32> to vector<16x32xf32>
    %337 = arith.subf %329, %336 : vector<16x32xf32>
    %338 = arith.mulf %337, %337 : vector<16x32xf32>
    %cst_111 = arith.constant dense<0.000000e+00> : vector<16xf32>
    %339 = vector.multi_reduction <add>, %338, %cst_111 [1] : vector<16x32xf32> to vector<16xf32>
    %340 = vector.shape_cast %339 : vector<16xf32> to vector<16x1xf32>
    %cst_112 = arith.constant 3.200000e+01 : f32
    %341 = vector.broadcast %cst_112 : f32 to vector<16x1xf32>
    %342 = arith.divf %340, %341 : vector<16x1xf32>
    %cst_113 = arith.constant 9.99999996E-13 : f32
    %343 = vector.broadcast %cst_113 : f32 to vector<16x1xf32>
    %344 = arith.addf %342, %343 : vector<16x1xf32>
    %345 = math.rsqrt %344 : vector<16x1xf32>
    %346 = vector.broadcast %345 : vector<16x1xf32> to vector<16x32xf32>
    %347 = arith.mulf %337, %346 : vector<16x32xf32>
    %348 = vector.broadcast %330 : vector<1x32xf32> to vector<16x32xf32>
    %349 = arith.mulf %347, %348 : vector<16x32xf32>
    %350 = vector.broadcast %331 : vector<1x32xf32> to vector<16x32xf32>
    %351 = arith.addf %349, %350 : vector<16x32xf32>
    %c0_114 = arith.constant 0 : index
    %c0_115 = arith.constant 0 : index
    %c0_116 = arith.constant 0 : index
    %352 = vector.load %arg27[%c0_114, %c0_115, %c0_116] : memref<2x32x96xf32, #tpu.memory_space<vmem>>, vector<1x32x96xf32>
    %353 = vector.shape_cast %352 : vector<1x32x96xf32> to vector<32x96xf32>
    %354 = arith.truncf %351 : vector<16x32xf32> to vector<16x32xbf16>
    %355 = arith.truncf %353 : vector<32x96xf32> to vector<32x96xbf16>
    %cst_117 = arith.constant dense<0.000000e+00> : vector<16x96xf32>
    %356 = tpu.matmul %354, %355, %cst_117 {dimension_numbers = #tpu.dot_dimension_numbers<[1], [0], [0], [1], [0, 0, 1, 1], [], []>} : vector<16x32xbf16>, vector<32x96xbf16>, vector<16x96xf32> -> vector<16x96xf32>
    %c0_118 = arith.constant 0 : index
    %c0_119 = arith.constant 0 : index
    %c0_120 = arith.constant 0 : index
    %357 = vector.load %arg28[%c0_118, %c0_119, %c0_120] : memref<2x1x96xf32, #tpu.memory_space<vmem>>, vector<1x1x96xf32>
    %358 = vector.shape_cast %357 : vector<1x1x96xf32> to vector<1x96xf32>
    %359 = vector.broadcast %358 : vector<1x96xf32> to vector<16x96xf32>
    %360 = arith.addf %356, %359 : vector<16x96xf32>
    %361 = vector.extract_strided_slice %360 {offsets = [0, 0], sizes = [16, 32], strides = [1, 1]} : vector<16x96xf32> to vector<16x32xf32>
    %362 = vector.extract_strided_slice %360 {offsets = [0, 32], sizes = [16, 32], strides = [1, 1]} : vector<16x96xf32> to vector<16x32xf32>
    %363 = vector.extract_strided_slice %360 {offsets = [0, 64], sizes = [16, 32], strides = [1, 1]} : vector<16x96xf32> to vector<16x32xf32>
    %c0_121 = arith.constant 0 : index
    %c0_122 = arith.constant 0 : index
    %c0_123 = arith.constant 0 : index
    %364 = vector.load %arg29[%c0_121, %c0_122, %c0_123] : memref<2x32x32xf32, #tpu.memory_space<vmem>>, vector<1x32x32xf32>
    %365 = vector.shape_cast %364 : vector<1x32x32xf32> to vector<32x32xf32>
    %c0_124 = arith.constant 0 : index
    %c0_125 = arith.constant 0 : index
    %c0_126 = arith.constant 0 : index
    %366 = vector.load %arg3[%c0_124, %c0_125, %c0_126] : memref<2x1x8xf32, #tpu.memory_space<vmem>>, vector<1x1x8xf32>
    %367 = vector.shape_cast %366 : vector<1x1x8xf32> to vector<1x8xf32>
    %cst_127 = arith.constant 1.000000e+00 : f32
    %368 = vector.broadcast %cst_127 : f32 to vector<1x8xf32>
    %369 = arith.subf %368, %367 : vector<1x8xf32>
    %cst_128 = arith.constant -1.000000e+09 : f32
    %370 = vector.broadcast %cst_128 : f32 to vector<1x8xf32>
    %371 = arith.mulf %369, %370 : vector<1x8xf32>
    %c0_129 = arith.constant 0 : index
    %c0_130 = arith.constant 0 : index
    %c0_131 = arith.constant 0 : index
    %372 = vector.load %arg30[%c0_129, %c0_130, %c0_131] : memref<2x1x32xf32, #tpu.memory_space<vmem>>, vector<1x1x32xf32>
    %373 = vector.shape_cast %372 : vector<1x1x32xf32> to vector<1x32xf32>
    %374 = vector.extract_strided_slice %361 {offsets = [0, 0], sizes = [8, 16], strides = [1, 1]} : vector<16x32xf32> to vector<8x16xf32>
    %375 = vector.extract_strided_slice %362 {offsets = [0, 0], sizes = [8, 16], strides = [1, 1]} : vector<16x32xf32> to vector<8x16xf32>
    %376 = vector.extract_strided_slice %363 {offsets = [0, 0], sizes = [8, 16], strides = [1, 1]} : vector<16x32xf32> to vector<8x16xf32>
    %377 = tpu.transpose %375, [1, 0] : vector<8x16xf32> -> vector<16x8xf32>
    %378 = arith.truncf %374 : vector<8x16xf32> to vector<8x16xbf16>
    %379 = arith.truncf %377 : vector<16x8xf32> to vector<16x8xbf16>
    %cst_132 = arith.constant dense<0.000000e+00> : vector<8x8xf32>
    %380 = tpu.matmul %378, %379, %cst_132 {dimension_numbers = #tpu.dot_dimension_numbers<[1], [0], [0], [1], [0, 0, 1, 1], [], []>} : vector<8x16xbf16>, vector<16x8xbf16>, vector<8x8xf32> -> vector<8x8xf32>
    %cst_133 = arith.constant 2.500000e-01 : f32
    %381 = vector.broadcast %cst_133 : f32 to vector<8x8xf32>
    %382 = arith.mulf %380, %381 : vector<8x8xf32>
    %383 = vector.broadcast %371 : vector<1x8xf32> to vector<8x8xf32>
    %384 = arith.addf %382, %383 : vector<8x8xf32>
    %cst_134 = arith.constant dense<0xFF800000> : vector<8xf32>
    %385 = vector.multi_reduction <maximumf>, %384, %cst_134 [1] : vector<8x8xf32> to vector<8xf32>
    %386 = vector.shape_cast %385 : vector<8xf32> to vector<8x1xf32>
    %387 = vector.broadcast %386 : vector<8x1xf32> to vector<8x8xf32>
    %388 = arith.subf %384, %387 : vector<8x8xf32>
    %389 = math.exp %388 : vector<8x8xf32>
    %cst_135 = arith.constant dense<0.000000e+00> : vector<8xf32>
    %390 = vector.multi_reduction <add>, %389, %cst_135 [1] : vector<8x8xf32> to vector<8xf32>
    %391 = vector.shape_cast %390 : vector<8xf32> to vector<8x1xf32>
    %392 = vector.broadcast %391 : vector<8x1xf32> to vector<8x8xf32>
    %393 = arith.divf %389, %392 : vector<8x8xf32>
    %394 = arith.truncf %393 : vector<8x8xf32> to vector<8x8xbf16>
    %395 = arith.truncf %376 : vector<8x16xf32> to vector<8x16xbf16>
    %cst_136 = arith.constant dense<0.000000e+00> : vector<8x16xf32>
    %396 = tpu.matmul %394, %395, %cst_136 {dimension_numbers = #tpu.dot_dimension_numbers<[1], [0], [0], [1], [0, 0, 1, 1], [], []>} : vector<8x8xbf16>, vector<8x16xbf16>, vector<8x16xf32> -> vector<8x16xf32>
    %397 = vector.extract_strided_slice %365 {offsets = [0, 0], sizes = [16, 32], strides = [1, 1]} : vector<32x32xf32> to vector<16x32xf32>
    %398 = arith.truncf %396 : vector<8x16xf32> to vector<8x16xbf16>
    %399 = arith.truncf %397 : vector<16x32xf32> to vector<16x32xbf16>
    %cst_137 = arith.constant dense<0.000000e+00> : vector<8x32xf32>
    %400 = tpu.matmul %398, %399, %cst_137 {dimension_numbers = #tpu.dot_dimension_numbers<[1], [0], [0], [1], [0, 0, 1, 1], [], []>} : vector<8x16xbf16>, vector<16x32xbf16>, vector<8x32xf32> -> vector<8x32xf32>
    %401 = vector.broadcast %373 : vector<1x32xf32> to vector<8x32xf32>
    %402 = arith.addf %401, %400 : vector<8x32xf32>
    %403 = vector.extract_strided_slice %361 {offsets = [0, 16], sizes = [8, 16], strides = [1, 1]} : vector<16x32xf32> to vector<8x16xf32>
    %404 = vector.extract_strided_slice %362 {offsets = [0, 16], sizes = [8, 16], strides = [1, 1]} : vector<16x32xf32> to vector<8x16xf32>
    %405 = vector.extract_strided_slice %363 {offsets = [0, 16], sizes = [8, 16], strides = [1, 1]} : vector<16x32xf32> to vector<8x16xf32>
    %406 = tpu.transpose %404, [1, 0] : vector<8x16xf32> -> vector<16x8xf32>
    %407 = arith.truncf %403 : vector<8x16xf32> to vector<8x16xbf16>
    %408 = arith.truncf %406 : vector<16x8xf32> to vector<16x8xbf16>
    %cst_138 = arith.constant dense<0.000000e+00> : vector<8x8xf32>
    %409 = tpu.matmul %407, %408, %cst_138 {dimension_numbers = #tpu.dot_dimension_numbers<[1], [0], [0], [1], [0, 0, 1, 1], [], []>} : vector<8x16xbf16>, vector<16x8xbf16>, vector<8x8xf32> -> vector<8x8xf32>
    %cst_139 = arith.constant 2.500000e-01 : f32
    %410 = vector.broadcast %cst_139 : f32 to vector<8x8xf32>
    %411 = arith.mulf %409, %410 : vector<8x8xf32>
    %412 = vector.broadcast %371 : vector<1x8xf32> to vector<8x8xf32>
    %413 = arith.addf %411, %412 : vector<8x8xf32>
    %cst_140 = arith.constant dense<0xFF800000> : vector<8xf32>
    %414 = vector.multi_reduction <maximumf>, %413, %cst_140 [1] : vector<8x8xf32> to vector<8xf32>
    %415 = vector.shape_cast %414 : vector<8xf32> to vector<8x1xf32>
    %416 = vector.broadcast %415 : vector<8x1xf32> to vector<8x8xf32>
    %417 = arith.subf %413, %416 : vector<8x8xf32>
    %418 = math.exp %417 : vector<8x8xf32>
    %cst_141 = arith.constant dense<0.000000e+00> : vector<8xf32>
    %419 = vector.multi_reduction <add>, %418, %cst_141 [1] : vector<8x8xf32> to vector<8xf32>
    %420 = vector.shape_cast %419 : vector<8xf32> to vector<8x1xf32>
    %421 = vector.broadcast %420 : vector<8x1xf32> to vector<8x8xf32>
    %422 = arith.divf %418, %421 : vector<8x8xf32>
    %423 = arith.truncf %422 : vector<8x8xf32> to vector<8x8xbf16>
    %424 = arith.truncf %405 : vector<8x16xf32> to vector<8x16xbf16>
    %cst_142 = arith.constant dense<0.000000e+00> : vector<8x16xf32>
    %425 = tpu.matmul %423, %424, %cst_142 {dimension_numbers = #tpu.dot_dimension_numbers<[1], [0], [0], [1], [0, 0, 1, 1], [], []>} : vector<8x8xbf16>, vector<8x16xbf16>, vector<8x16xf32> -> vector<8x16xf32>
    %426 = vector.extract_strided_slice %365 {offsets = [16, 0], sizes = [16, 32], strides = [1, 1]} : vector<32x32xf32> to vector<16x32xf32>
    %427 = arith.truncf %425 : vector<8x16xf32> to vector<8x16xbf16>
    %428 = arith.truncf %426 : vector<16x32xf32> to vector<16x32xbf16>
    %cst_143 = arith.constant dense<0.000000e+00> : vector<8x32xf32>
    %429 = tpu.matmul %427, %428, %cst_143 {dimension_numbers = #tpu.dot_dimension_numbers<[1], [0], [0], [1], [0, 0, 1, 1], [], []>} : vector<8x16xbf16>, vector<16x32xbf16>, vector<8x32xf32> -> vector<8x32xf32>
    %430 = arith.addf %402, %429 : vector<8x32xf32>
    %c1_144 = arith.constant 1 : index
    %c0_145 = arith.constant 0 : index
    %c0_146 = arith.constant 0 : index
    %431 = vector.load %arg3[%c1_144, %c0_145, %c0_146] : memref<2x1x8xf32, #tpu.memory_space<vmem>>, vector<1x1x8xf32>
    %432 = vector.shape_cast %431 : vector<1x1x8xf32> to vector<1x8xf32>
    %cst_147 = arith.constant 1.000000e+00 : f32
    %433 = vector.broadcast %cst_147 : f32 to vector<1x8xf32>
    %434 = arith.subf %433, %432 : vector<1x8xf32>
    %cst_148 = arith.constant -1.000000e+09 : f32
    %435 = vector.broadcast %cst_148 : f32 to vector<1x8xf32>
    %436 = arith.mulf %434, %435 : vector<1x8xf32>
    %c0_149 = arith.constant 0 : index
    %c0_150 = arith.constant 0 : index
    %c0_151 = arith.constant 0 : index
    %437 = vector.load %arg30[%c0_149, %c0_150, %c0_151] : memref<2x1x32xf32, #tpu.memory_space<vmem>>, vector<1x1x32xf32>
    %438 = vector.shape_cast %437 : vector<1x1x32xf32> to vector<1x32xf32>
    %439 = vector.extract_strided_slice %361 {offsets = [8, 0], sizes = [8, 16], strides = [1, 1]} : vector<16x32xf32> to vector<8x16xf32>
    %440 = vector.extract_strided_slice %362 {offsets = [8, 0], sizes = [8, 16], strides = [1, 1]} : vector<16x32xf32> to vector<8x16xf32>
    %441 = vector.extract_strided_slice %363 {offsets = [8, 0], sizes = [8, 16], strides = [1, 1]} : vector<16x32xf32> to vector<8x16xf32>
    %442 = tpu.transpose %440, [1, 0] : vector<8x16xf32> -> vector<16x8xf32>
    %443 = arith.truncf %439 : vector<8x16xf32> to vector<8x16xbf16>
    %444 = arith.truncf %442 : vector<16x8xf32> to vector<16x8xbf16>
    %cst_152 = arith.constant dense<0.000000e+00> : vector<8x8xf32>
    %445 = tpu.matmul %443, %444, %cst_152 {dimension_numbers = #tpu.dot_dimension_numbers<[1], [0], [0], [1], [0, 0, 1, 1], [], []>} : vector<8x16xbf16>, vector<16x8xbf16>, vector<8x8xf32> -> vector<8x8xf32>
    %cst_153 = arith.constant 2.500000e-01 : f32
    %446 = vector.broadcast %cst_153 : f32 to vector<8x8xf32>
    %447 = arith.mulf %445, %446 : vector<8x8xf32>
    %448 = vector.broadcast %436 : vector<1x8xf32> to vector<8x8xf32>
    %449 = arith.addf %447, %448 : vector<8x8xf32>
    %cst_154 = arith.constant dense<0xFF800000> : vector<8xf32>
    %450 = vector.multi_reduction <maximumf>, %449, %cst_154 [1] : vector<8x8xf32> to vector<8xf32>
    %451 = vector.shape_cast %450 : vector<8xf32> to vector<8x1xf32>
    %452 = vector.broadcast %451 : vector<8x1xf32> to vector<8x8xf32>
    %453 = arith.subf %449, %452 : vector<8x8xf32>
    %454 = math.exp %453 : vector<8x8xf32>
    %cst_155 = arith.constant dense<0.000000e+00> : vector<8xf32>
    %455 = vector.multi_reduction <add>, %454, %cst_155 [1] : vector<8x8xf32> to vector<8xf32>
    %456 = vector.shape_cast %455 : vector<8xf32> to vector<8x1xf32>
    %457 = vector.broadcast %456 : vector<8x1xf32> to vector<8x8xf32>
    %458 = arith.divf %454, %457 : vector<8x8xf32>
    %459 = arith.truncf %458 : vector<8x8xf32> to vector<8x8xbf16>
    %460 = arith.truncf %441 : vector<8x16xf32> to vector<8x16xbf16>
    %cst_156 = arith.constant dense<0.000000e+00> : vector<8x16xf32>
    %461 = tpu.matmul %459, %460, %cst_156 {dimension_numbers = #tpu.dot_dimension_numbers<[1], [0], [0], [1], [0, 0, 1, 1], [], []>} : vector<8x8xbf16>, vector<8x16xbf16>, vector<8x16xf32> -> vector<8x16xf32>
    %462 = vector.extract_strided_slice %365 {offsets = [0, 0], sizes = [16, 32], strides = [1, 1]} : vector<32x32xf32> to vector<16x32xf32>
    %463 = arith.truncf %461 : vector<8x16xf32> to vector<8x16xbf16>
    %464 = arith.truncf %462 : vector<16x32xf32> to vector<16x32xbf16>
    %cst_157 = arith.constant dense<0.000000e+00> : vector<8x32xf32>
    %465 = tpu.matmul %463, %464, %cst_157 {dimension_numbers = #tpu.dot_dimension_numbers<[1], [0], [0], [1], [0, 0, 1, 1], [], []>} : vector<8x16xbf16>, vector<16x32xbf16>, vector<8x32xf32> -> vector<8x32xf32>
    %466 = vector.broadcast %438 : vector<1x32xf32> to vector<8x32xf32>
    %467 = arith.addf %466, %465 : vector<8x32xf32>
    %468 = vector.extract_strided_slice %361 {offsets = [8, 16], sizes = [8, 16], strides = [1, 1]} : vector<16x32xf32> to vector<8x16xf32>
    %469 = vector.extract_strided_slice %362 {offsets = [8, 16], sizes = [8, 16], strides = [1, 1]} : vector<16x32xf32> to vector<8x16xf32>
    %470 = vector.extract_strided_slice %363 {offsets = [8, 16], sizes = [8, 16], strides = [1, 1]} : vector<16x32xf32> to vector<8x16xf32>
    %471 = tpu.transpose %469, [1, 0] : vector<8x16xf32> -> vector<16x8xf32>
    %472 = arith.truncf %468 : vector<8x16xf32> to vector<8x16xbf16>
    %473 = arith.truncf %471 : vector<16x8xf32> to vector<16x8xbf16>
    %cst_158 = arith.constant dense<0.000000e+00> : vector<8x8xf32>
    %474 = tpu.matmul %472, %473, %cst_158 {dimension_numbers = #tpu.dot_dimension_numbers<[1], [0], [0], [1], [0, 0, 1, 1], [], []>} : vector<8x16xbf16>, vector<16x8xbf16>, vector<8x8xf32> -> vector<8x8xf32>
    %cst_159 = arith.constant 2.500000e-01 : f32
    %475 = vector.broadcast %cst_159 : f32 to vector<8x8xf32>
    %476 = arith.mulf %474, %475 : vector<8x8xf32>
    %477 = vector.broadcast %436 : vector<1x8xf32> to vector<8x8xf32>
    %478 = arith.addf %476, %477 : vector<8x8xf32>
    %cst_160 = arith.constant dense<0xFF800000> : vector<8xf32>
    %479 = vector.multi_reduction <maximumf>, %478, %cst_160 [1] : vector<8x8xf32> to vector<8xf32>
    %480 = vector.shape_cast %479 : vector<8xf32> to vector<8x1xf32>
    %481 = vector.broadcast %480 : vector<8x1xf32> to vector<8x8xf32>
    %482 = arith.subf %478, %481 : vector<8x8xf32>
    %483 = math.exp %482 : vector<8x8xf32>
    %cst_161 = arith.constant dense<0.000000e+00> : vector<8xf32>
    %484 = vector.multi_reduction <add>, %483, %cst_161 [1] : vector<8x8xf32> to vector<8xf32>
    %485 = vector.shape_cast %484 : vector<8xf32> to vector<8x1xf32>
    %486 = vector.broadcast %485 : vector<8x1xf32> to vector<8x8xf32>
    %487 = arith.divf %483, %486 : vector<8x8xf32>
    %488 = arith.truncf %487 : vector<8x8xf32> to vector<8x8xbf16>
    %489 = arith.truncf %470 : vector<8x16xf32> to vector<8x16xbf16>
    %cst_162 = arith.constant dense<0.000000e+00> : vector<8x16xf32>
    %490 = tpu.matmul %488, %489, %cst_162 {dimension_numbers = #tpu.dot_dimension_numbers<[1], [0], [0], [1], [0, 0, 1, 1], [], []>} : vector<8x8xbf16>, vector<8x16xbf16>, vector<8x16xf32> -> vector<8x16xf32>
    %491 = vector.extract_strided_slice %365 {offsets = [16, 0], sizes = [16, 32], strides = [1, 1]} : vector<32x32xf32> to vector<16x32xf32>
    %492 = arith.truncf %490 : vector<8x16xf32> to vector<8x16xbf16>
    %493 = arith.truncf %491 : vector<16x32xf32> to vector<16x32xbf16>
    %cst_163 = arith.constant dense<0.000000e+00> : vector<8x32xf32>
    %494 = tpu.matmul %492, %493, %cst_163 {dimension_numbers = #tpu.dot_dimension_numbers<[1], [0], [0], [1], [0, 0, 1, 1], [], []>} : vector<8x16xbf16>, vector<16x32xbf16>, vector<8x32xf32> -> vector<8x32xf32>
    %495 = arith.addf %467, %494 : vector<8x32xf32>
    %496 = tpu.concatenate %430, %495 in 0 : vector<8x32xf32>, vector<8x32xf32> -> vector<16x32xf32>
    %497 = arith.addf %351, %496 : vector<16x32xf32>
    %c0_164 = arith.constant 0 : index
    %c0_165 = arith.constant 0 : index
    %c0_166 = arith.constant 0 : index
    %498 = vector.load %arg31[%c0_164, %c0_165, %c0_166] : memref<2x1x32xf32, #tpu.memory_space<vmem>>, vector<1x1x32xf32>
    %499 = vector.shape_cast %498 : vector<1x1x32xf32> to vector<1x32xf32>
    %c0_167 = arith.constant 0 : index
    %c0_168 = arith.constant 0 : index
    %c0_169 = arith.constant 0 : index
    %500 = vector.load %arg32[%c0_167, %c0_168, %c0_169] : memref<2x1x32xf32, #tpu.memory_space<vmem>>, vector<1x1x32xf32>
    %501 = vector.shape_cast %500 : vector<1x1x32xf32> to vector<1x32xf32>
    %cst_170 = arith.constant dense<0.000000e+00> : vector<16xf32>
    %502 = vector.multi_reduction <add>, %497, %cst_170 [1] : vector<16x32xf32> to vector<16xf32>
    %503 = vector.shape_cast %502 : vector<16xf32> to vector<16x1xf32>
    %cst_171 = arith.constant 3.200000e+01 : f32
    %504 = vector.broadcast %cst_171 : f32 to vector<16x1xf32>
    %505 = arith.divf %503, %504 : vector<16x1xf32>
    %506 = vector.broadcast %505 : vector<16x1xf32> to vector<16x32xf32>
    %507 = arith.subf %497, %506 : vector<16x32xf32>
    %508 = arith.mulf %507, %507 : vector<16x32xf32>
    %cst_172 = arith.constant dense<0.000000e+00> : vector<16xf32>
    %509 = vector.multi_reduction <add>, %508, %cst_172 [1] : vector<16x32xf32> to vector<16xf32>
    %510 = vector.shape_cast %509 : vector<16xf32> to vector<16x1xf32>
    %cst_173 = arith.constant 3.200000e+01 : f32
    %511 = vector.broadcast %cst_173 : f32 to vector<16x1xf32>
    %512 = arith.divf %510, %511 : vector<16x1xf32>
    %cst_174 = arith.constant 9.99999996E-13 : f32
    %513 = vector.broadcast %cst_174 : f32 to vector<16x1xf32>
    %514 = arith.addf %512, %513 : vector<16x1xf32>
    %515 = math.rsqrt %514 : vector<16x1xf32>
    %516 = vector.broadcast %515 : vector<16x1xf32> to vector<16x32xf32>
    %517 = arith.mulf %507, %516 : vector<16x32xf32>
    %518 = vector.broadcast %499 : vector<1x32xf32> to vector<16x32xf32>
    %519 = arith.mulf %517, %518 : vector<16x32xf32>
    %520 = vector.broadcast %501 : vector<1x32xf32> to vector<16x32xf32>
    %521 = arith.addf %519, %520 : vector<16x32xf32>
    %c0_175 = arith.constant 0 : index
    %c0_176 = arith.constant 0 : index
    %c0_177 = arith.constant 0 : index
    %522 = vector.load %arg33[%c0_175, %c0_176, %c0_177] : memref<2x32x64xf32, #tpu.memory_space<vmem>>, vector<1x32x64xf32>
    %523 = vector.shape_cast %522 : vector<1x32x64xf32> to vector<32x64xf32>
    %524 = arith.truncf %521 : vector<16x32xf32> to vector<16x32xbf16>
    %525 = arith.truncf %523 : vector<32x64xf32> to vector<32x64xbf16>
    %cst_178 = arith.constant dense<0.000000e+00> : vector<16x64xf32>
    %526 = tpu.matmul %524, %525, %cst_178 {dimension_numbers = #tpu.dot_dimension_numbers<[1], [0], [0], [1], [0, 0, 1, 1], [], []>} : vector<16x32xbf16>, vector<32x64xbf16>, vector<16x64xf32> -> vector<16x64xf32>
    %c0_179 = arith.constant 0 : index
    %c0_180 = arith.constant 0 : index
    %c0_181 = arith.constant 0 : index
    %527 = vector.load %arg34[%c0_179, %c0_180, %c0_181] : memref<2x1x64xf32, #tpu.memory_space<vmem>>, vector<1x1x64xf32>
    %528 = vector.shape_cast %527 : vector<1x1x64xf32> to vector<1x64xf32>
    %529 = vector.broadcast %528 : vector<1x64xf32> to vector<16x64xf32>
    %530 = arith.addf %526, %529 : vector<16x64xf32>
    %531 = arith.mulf %530, %530 : vector<16x64xf32>
    %532 = arith.mulf %530, %531 : vector<16x64xf32>
    %cst_182 = arith.constant 4.471500e-02 : f32
    %533 = vector.broadcast %cst_182 : f32 to vector<16x64xf32>
    %534 = arith.mulf %533, %532 : vector<16x64xf32>
    %535 = arith.addf %530, %534 : vector<16x64xf32>
    %cst_183 = arith.constant 0.797884583 : f32
    %536 = vector.broadcast %cst_183 : f32 to vector<16x64xf32>
    %537 = arith.mulf %536, %535 : vector<16x64xf32>
    %538 = math.tanh %537 : vector<16x64xf32>
    %cst_184 = arith.constant 1.000000e+00 : f32
    %539 = vector.broadcast %cst_184 : f32 to vector<16x64xf32>
    %540 = arith.addf %539, %538 : vector<16x64xf32>
    %cst_185 = arith.constant 5.000000e-01 : f32
    %541 = vector.broadcast %cst_185 : f32 to vector<16x64xf32>
    %542 = arith.mulf %541, %540 : vector<16x64xf32>
    %543 = arith.mulf %530, %542 : vector<16x64xf32>
    %c0_186 = arith.constant 0 : index
    %c0_187 = arith.constant 0 : index
    %c0_188 = arith.constant 0 : index
    %544 = vector.load %arg35[%c0_186, %c0_187, %c0_188] : memref<2x64x32xf32, #tpu.memory_space<vmem>>, vector<1x64x32xf32>
    %545 = vector.shape_cast %544 : vector<1x64x32xf32> to vector<64x32xf32>
    %546 = arith.truncf %543 : vector<16x64xf32> to vector<16x64xbf16>
    %547 = arith.truncf %545 : vector<64x32xf32> to vector<64x32xbf16>
    %cst_189 = arith.constant dense<0.000000e+00> : vector<16x32xf32>
    %548 = tpu.matmul %546, %547, %cst_189 {dimension_numbers = #tpu.dot_dimension_numbers<[1], [0], [0], [1], [0, 0, 1, 1], [], []>} : vector<16x64xbf16>, vector<64x32xbf16>, vector<16x32xf32> -> vector<16x32xf32>
    %c0_190 = arith.constant 0 : index
    %c0_191 = arith.constant 0 : index
    %c0_192 = arith.constant 0 : index
    %549 = vector.load %arg36[%c0_190, %c0_191, %c0_192] : memref<2x1x32xf32, #tpu.memory_space<vmem>>, vector<1x1x32xf32>
    %550 = vector.shape_cast %549 : vector<1x1x32xf32> to vector<1x32xf32>
    %551 = vector.broadcast %550 : vector<1x32xf32> to vector<16x32xf32>
    %552 = arith.addf %548, %551 : vector<16x32xf32>
    %553 = arith.addf %521, %552 : vector<16x32xf32>
    %c0_193 = arith.constant 0 : index
    %c0_194 = arith.constant 0 : index
    %c0_195 = arith.constant 0 : index
    %554 = vector.load %arg37[%c0_193, %c0_194, %c0_195] : memref<2x1x32xf32, #tpu.memory_space<vmem>>, vector<1x1x32xf32>
    %555 = vector.shape_cast %554 : vector<1x1x32xf32> to vector<1x32xf32>
    %c0_196 = arith.constant 0 : index
    %c0_197 = arith.constant 0 : index
    %c0_198 = arith.constant 0 : index
    %556 = vector.load %arg38[%c0_196, %c0_197, %c0_198] : memref<2x1x32xf32, #tpu.memory_space<vmem>>, vector<1x1x32xf32>
    %557 = vector.shape_cast %556 : vector<1x1x32xf32> to vector<1x32xf32>
    %cst_199 = arith.constant dense<0.000000e+00> : vector<16xf32>
    %558 = vector.multi_reduction <add>, %553, %cst_199 [1] : vector<16x32xf32> to vector<16xf32>
    %559 = vector.shape_cast %558 : vector<16xf32> to vector<16x1xf32>
    %cst_200 = arith.constant 3.200000e+01 : f32
    %560 = vector.broadcast %cst_200 : f32 to vector<16x1xf32>
    %561 = arith.divf %559, %560 : vector<16x1xf32>
    %562 = vector.broadcast %561 : vector<16x1xf32> to vector<16x32xf32>
    %563 = arith.subf %553, %562 : vector<16x32xf32>
    %564 = arith.mulf %563, %563 : vector<16x32xf32>
    %cst_201 = arith.constant dense<0.000000e+00> : vector<16xf32>
    %565 = vector.multi_reduction <add>, %564, %cst_201 [1] : vector<16x32xf32> to vector<16xf32>
    %566 = vector.shape_cast %565 : vector<16xf32> to vector<16x1xf32>
    %cst_202 = arith.constant 3.200000e+01 : f32
    %567 = vector.broadcast %cst_202 : f32 to vector<16x1xf32>
    %568 = arith.divf %566, %567 : vector<16x1xf32>
    %cst_203 = arith.constant 9.99999996E-13 : f32
    %569 = vector.broadcast %cst_203 : f32 to vector<16x1xf32>
    %570 = arith.addf %568, %569 : vector<16x1xf32>
    %571 = math.rsqrt %570 : vector<16x1xf32>
    %572 = vector.broadcast %571 : vector<16x1xf32> to vector<16x32xf32>
    %573 = arith.mulf %563, %572 : vector<16x32xf32>
    %574 = vector.broadcast %555 : vector<1x32xf32> to vector<16x32xf32>
    %575 = arith.mulf %573, %574 : vector<16x32xf32>
    %576 = vector.broadcast %557 : vector<1x32xf32> to vector<16x32xf32>
    %577 = arith.addf %575, %576 : vector<16x32xf32>
    %c1_204 = arith.constant 1 : index
    %c0_205 = arith.constant 0 : index
    %c0_206 = arith.constant 0 : index
    %578 = vector.load %arg27[%c1_204, %c0_205, %c0_206] : memref<2x32x96xf32, #tpu.memory_space<vmem>>, vector<1x32x96xf32>
    %579 = vector.shape_cast %578 : vector<1x32x96xf32> to vector<32x96xf32>
    %580 = arith.truncf %577 : vector<16x32xf32> to vector<16x32xbf16>
    %581 = arith.truncf %579 : vector<32x96xf32> to vector<32x96xbf16>
    %cst_207 = arith.constant dense<0.000000e+00> : vector<16x96xf32>
    %582 = tpu.matmul %580, %581, %cst_207 {dimension_numbers = #tpu.dot_dimension_numbers<[1], [0], [0], [1], [0, 0, 1, 1], [], []>} : vector<16x32xbf16>, vector<32x96xbf16>, vector<16x96xf32> -> vector<16x96xf32>
    %c1_208 = arith.constant 1 : index
    %c0_209 = arith.constant 0 : index
    %c0_210 = arith.constant 0 : index
    %583 = vector.load %arg28[%c1_208, %c0_209, %c0_210] : memref<2x1x96xf32, #tpu.memory_space<vmem>>, vector<1x1x96xf32>
    %584 = vector.shape_cast %583 : vector<1x1x96xf32> to vector<1x96xf32>
    %585 = vector.broadcast %584 : vector<1x96xf32> to vector<16x96xf32>
    %586 = arith.addf %582, %585 : vector<16x96xf32>
    %587 = vector.extract_strided_slice %586 {offsets = [0, 0], sizes = [16, 32], strides = [1, 1]} : vector<16x96xf32> to vector<16x32xf32>
    %588 = vector.extract_strided_slice %586 {offsets = [0, 32], sizes = [16, 32], strides = [1, 1]} : vector<16x96xf32> to vector<16x32xf32>
    %589 = vector.extract_strided_slice %586 {offsets = [0, 64], sizes = [16, 32], strides = [1, 1]} : vector<16x96xf32> to vector<16x32xf32>
    %c1_211 = arith.constant 1 : index
    %c0_212 = arith.constant 0 : index
    %c0_213 = arith.constant 0 : index
    %590 = vector.load %arg29[%c1_211, %c0_212, %c0_213] : memref<2x32x32xf32, #tpu.memory_space<vmem>>, vector<1x32x32xf32>
    %591 = vector.shape_cast %590 : vector<1x32x32xf32> to vector<32x32xf32>
    %c0_214 = arith.constant 0 : index
    %c0_215 = arith.constant 0 : index
    %c0_216 = arith.constant 0 : index
    %592 = vector.load %arg3[%c0_214, %c0_215, %c0_216] : memref<2x1x8xf32, #tpu.memory_space<vmem>>, vector<1x1x8xf32>
    %593 = vector.shape_cast %592 : vector<1x1x8xf32> to vector<1x8xf32>
    %cst_217 = arith.constant 1.000000e+00 : f32
    %594 = vector.broadcast %cst_217 : f32 to vector<1x8xf32>
    %595 = arith.subf %594, %593 : vector<1x8xf32>
    %cst_218 = arith.constant -1.000000e+09 : f32
    %596 = vector.broadcast %cst_218 : f32 to vector<1x8xf32>
    %597 = arith.mulf %595, %596 : vector<1x8xf32>
    %c1_219 = arith.constant 1 : index
    %c0_220 = arith.constant 0 : index
    %c0_221 = arith.constant 0 : index
    %598 = vector.load %arg30[%c1_219, %c0_220, %c0_221] : memref<2x1x32xf32, #tpu.memory_space<vmem>>, vector<1x1x32xf32>
    %599 = vector.shape_cast %598 : vector<1x1x32xf32> to vector<1x32xf32>
    %600 = vector.extract_strided_slice %587 {offsets = [0, 0], sizes = [8, 16], strides = [1, 1]} : vector<16x32xf32> to vector<8x16xf32>
    %601 = vector.extract_strided_slice %588 {offsets = [0, 0], sizes = [8, 16], strides = [1, 1]} : vector<16x32xf32> to vector<8x16xf32>
    %602 = vector.extract_strided_slice %589 {offsets = [0, 0], sizes = [8, 16], strides = [1, 1]} : vector<16x32xf32> to vector<8x16xf32>
    %603 = tpu.transpose %601, [1, 0] : vector<8x16xf32> -> vector<16x8xf32>
    %604 = arith.truncf %600 : vector<8x16xf32> to vector<8x16xbf16>
    %605 = arith.truncf %603 : vector<16x8xf32> to vector<16x8xbf16>
    %cst_222 = arith.constant dense<0.000000e+00> : vector<8x8xf32>
    %606 = tpu.matmul %604, %605, %cst_222 {dimension_numbers = #tpu.dot_dimension_numbers<[1], [0], [0], [1], [0, 0, 1, 1], [], []>} : vector<8x16xbf16>, vector<16x8xbf16>, vector<8x8xf32> -> vector<8x8xf32>
    %cst_223 = arith.constant 2.500000e-01 : f32
    %607 = vector.broadcast %cst_223 : f32 to vector<8x8xf32>
    %608 = arith.mulf %606, %607 : vector<8x8xf32>
    %609 = vector.broadcast %597 : vector<1x8xf32> to vector<8x8xf32>
    %610 = arith.addf %608, %609 : vector<8x8xf32>
    %cst_224 = arith.constant dense<0xFF800000> : vector<8xf32>
    %611 = vector.multi_reduction <maximumf>, %610, %cst_224 [1] : vector<8x8xf32> to vector<8xf32>
    %612 = vector.shape_cast %611 : vector<8xf32> to vector<8x1xf32>
    %613 = vector.broadcast %612 : vector<8x1xf32> to vector<8x8xf32>
    %614 = arith.subf %610, %613 : vector<8x8xf32>
    %615 = math.exp %614 : vector<8x8xf32>
    %cst_225 = arith.constant dense<0.000000e+00> : vector<8xf32>
    %616 = vector.multi_reduction <add>, %615, %cst_225 [1] : vector<8x8xf32> to vector<8xf32>
    %617 = vector.shape_cast %616 : vector<8xf32> to vector<8x1xf32>
    %618 = vector.broadcast %617 : vector<8x1xf32> to vector<8x8xf32>
    %619 = arith.divf %615, %618 : vector<8x8xf32>
    %620 = arith.truncf %619 : vector<8x8xf32> to vector<8x8xbf16>
    %621 = arith.truncf %602 : vector<8x16xf32> to vector<8x16xbf16>
    %cst_226 = arith.constant dense<0.000000e+00> : vector<8x16xf32>
    %622 = tpu.matmul %620, %621, %cst_226 {dimension_numbers = #tpu.dot_dimension_numbers<[1], [0], [0], [1], [0, 0, 1, 1], [], []>} : vector<8x8xbf16>, vector<8x16xbf16>, vector<8x16xf32> -> vector<8x16xf32>
    %623 = vector.extract_strided_slice %591 {offsets = [0, 0], sizes = [16, 32], strides = [1, 1]} : vector<32x32xf32> to vector<16x32xf32>
    %624 = arith.truncf %622 : vector<8x16xf32> to vector<8x16xbf16>
    %625 = arith.truncf %623 : vector<16x32xf32> to vector<16x32xbf16>
    %cst_227 = arith.constant dense<0.000000e+00> : vector<8x32xf32>
    %626 = tpu.matmul %624, %625, %cst_227 {dimension_numbers = #tpu.dot_dimension_numbers<[1], [0], [0], [1], [0, 0, 1, 1], [], []>} : vector<8x16xbf16>, vector<16x32xbf16>, vector<8x32xf32> -> vector<8x32xf32>
    %627 = vector.broadcast %599 : vector<1x32xf32> to vector<8x32xf32>
    %628 = arith.addf %627, %626 : vector<8x32xf32>
    %629 = vector.extract_strided_slice %587 {offsets = [0, 16], sizes = [8, 16], strides = [1, 1]} : vector<16x32xf32> to vector<8x16xf32>
    %630 = vector.extract_strided_slice %588 {offsets = [0, 16], sizes = [8, 16], strides = [1, 1]} : vector<16x32xf32> to vector<8x16xf32>
    %631 = vector.extract_strided_slice %589 {offsets = [0, 16], sizes = [8, 16], strides = [1, 1]} : vector<16x32xf32> to vector<8x16xf32>
    %632 = tpu.transpose %630, [1, 0] : vector<8x16xf32> -> vector<16x8xf32>
    %633 = arith.truncf %629 : vector<8x16xf32> to vector<8x16xbf16>
    %634 = arith.truncf %632 : vector<16x8xf32> to vector<16x8xbf16>
    %cst_228 = arith.constant dense<0.000000e+00> : vector<8x8xf32>
    %635 = tpu.matmul %633, %634, %cst_228 {dimension_numbers = #tpu.dot_dimension_numbers<[1], [0], [0], [1], [0, 0, 1, 1], [], []>} : vector<8x16xbf16>, vector<16x8xbf16>, vector<8x8xf32> -> vector<8x8xf32>
    %cst_229 = arith.constant 2.500000e-01 : f32
    %636 = vector.broadcast %cst_229 : f32 to vector<8x8xf32>
    %637 = arith.mulf %635, %636 : vector<8x8xf32>
    %638 = vector.broadcast %597 : vector<1x8xf32> to vector<8x8xf32>
    %639 = arith.addf %637, %638 : vector<8x8xf32>
    %cst_230 = arith.constant dense<0xFF800000> : vector<8xf32>
    %640 = vector.multi_reduction <maximumf>, %639, %cst_230 [1] : vector<8x8xf32> to vector<8xf32>
    %641 = vector.shape_cast %640 : vector<8xf32> to vector<8x1xf32>
    %642 = vector.broadcast %641 : vector<8x1xf32> to vector<8x8xf32>
    %643 = arith.subf %639, %642 : vector<8x8xf32>
    %644 = math.exp %643 : vector<8x8xf32>
    %cst_231 = arith.constant dense<0.000000e+00> : vector<8xf32>
    %645 = vector.multi_reduction <add>, %644, %cst_231 [1] : vector<8x8xf32> to vector<8xf32>
    %646 = vector.shape_cast %645 : vector<8xf32> to vector<8x1xf32>
    %647 = vector.broadcast %646 : vector<8x1xf32> to vector<8x8xf32>
    %648 = arith.divf %644, %647 : vector<8x8xf32>
    %649 = arith.truncf %648 : vector<8x8xf32> to vector<8x8xbf16>
    %650 = arith.truncf %631 : vector<8x16xf32> to vector<8x16xbf16>
    %cst_232 = arith.constant dense<0.000000e+00> : vector<8x16xf32>
    %651 = tpu.matmul %649, %650, %cst_232 {dimension_numbers = #tpu.dot_dimension_numbers<[1], [0], [0], [1], [0, 0, 1, 1], [], []>} : vector<8x8xbf16>, vector<8x16xbf16>, vector<8x16xf32> -> vector<8x16xf32>
    %652 = vector.extract_strided_slice %591 {offsets = [16, 0], sizes = [16, 32], strides = [1, 1]} : vector<32x32xf32> to vector<16x32xf32>
    %653 = arith.truncf %651 : vector<8x16xf32> to vector<8x16xbf16>
    %654 = arith.truncf %652 : vector<16x32xf32> to vector<16x32xbf16>
    %cst_233 = arith.constant dense<0.000000e+00> : vector<8x32xf32>
    %655 = tpu.matmul %653, %654, %cst_233 {dimension_numbers = #tpu.dot_dimension_numbers<[1], [0], [0], [1], [0, 0, 1, 1], [], []>} : vector<8x16xbf16>, vector<16x32xbf16>, vector<8x32xf32> -> vector<8x32xf32>
    %656 = arith.addf %628, %655 : vector<8x32xf32>
    %c1_234 = arith.constant 1 : index
    %c0_235 = arith.constant 0 : index
    %c0_236 = arith.constant 0 : index
    %657 = vector.load %arg3[%c1_234, %c0_235, %c0_236] : memref<2x1x8xf32, #tpu.memory_space<vmem>>, vector<1x1x8xf32>
    %658 = vector.shape_cast %657 : vector<1x1x8xf32> to vector<1x8xf32>
    %cst_237 = arith.constant 1.000000e+00 : f32
    %659 = vector.broadcast %cst_237 : f32 to vector<1x8xf32>
    %660 = arith.subf %659, %658 : vector<1x8xf32>
    %cst_238 = arith.constant -1.000000e+09 : f32
    %661 = vector.broadcast %cst_238 : f32 to vector<1x8xf32>
    %662 = arith.mulf %660, %661 : vector<1x8xf32>
    %c1_239 = arith.constant 1 : index
    %c0_240 = arith.constant 0 : index
    %c0_241 = arith.constant 0 : index
    %663 = vector.load %arg30[%c1_239, %c0_240, %c0_241] : memref<2x1x32xf32, #tpu.memory_space<vmem>>, vector<1x1x32xf32>
    %664 = vector.shape_cast %663 : vector<1x1x32xf32> to vector<1x32xf32>
    %665 = vector.extract_strided_slice %587 {offsets = [8, 0], sizes = [8, 16], strides = [1, 1]} : vector<16x32xf32> to vector<8x16xf32>
    %666 = vector.extract_strided_slice %588 {offsets = [8, 0], sizes = [8, 16], strides = [1, 1]} : vector<16x32xf32> to vector<8x16xf32>
    %667 = vector.extract_strided_slice %589 {offsets = [8, 0], sizes = [8, 16], strides = [1, 1]} : vector<16x32xf32> to vector<8x16xf32>
    %668 = tpu.transpose %666, [1, 0] : vector<8x16xf32> -> vector<16x8xf32>
    %669 = arith.truncf %665 : vector<8x16xf32> to vector<8x16xbf16>
    %670 = arith.truncf %668 : vector<16x8xf32> to vector<16x8xbf16>
    %cst_242 = arith.constant dense<0.000000e+00> : vector<8x8xf32>
    %671 = tpu.matmul %669, %670, %cst_242 {dimension_numbers = #tpu.dot_dimension_numbers<[1], [0], [0], [1], [0, 0, 1, 1], [], []>} : vector<8x16xbf16>, vector<16x8xbf16>, vector<8x8xf32> -> vector<8x8xf32>
    %cst_243 = arith.constant 2.500000e-01 : f32
    %672 = vector.broadcast %cst_243 : f32 to vector<8x8xf32>
    %673 = arith.mulf %671, %672 : vector<8x8xf32>
    %674 = vector.broadcast %662 : vector<1x8xf32> to vector<8x8xf32>
    %675 = arith.addf %673, %674 : vector<8x8xf32>
    %cst_244 = arith.constant dense<0xFF800000> : vector<8xf32>
    %676 = vector.multi_reduction <maximumf>, %675, %cst_244 [1] : vector<8x8xf32> to vector<8xf32>
    %677 = vector.shape_cast %676 : vector<8xf32> to vector<8x1xf32>
    %678 = vector.broadcast %677 : vector<8x1xf32> to vector<8x8xf32>
    %679 = arith.subf %675, %678 : vector<8x8xf32>
    %680 = math.exp %679 : vector<8x8xf32>
    %cst_245 = arith.constant dense<0.000000e+00> : vector<8xf32>
    %681 = vector.multi_reduction <add>, %680, %cst_245 [1] : vector<8x8xf32> to vector<8xf32>
    %682 = vector.shape_cast %681 : vector<8xf32> to vector<8x1xf32>
    %683 = vector.broadcast %682 : vector<8x1xf32> to vector<8x8xf32>
    %684 = arith.divf %680, %683 : vector<8x8xf32>
    %685 = arith.truncf %684 : vector<8x8xf32> to vector<8x8xbf16>
    %686 = arith.truncf %667 : vector<8x16xf32> to vector<8x16xbf16>
    %cst_246 = arith.constant dense<0.000000e+00> : vector<8x16xf32>
    %687 = tpu.matmul %685, %686, %cst_246 {dimension_numbers = #tpu.dot_dimension_numbers<[1], [0], [0], [1], [0, 0, 1, 1], [], []>} : vector<8x8xbf16>, vector<8x16xbf16>, vector<8x16xf32> -> vector<8x16xf32>
    %688 = vector.extract_strided_slice %591 {offsets = [0, 0], sizes = [16, 32], strides = [1, 1]} : vector<32x32xf32> to vector<16x32xf32>
    %689 = arith.truncf %687 : vector<8x16xf32> to vector<8x16xbf16>
    %690 = arith.truncf %688 : vector<16x32xf32> to vector<16x32xbf16>
    %cst_247 = arith.constant dense<0.000000e+00> : vector<8x32xf32>
    %691 = tpu.matmul %689, %690, %cst_247 {dimension_numbers = #tpu.dot_dimension_numbers<[1], [0], [0], [1], [0, 0, 1, 1], [], []>} : vector<8x16xbf16>, vector<16x32xbf16>, vector<8x32xf32> -> vector<8x32xf32>
    %692 = vector.broadcast %664 : vector<1x32xf32> to vector<8x32xf32>
    %693 = arith.addf %692, %691 : vector<8x32xf32>
    %694 = vector.extract_strided_slice %587 {offsets = [8, 16], sizes = [8, 16], strides = [1, 1]} : vector<16x32xf32> to vector<8x16xf32>
    %695 = vector.extract_strided_slice %588 {offsets = [8, 16], sizes = [8, 16], strides = [1, 1]} : vector<16x32xf32> to vector<8x16xf32>
    %696 = vector.extract_strided_slice %589 {offsets = [8, 16], sizes = [8, 16], strides = [1, 1]} : vector<16x32xf32> to vector<8x16xf32>
    %697 = tpu.transpose %695, [1, 0] : vector<8x16xf32> -> vector<16x8xf32>
    %698 = arith.truncf %694 : vector<8x16xf32> to vector<8x16xbf16>
    %699 = arith.truncf %697 : vector<16x8xf32> to vector<16x8xbf16>
    %cst_248 = arith.constant dense<0.000000e+00> : vector<8x8xf32>
    %700 = tpu.matmul %698, %699, %cst_248 {dimension_numbers = #tpu.dot_dimension_numbers<[1], [0], [0], [1], [0, 0, 1, 1], [], []>} : vector<8x16xbf16>, vector<16x8xbf16>, vector<8x8xf32> -> vector<8x8xf32>
    %cst_249 = arith.constant 2.500000e-01 : f32
    %701 = vector.broadcast %cst_249 : f32 to vector<8x8xf32>
    %702 = arith.mulf %700, %701 : vector<8x8xf32>
    %703 = vector.broadcast %662 : vector<1x8xf32> to vector<8x8xf32>
    %704 = arith.addf %702, %703 : vector<8x8xf32>
    %cst_250 = arith.constant dense<0xFF800000> : vector<8xf32>
    %705 = vector.multi_reduction <maximumf>, %704, %cst_250 [1] : vector<8x8xf32> to vector<8xf32>
    %706 = vector.shape_cast %705 : vector<8xf32> to vector<8x1xf32>
    %707 = vector.broadcast %706 : vector<8x1xf32> to vector<8x8xf32>
    %708 = arith.subf %704, %707 : vector<8x8xf32>
    %709 = math.exp %708 : vector<8x8xf32>
    %cst_251 = arith.constant dense<0.000000e+00> : vector<8xf32>
    %710 = vector.multi_reduction <add>, %709, %cst_251 [1] : vector<8x8xf32> to vector<8xf32>
    %711 = vector.shape_cast %710 : vector<8xf32> to vector<8x1xf32>
    %712 = vector.broadcast %711 : vector<8x1xf32> to vector<8x8xf32>
    %713 = arith.divf %709, %712 : vector<8x8xf32>
    %714 = arith.truncf %713 : vector<8x8xf32> to vector<8x8xbf16>
    %715 = arith.truncf %696 : vector<8x16xf32> to vector<8x16xbf16>
    %cst_252 = arith.constant dense<0.000000e+00> : vector<8x16xf32>
    %716 = tpu.matmul %714, %715, %cst_252 {dimension_numbers = #tpu.dot_dimension_numbers<[1], [0], [0], [1], [0, 0, 1, 1], [], []>} : vector<8x8xbf16>, vector<8x16xbf16>, vector<8x16xf32> -> vector<8x16xf32>
    %717 = vector.extract_strided_slice %591 {offsets = [16, 0], sizes = [16, 32], strides = [1, 1]} : vector<32x32xf32> to vector<16x32xf32>
    %718 = arith.truncf %716 : vector<8x16xf32> to vector<8x16xbf16>
    %719 = arith.truncf %717 : vector<16x32xf32> to vector<16x32xbf16>
    %cst_253 = arith.constant dense<0.000000e+00> : vector<8x32xf32>
    %720 = tpu.matmul %718, %719, %cst_253 {dimension_numbers = #tpu.dot_dimension_numbers<[1], [0], [0], [1], [0, 0, 1, 1], [], []>} : vector<8x16xbf16>, vector<16x32xbf16>, vector<8x32xf32> -> vector<8x32xf32>
    %721 = arith.addf %693, %720 : vector<8x32xf32>
    %722 = tpu.concatenate %656, %721 in 0 : vector<8x32xf32>, vector<8x32xf32> -> vector<16x32xf32>
    %723 = arith.addf %577, %722 : vector<16x32xf32>
    %c1_254 = arith.constant 1 : index
    %c0_255 = arith.constant 0 : index
    %c0_256 = arith.constant 0 : index
    %724 = vector.load %arg31[%c1_254, %c0_255, %c0_256] : memref<2x1x32xf32, #tpu.memory_space<vmem>>, vector<1x1x32xf32>
    %725 = vector.shape_cast %724 : vector<1x1x32xf32> to vector<1x32xf32>
    %c1_257 = arith.constant 1 : index
    %c0_258 = arith.constant 0 : index
    %c0_259 = arith.constant 0 : index
    %726 = vector.load %arg32[%c1_257, %c0_258, %c0_259] : memref<2x1x32xf32, #tpu.memory_space<vmem>>, vector<1x1x32xf32>
    %727 = vector.shape_cast %726 : vector<1x1x32xf32> to vector<1x32xf32>
    %cst_260 = arith.constant dense<0.000000e+00> : vector<16xf32>
    %728 = vector.multi_reduction <add>, %723, %cst_260 [1] : vector<16x32xf32> to vector<16xf32>
    %729 = vector.shape_cast %728 : vector<16xf32> to vector<16x1xf32>
    %cst_261 = arith.constant 3.200000e+01 : f32
    %730 = vector.broadcast %cst_261 : f32 to vector<16x1xf32>
    %731 = arith.divf %729, %730 : vector<16x1xf32>
    %732 = vector.broadcast %731 : vector<16x1xf32> to vector<16x32xf32>
    %733 = arith.subf %723, %732 : vector<16x32xf32>
    %734 = arith.mulf %733, %733 : vector<16x32xf32>
    %cst_262 = arith.constant dense<0.000000e+00> : vector<16xf32>
    %735 = vector.multi_reduction <add>, %734, %cst_262 [1] : vector<16x32xf32> to vector<16xf32>
    %736 = vector.shape_cast %735 : vector<16xf32> to vector<16x1xf32>
    %cst_263 = arith.constant 3.200000e+01 : f32
    %737 = vector.broadcast %cst_263 : f32 to vector<16x1xf32>
    %738 = arith.divf %736, %737 : vector<16x1xf32>
    %cst_264 = arith.constant 9.99999996E-13 : f32
    %739 = vector.broadcast %cst_264 : f32 to vector<16x1xf32>
    %740 = arith.addf %738, %739 : vector<16x1xf32>
    %741 = math.rsqrt %740 : vector<16x1xf32>
    %742 = vector.broadcast %741 : vector<16x1xf32> to vector<16x32xf32>
    %743 = arith.mulf %733, %742 : vector<16x32xf32>
    %744 = vector.broadcast %725 : vector<1x32xf32> to vector<16x32xf32>
    %745 = arith.mulf %743, %744 : vector<16x32xf32>
    %746 = vector.broadcast %727 : vector<1x32xf32> to vector<16x32xf32>
    %747 = arith.addf %745, %746 : vector<16x32xf32>
    %c1_265 = arith.constant 1 : index
    %c0_266 = arith.constant 0 : index
    %c0_267 = arith.constant 0 : index
    %748 = vector.load %arg33[%c1_265, %c0_266, %c0_267] : memref<2x32x64xf32, #tpu.memory_space<vmem>>, vector<1x32x64xf32>
    %749 = vector.shape_cast %748 : vector<1x32x64xf32> to vector<32x64xf32>
    %750 = arith.truncf %747 : vector<16x32xf32> to vector<16x32xbf16>
    %751 = arith.truncf %749 : vector<32x64xf32> to vector<32x64xbf16>
    %cst_268 = arith.constant dense<0.000000e+00> : vector<16x64xf32>
    %752 = tpu.matmul %750, %751, %cst_268 {dimension_numbers = #tpu.dot_dimension_numbers<[1], [0], [0], [1], [0, 0, 1, 1], [], []>} : vector<16x32xbf16>, vector<32x64xbf16>, vector<16x64xf32> -> vector<16x64xf32>
    %c1_269 = arith.constant 1 : index
    %c0_270 = arith.constant 0 : index
    %c0_271 = arith.constant 0 : index
    %753 = vector.load %arg34[%c1_269, %c0_270, %c0_271] : memref<2x1x64xf32, #tpu.memory_space<vmem>>, vector<1x1x64xf32>
    %754 = vector.shape_cast %753 : vector<1x1x64xf32> to vector<1x64xf32>
    %755 = vector.broadcast %754 : vector<1x64xf32> to vector<16x64xf32>
    %756 = arith.addf %752, %755 : vector<16x64xf32>
    %757 = arith.mulf %756, %756 : vector<16x64xf32>
    %758 = arith.mulf %756, %757 : vector<16x64xf32>
    %cst_272 = arith.constant 4.471500e-02 : f32
    %759 = vector.broadcast %cst_272 : f32 to vector<16x64xf32>
    %760 = arith.mulf %759, %758 : vector<16x64xf32>
    %761 = arith.addf %756, %760 : vector<16x64xf32>
    %cst_273 = arith.constant 0.797884583 : f32
    %762 = vector.broadcast %cst_273 : f32 to vector<16x64xf32>
    %763 = arith.mulf %762, %761 : vector<16x64xf32>
    %764 = math.tanh %763 : vector<16x64xf32>
    %cst_274 = arith.constant 1.000000e+00 : f32
    %765 = vector.broadcast %cst_274 : f32 to vector<16x64xf32>
    %766 = arith.addf %765, %764 : vector<16x64xf32>
    %cst_275 = arith.constant 5.000000e-01 : f32
    %767 = vector.broadcast %cst_275 : f32 to vector<16x64xf32>
    %768 = arith.mulf %767, %766 : vector<16x64xf32>
    %769 = arith.mulf %756, %768 : vector<16x64xf32>
    %c1_276 = arith.constant 1 : index
    %c0_277 = arith.constant 0 : index
    %c0_278 = arith.constant 0 : index
    %770 = vector.load %arg35[%c1_276, %c0_277, %c0_278] : memref<2x64x32xf32, #tpu.memory_space<vmem>>, vector<1x64x32xf32>
    %771 = vector.shape_cast %770 : vector<1x64x32xf32> to vector<64x32xf32>
    %772 = arith.truncf %769 : vector<16x64xf32> to vector<16x64xbf16>
    %773 = arith.truncf %771 : vector<64x32xf32> to vector<64x32xbf16>
    %cst_279 = arith.constant dense<0.000000e+00> : vector<16x32xf32>
    %774 = tpu.matmul %772, %773, %cst_279 {dimension_numbers = #tpu.dot_dimension_numbers<[1], [0], [0], [1], [0, 0, 1, 1], [], []>} : vector<16x64xbf16>, vector<64x32xbf16>, vector<16x32xf32> -> vector<16x32xf32>
    %c1_280 = arith.constant 1 : index
    %c0_281 = arith.constant 0 : index
    %c0_282 = arith.constant 0 : index
    %775 = vector.load %arg36[%c1_280, %c0_281, %c0_282] : memref<2x1x32xf32, #tpu.memory_space<vmem>>, vector<1x1x32xf32>
    %776 = vector.shape_cast %775 : vector<1x1x32xf32> to vector<1x32xf32>
    %777 = vector.broadcast %776 : vector<1x32xf32> to vector<16x32xf32>
    %778 = arith.addf %774, %777 : vector<16x32xf32>
    %779 = arith.addf %747, %778 : vector<16x32xf32>
    %c1_283 = arith.constant 1 : index
    %c0_284 = arith.constant 0 : index
    %c0_285 = arith.constant 0 : index
    %780 = vector.load %arg37[%c1_283, %c0_284, %c0_285] : memref<2x1x32xf32, #tpu.memory_space<vmem>>, vector<1x1x32xf32>
    %781 = vector.shape_cast %780 : vector<1x1x32xf32> to vector<1x32xf32>
    %c1_286 = arith.constant 1 : index
    %c0_287 = arith.constant 0 : index
    %c0_288 = arith.constant 0 : index
    %782 = vector.load %arg38[%c1_286, %c0_287, %c0_288] : memref<2x1x32xf32, #tpu.memory_space<vmem>>, vector<1x1x32xf32>
    %783 = vector.shape_cast %782 : vector<1x1x32xf32> to vector<1x32xf32>
    %cst_289 = arith.constant dense<0.000000e+00> : vector<16xf32>
    %784 = vector.multi_reduction <add>, %779, %cst_289 [1] : vector<16x32xf32> to vector<16xf32>
    %785 = vector.shape_cast %784 : vector<16xf32> to vector<16x1xf32>
    %cst_290 = arith.constant 3.200000e+01 : f32
    %786 = vector.broadcast %cst_290 : f32 to vector<16x1xf32>
    %787 = arith.divf %785, %786 : vector<16x1xf32>
    %788 = vector.broadcast %787 : vector<16x1xf32> to vector<16x32xf32>
    %789 = arith.subf %779, %788 : vector<16x32xf32>
    %790 = arith.mulf %789, %789 : vector<16x32xf32>
    %cst_291 = arith.constant dense<0.000000e+00> : vector<16xf32>
    %791 = vector.multi_reduction <add>, %790, %cst_291 [1] : vector<16x32xf32> to vector<16xf32>
    %792 = vector.shape_cast %791 : vector<16xf32> to vector<16x1xf32>
    %cst_292 = arith.constant 3.200000e+01 : f32
    %793 = vector.broadcast %cst_292 : f32 to vector<16x1xf32>
    %794 = arith.divf %792, %793 : vector<16x1xf32>
    %cst_293 = arith.constant 9.99999996E-13 : f32
    %795 = vector.broadcast %cst_293 : f32 to vector<16x1xf32>
    %796 = arith.addf %794, %795 : vector<16x1xf32>
    %797 = math.rsqrt %796 : vector<16x1xf32>
    %798 = vector.broadcast %797 : vector<16x1xf32> to vector<16x32xf32>
    %799 = arith.mulf %789, %798 : vector<16x32xf32>
    %800 = vector.broadcast %781 : vector<1x32xf32> to vector<16x32xf32>
    %801 = arith.mulf %799, %800 : vector<16x32xf32>
    %802 = vector.broadcast %783 : vector<1x32xf32> to vector<16x32xf32>
    %803 = arith.addf %801, %802 : vector<16x32xf32>
    %c0_294 = arith.constant 0 : index
    %c0_295 = arith.constant 0 : index
    %804 = vector.load %arg39[%c0_294, %c0_295] : memref<32x32xf32, #tpu.memory_space<vmem>>, vector<32x32xf32>
    %805 = arith.truncf %803 : vector<16x32xf32> to vector<16x32xbf16>
    %806 = arith.truncf %804 : vector<32x32xf32> to vector<32x32xbf16>
    %cst_296 = arith.constant dense<0.000000e+00> : vector<16x32xf32>
    %807 = tpu.matmul %805, %806, %cst_296 {dimension_numbers = #tpu.dot_dimension_numbers<[1], [0], [0], [1], [0, 0, 1, 1], [], []>} : vector<16x32xbf16>, vector<32x32xbf16>, vector<16x32xf32> -> vector<16x32xf32>
    %c0_297 = arith.constant 0 : index
    %c0_298 = arith.constant 0 : index
    %808 = vector.load %arg40[%c0_297, %c0_298] : memref<1x32xf32, #tpu.memory_space<vmem>>, vector<1x32xf32>
    %809 = vector.broadcast %808 : vector<1x32xf32> to vector<16x32xf32>
    %810 = arith.addf %807, %809 : vector<16x32xf32>
    %811 = arith.mulf %810, %810 : vector<16x32xf32>
    %812 = arith.mulf %810, %811 : vector<16x32xf32>
    %cst_299 = arith.constant 4.471500e-02 : f32
    %813 = vector.broadcast %cst_299 : f32 to vector<16x32xf32>
    %814 = arith.mulf %813, %812 : vector<16x32xf32>
    %815 = arith.addf %810, %814 : vector<16x32xf32>
    %cst_300 = arith.constant 0.797884583 : f32
    %816 = vector.broadcast %cst_300 : f32 to vector<16x32xf32>
    %817 = arith.mulf %816, %815 : vector<16x32xf32>
    %818 = math.tanh %817 : vector<16x32xf32>
    %cst_301 = arith.constant 1.000000e+00 : f32
    %819 = vector.broadcast %cst_301 : f32 to vector<16x32xf32>
    %820 = arith.addf %819, %818 : vector<16x32xf32>
    %cst_302 = arith.constant 5.000000e-01 : f32
    %821 = vector.broadcast %cst_302 : f32 to vector<16x32xf32>
    %822 = arith.mulf %821, %820 : vector<16x32xf32>
    %823 = arith.mulf %810, %822 : vector<16x32xf32>
    %c0_303 = arith.constant 0 : index
    %c0_304 = arith.constant 0 : index
    %824 = vector.load %arg41[%c0_303, %c0_304] : memref<1x32xf32, #tpu.memory_space<vmem>>, vector<1x32xf32>
    %c0_305 = arith.constant 0 : index
    %c0_306 = arith.constant 0 : index
    %825 = vector.load %arg42[%c0_305, %c0_306] : memref<1x32xf32, #tpu.memory_space<vmem>>, vector<1x32xf32>
    %cst_307 = arith.constant dense<0.000000e+00> : vector<16xf32>
    %826 = vector.multi_reduction <add>, %823, %cst_307 [1] : vector<16x32xf32> to vector<16xf32>
    %827 = vector.shape_cast %826 : vector<16xf32> to vector<16x1xf32>
    %cst_308 = arith.constant 3.200000e+01 : f32
    %828 = vector.broadcast %cst_308 : f32 to vector<16x1xf32>
    %829 = arith.divf %827, %828 : vector<16x1xf32>
    %830 = vector.broadcast %829 : vector<16x1xf32> to vector<16x32xf32>
    %831 = arith.subf %823, %830 : vector<16x32xf32>
    %832 = arith.mulf %831, %831 : vector<16x32xf32>
    %cst_309 = arith.constant dense<0.000000e+00> : vector<16xf32>
    %833 = vector.multi_reduction <add>, %832, %cst_309 [1] : vector<16x32xf32> to vector<16xf32>
    %834 = vector.shape_cast %833 : vector<16xf32> to vector<16x1xf32>
    %cst_310 = arith.constant 3.200000e+01 : f32
    %835 = vector.broadcast %cst_310 : f32 to vector<16x1xf32>
    %836 = arith.divf %834, %835 : vector<16x1xf32>
    %cst_311 = arith.constant 9.99999996E-13 : f32
    %837 = vector.broadcast %cst_311 : f32 to vector<16x1xf32>
    %838 = arith.addf %836, %837 : vector<16x1xf32>
    %839 = math.rsqrt %838 : vector<16x1xf32>
    %840 = vector.broadcast %839 : vector<16x1xf32> to vector<16x32xf32>
    %841 = arith.mulf %831, %840 : vector<16x32xf32>
    %842 = vector.broadcast %824 : vector<1x32xf32> to vector<16x32xf32>
    %843 = arith.mulf %841, %842 : vector<16x32xf32>
    %844 = vector.broadcast %825 : vector<1x32xf32> to vector<16x32xf32>
    %845 = arith.addf %843, %844 : vector<16x32xf32>
    %c0_312 = arith.constant 0 : index
    %c0_313 = arith.constant 0 : index
    %846 = vector.load %arg5[%c0_312, %c0_313] : memref<128x32xf32, #tpu.memory_space<vmem>>, vector<128x32xf32>
    %847 = tpu.transpose %846, [1, 0] : vector<128x32xf32> -> vector<32x128xf32>
    %848 = arith.truncf %845 : vector<16x32xf32> to vector<16x32xbf16>
    %849 = arith.truncf %847 : vector<32x128xf32> to vector<32x128xbf16>
    %cst_314 = arith.constant dense<0.000000e+00> : vector<16x128xf32>
    %850 = tpu.matmul %848, %849, %cst_314 {dimension_numbers = #tpu.dot_dimension_numbers<[1], [0], [0], [1], [0, 0, 1, 1], [], []>} : vector<16x32xbf16>, vector<32x128xbf16>, vector<16x128xf32> -> vector<16x128xf32>
    %c0_315 = arith.constant 0 : index
    %c0_316 = arith.constant 0 : index
    %851 = vector.load %arg43[%c0_315, %c0_316] : memref<1x128xf32, #tpu.memory_space<vmem>>, vector<1x128xf32>
    %852 = vector.broadcast %851 : vector<1x128xf32> to vector<16x128xf32>
    %853 = arith.addf %850, %852 : vector<16x128xf32>
    %c0_317 = arith.constant 0 : index
    %c0_318 = arith.constant 0 : index
    %854 = vector.load %arg44[%c0_317, %c0_318] : memref<16x128xf32, #tpu.memory_space<vmem>>, vector<16x128xf32>
    tpu.vector_store %arg44[%c0_317, %c0_318], %853 {strides = array<i32>} : memref<16x128xf32, #tpu.memory_space<vmem>>, vector<16x128xf32>,
    %c0_319 = arith.constant 0 : index
    %c0_320 = arith.constant 0 : index
    %855 = vector.load %arg4[%c0_319, %c0_320] : memref<16x1xi32, #tpu.memory_space<vmem>>, vector<16x1xi32>
    %856 = vector.broadcast %855 : vector<16x1xi32> to vector<16x128xi32>
    %857 = arith.cmpi eq, %1, %856 : vector<16x128xi32>
    %858 = arith.extui %857 : vector<16x128xi1> to vector<16x128xi32>
    %859 = arith.sitofp %858 : vector<16x128xi32> to vector<16x128xf32>
    %860 = arith.mulf %859, %853 : vector<16x128xf32>
    %cst_321 = arith.constant dense<0.000000e+00> : vector<16xf32>
    %861 = vector.multi_reduction <add>, %860, %cst_321 [1] : vector<16x128xf32> to vector<16xf32>
    %862 = vector.shape_cast %861 : vector<16xf32> to vector<16x1xf32>
    %cst_322 = arith.constant dense<0xFF800000> : vector<16xf32>
    %863 = vector.multi_reduction <maximumf>, %853, %cst_322 [1] : vector<16x128xf32> to vector<16xf32>
    %864 = vector.shape_cast %863 : vector<16xf32> to vector<16x1xf32>
    %865 = vector.broadcast %864 : vector<16x1xf32> to vector<16x128xf32>
    %866 = arith.subf %853, %865 : vector<16x128xf32>
    %867 = math.exp %866 : vector<16x128xf32>
    %cst_323 = arith.constant dense<0.000000e+00> : vector<16xf32>
    %868 = vector.multi_reduction <add>, %867, %cst_323 [1] : vector<16x128xf32> to vector<16xf32>
    %869 = vector.shape_cast %868 : vector<16xf32> to vector<16x1xf32>
    %870 = math.log %869 : vector<16x1xf32>
    %871 = arith.addf %864, %870 : vector<16x1xf32>
    %c0_i32 = arith.constant 0 : i32
    %872 = vector.broadcast %c0_i32 : i32 to vector<16x1xi32>
    %873 = arith.cmpi sge, %855, %872 : vector<16x1xi32>
    %874 = arith.extui %873 : vector<16x1xi1> to vector<16x1xi32>
    %875 = arith.sitofp %874 : vector<16x1xi32> to vector<16x1xf32>
    %876 = arith.subf %871, %862 : vector<16x1xf32>
    %877 = arith.mulf %876, %875 : vector<16x1xf32>
    %cst_324 = arith.constant 1.000000e+00 : f32
    %878 = vector.broadcast %cst_324 : f32 to vector<1x16xf32>
    %cst_325 = arith.constant dense<0.000000e+00> : vector<1x1xf32>
    %879 = tpu.matmul %878, %877, %cst_325 {dimension_numbers = #tpu.dot_dimension_numbers<[1], [0], [0], [1], [0, 0, 1, 1], [], []>} : vector<1x16xf32>, vector<16x1xf32>, vector<1x1xf32> -> vector<1x1xf32>
    %cst_326 = arith.constant dense<0.000000e+00> : vector<1x1xf32>
    %880 = tpu.matmul %878, %875, %cst_326 {dimension_numbers = #tpu.dot_dimension_numbers<[1], [0], [0], [1], [0, 0, 1, 1], [], []>} : vector<1x16xf32>, vector<16x1xf32>, vector<1x1xf32> -> vector<1x1xf32>
    %cst_327 = arith.constant 1.000000e+00 : f32
    %881 = vector.broadcast %cst_327 : f32 to vector<1x1xf32>
    %882 = arith.maximumf %880, %881 : vector<1x1xf32>
    %883 = arith.divf %879, %882 : vector<1x1xf32>
    %c0_328 = arith.constant 0 : index
    %c0_329 = arith.constant 0 : index
    %884 = vector.load %arg45[%c0_328, %c0_329] : memref<1x1xf32, #tpu.memory_space<vmem>>, vector<1x1xf32>
    tpu.vector_store %arg45[%c0_328, %c0_329], %883 {strides = array<i32>} : memref<1x1xf32, #tpu.memory_space<vmem>>, vector<1x1xf32>,
    return
  }
}

</mosaic_0001>

<bundles_post_ra>
// kernel: relm_ptuning_forward.1
= control target key start
LH: loop header
LB: loop body
LE: loop exit
PB: predicated region body
PF: predicated region fallthrough
CT: control target
= control target key end

     0   :  { %s3955_s6 = smov 1   ;;  %s3956_s10 = smov 2   ;;  %s4874_s0 = inlined_call_operand.smem [shape: u32[46], index: -1, kind: input, shape index: {}] }
   0x1   :  { %s4034_s5 = sld [smem:[%s4874_s0]]   ;;  %s3957_s14 = smov 3  }
   0x2   :  { %s4039_s9 = sld [smem:[%s4874_s0 + %s3955_s6]]   ;;  %s3958_s18 = smov 4  }
   0x3   :  { %s4044_s13 = sld [smem:[%s4874_s0 + %s3956_s10]]   ;;  %s3959_s22 = smov 5  }
   0x4   :  { %s4049_s17 = sld [smem:[%s4874_s0 + %s3957_s14]]   ;;  %s3960_s26 = smov 6  }
   0x5   :  { %s4054_s21 = sld [smem:[%s4874_s0 + %s3958_s18]]   ;;  %s3961_s30 = smov 7  }
   0x6   :  { %s4059_s25 = sld [smem:[%s4874_s0 + %s3959_s22]]   ;;  %s3962_s4 = smov 8  }
   0x7   :  { %4895 = sst [smem:[#allocation30_spill]] %s4034_s5  ;;  %s3963_s10 = smov 9  }
   0x8   :  { %4896 = sst [smem:[#allocation31_spill]] %s4039_s9  ;;  %s3964_s15 = smov 10  }
   0x9   :  { %4897 = sst [smem:[#allocation32_spill]] %s4044_s13  ;;  %s3965_s20 = smov 11  }
   0xa   :  { %4898 = sst [smem:[#allocation33_spill]] %s4049_s17  ;;  %s3967_s1 = smov 13  }
   0xb   :  { %4899 = sst [smem:[#allocation34_spill]] %s4054_s21  ;;  %s3968_s7 = smov 14  }
   0xc   :  { %4900 = sst [smem:[#allocation35_spill]] %s4059_s25  ;;  %s3970_s22 = smov 16  }
   0xd   :  { %s4064_s29 = sld [smem:[%s4874_s0 + %s3960_s26]]   ;;  %s3966_s26 = smov 12  }
   0xe   :  { %s4069_s3 = sld [smem:[%s4874_s0 + %s3961_s30]]   ;;  %s3971_s28 = smov 17  }
   0xf   :  { %s4074_s8 = sld [smem:[%s4874_s0 + %s3962_s4]]  }
  0x10   :  { %s4079_s14 = sld [smem:[%s4874_s0 + %s3963_s10]]  }
  0x11   :  { %s4084_s19 = sld [smem:[%s4874_s0 + %s3964_s15]]   ;;  %s3969_s15 = smov 15  }
  0x12   :  { %s4089_s24 = sld [smem:[%s4874_s0 + %s3965_s20]]  }
  0x13   :  { %4901 = sst [smem:[#allocation36_spill]] %s4064_s29 }
  0x14   :  { %4902 = sst [smem:[#allocation37_spill]] %s4069_s3 }
  0x15   :  { %s4094_s30 = sld [smem:[%s4874_s0 + %s3966_s26]]  }
  0x16   :  { %s4099_s6 = sld [smem:[%s4874_s0 + %s3967_s1]]  }
  0x17   :  { %s4104_s12 = sld [smem:[%s4874_s0 + %s3968_s7]]   ;;  %s3972_s7 = smov 18  }
  0x18   :  { %s4109_s20 = sld [smem:[%s4874_s0 + %s3969_s15]]   ;;  %s3973_s15 = smov 19  }
  0x19   :  { %s4114_s27 = sld [smem:[%s4874_s0 + %s3970_s22]]   ;;  %s3974_s22 = smov 20  }
  0x1a   :  { %s4119_s4 = sld [smem:[%s4874_s0 + %s3971_s28]]   ;;  %s3975_s28 = smov 21  }
  0x1b   :  { %s4124_s21 = sld [smem:[%s4874_s0 + %s3972_s7]]   ;;  %s3976_s7 = smov 22  }
  0x1c   :  { %s4129_s17 = sld [smem:[%s4874_s0 + %s3973_s15]]   ;;  %s3977_s15 = smov 23  }
  0x1d   :  { %4903 = sst [smem:[#allocation38_spill]] %s4104_s12 }
  0x1e   :  { %4904 = sst [smem:[#allocation39_spill]] %s4109_s20 }
  0x1f   :  { %4905 = sst [smem:[#allocation40_spill]] %s4114_s27 }
  0x20   :  { %4906 = sst [smem:[#allocation41_spill]] %s4119_s4 }
  0x21   :  { %s4134_s3 = sld [smem:[%s4874_s0 + %s3974_s22]]   ;;  %s3978_s22 = smov 24  }
  0x22   :  { %4907 = sst [smem:[#allocation42_spill]] %s4129_s17 }
  0x23   :  { %s4139_s29 = sld [smem:[%s4874_s0 + %s3975_s28]]   ;;  %s3979_s28 = smov 25  }
  0x24   :  { %s4144_s9 = sld [smem:[%s4874_s0 + %s3976_s7]]   ;;  %s3980_s7 = smov 26  }
  0x25   :  { %s4149_s13 = sld [smem:[%s4874_s0 + %s3977_s15]]   ;;  %s3981_s15 = smov 27  }
  0x26   :  { %s4159_s25 = sld [smem:[%s4874_s0 + %s3979_s28]]   ;;  %s3983_s28 = smov 29  }
  0x27   :  { %4908 = sst [smem:[#allocation43_spill]] %s4134_s3 }
  0x28   :  { %s4154_s3 = sld [smem:[%s4874_s0 + %s3978_s22]]   ;;  %s3982_s22 = smov 28  }
  0x29   :  { %s4179_s5 = sld [smem:[%s4874_s0 + %s3983_s28]]   ;;  %s3987_s28 = smov 33  }
  0x2a   :  { %4909 = sst [smem:[#allocation44_spill]] %s4144_s9 }
  0x2b   :  { %4910 = sst [smem:[#allocation45_spill]] %s4149_s13 }
  0x2c   :  { %s4164_s9 = sld [smem:[%s4874_s0 + %s3980_s7]]   ;;  %s3984_s7 = smov 30  }
  0x2d   :  { %s4169_s13 = sld [smem:[%s4874_s0 + %s3981_s15]]   ;;  %s3985_s15 = smov 31  }
  0x2e   :  { %4911 = sst [smem:[#allocation46_spill]] %s4154_s3 }
  0x2f   :  { %s4174_s3 = sld [smem:[%s4874_s0 + %s3982_s22]]   ;;  %s3986_s22 = smov 32  }
  0x30   :  { %4915 = sst [smem:[#allocation50_spill]] %s4179_s5 }
  0x31   :  { %s4199_s5 = sld [smem:[%s4874_s0 + %s3987_s28]]   ;;  %s3991_s28 = smov 37  }
  0x32   :  { %4912 = sst [smem:[#allocation47_spill]] %s4164_s9 }
  0x33   :  { %4913 = sst [smem:[#allocation48_spill]] %s4169_s13 }
  0x34   :  { %s4184_s9 = sld [smem:[%s4874_s0 + %s3984_s7]]   ;;  %s3988_s7 = smov 34  }
  0x35   :  { %4914 = sst [smem:[#allocation49_spill]] %s4174_s3 }
  0x36   :  { %s4189_s13 = sld [smem:[%s4874_s0 + %s3985_s15]]   ;;  %s3989_s15 = smov 35  }
  0x37   :  { %s4194_s3 = sld [smem:[%s4874_s0 + %s3986_s22]]   ;;  %s3990_s22 = smov 36  }
  0x38   :  { %4918 = sst [smem:[#allocation53_spill]] %s4199_s5 }
  0x39   :  { %s4214_s17 = sld [smem:[%s4874_s0 + %s3990_s22]]   ;;  %s3994_s22 = smov 40  }
  0x3a   :  { %4916 = sst [smem:[#allocation51_spill]] %s4184_s9 }
  0x3b   :  { %s4204_s9 = sld [smem:[%s4874_s0 + %s3988_s7]]   ;;  %s3992_s7 = smov 38  }
  0x3c   :  { %4917 = sst [smem:[#allocation52_spill]] %s4189_s13 }
  0x3d   :  { %s4209_s13 = sld [smem:[%s4874_s0 + %s3989_s15]]   ;;  %s3993_s15 = smov 39  }
  0x3e   :  { %s4219_s5 = sld [smem:[%s4874_s0 + %s3991_s28]]   ;;  %s3995_s28 = smov 41  }
  0x3f   :  { %s4224_s4 = sld [smem:[%s4874_s0 + %s3992_s7]]   ;;  %s3996_s7 = smov 42  }
  0x40   :  { %s4234_s27 = sld [smem:[%s4874_s0 + %s3994_s22]]   ;;  %s3998_s22 = smov 44  }
  0x41   :  { %s4244_s12 = sld [smem:[%s4874_s0 + %s3996_s7]]  }
  0x43   :  { %4919 = sst [smem:[#allocation54_spill]] %s4209_s13 }
  0x44   :  { %4920 = sst [smem:[#allocation55_spill]] %s4219_s5 }
  0x45   :  { %s4229_s13 = sld [smem:[%s4874_s0 + %s3993_s15]]   ;;  %s3997_s15 = smov 43  }
  0x46   :  { %4921 = sst [smem:[#allocation56_spill]] %s4234_s27 }
  0x47   :  { %s4239_s5 = sld [smem:[%s4874_s0 + %s3995_s28]]   ;;  %s3999_s28 = smov 45  }
  0x48   :  { %s4249_s20 = sld [smem:[%s4874_s0 + %s3997_s15]]  }
  0x49   :  { %s4254_s27 = sld [smem:[%s4874_s0 + %s3998_s22]]  }
  0x4d   :  { %4922 = sst [smem:[#allocation57_spill]] %s4239_s5 }
  0x4e   :  { %s4259_s5 = sld [smem:[%s4874_s0 + %s3999_s28]]  }
  0x4f   :  { %97 = vsyncpa [#allocation3], 0 }
  0x50   :  { %98 = vsyncpa [#allocation6], 0 }
  0x51   :  { %99 = vsyncpa [#allocation9], 0 }
  0x52   :  { %100 = vsyncpa [#allocation12], 0 }
  0x53   :  { %101 = vsyncpa [#allocation15], 0 }
  0x54   :  { %102 = vsyncpa [#allocation18], 0 }
  0x55   :  { %103 = vsyncpa [#allocation4], 0  ;;  %s137_s7 = sshll.u32 %s4079_s14, 4  ;;  %s138_s7 = int_to_ptr.hbm [resolvable:$true] %s137_s7 }
  0x56   :  { %104 = vsyncpa [#allocation21], 0  ;;  %s4000_s10 = smov [#allocation5]   ;;  %s3651_s15 = sshra.s32 %s138_s7, 4  ;;  %s3652_s15 = int_to_ptr.hbm [resolvable:$true] %s3651_s15 }
  0x57   :  { %s139_s11 = sshll.u32 %s4000_s10, 4  ;;  %s3653_s0 = scalar_lea.hbm %s3652_s15, 1  ;;  %s140_s11 = int_to_ptr.vmem [resolvable:$true] %s139_s11 }
  0x58   :  { %p3654_p0 = scmp.ne.s32.totalorder %s3652_s15, %s3653_s0  ;;  %s3655_s16 = scalar_lea.hbm %s4079_s14, 1 }
  0x59   :  { %p3656_p1 = scmp.lt.s32.totalorder %s3652_s15, %s4079_s14  ;;  %p3657_p2 = scmp.lt.s32.totalorder %s3655_s16, %s3653_s0 }
  0x5b   :  { %p3658_p3 = por %p3657_p2, %p3656_p1 }
  0x5d   :  { %p3659_p4 = pnand %p3658_p3, %p3654_p0 }
  0x5f   :  { %3662 = shalt.err (!%p3659_p4)
}
  0x60   :  { %142 = dma.hbm_to_vmem [thread:$0]  %s138_s7, 16, %s140_s11, [#allocation6]  }
  0x61   :  { %s180_s18 = sshll.u32 %s4139_s29, 4  ;;  %s4001_s22 = smov [#allocation8]   ;;  %s181_s18 = int_to_ptr.hbm [resolvable:$true] %s180_s18 }
  0x62   :  { %s182_s23 = sshll.u32 %s4001_s22, 4  ;;  %s224_s26 = sshll.u32 %s4194_s3, 4  ;;  %s183_s23 = int_to_ptr.vmem [resolvable:$true] %s182_s23  ;;  %s4266_s26 = int_to_ptr.hbm [resolvable:$true] %s224_s26 }
  0x63   :  { %s3675_s28 = sshra.s32 %s181_s18, 4  ;;  %s3679_s1 = scalar_lea.hbm %s4139_s29, 32  ;;  %s3676_s28 = int_to_ptr.hbm [resolvable:$true] %s3675_s28 }
  0x64   :  { %s3677_s14 = scalar_lea.hbm %s3676_s28, 32  ;;  %p3680_p6 = scmp.lt.s32.totalorder %s3676_s28, %s4139_s29 }
  0x65   :  { %p3678_p5 = scmp.ne.s32.totalorder %s3676_s28, %s3677_s14  ;;  %p3681_p7 = scmp.lt.s32.totalorder %s3679_s1, %s3677_s14 }
  0x67   :  { %p3682_p8 = por %p3681_p7, %p3680_p6 }
  0x69   :  { %p3683_p9 = pnand %p3682_p8, %p3678_p5 }
  0x6b   :  { %3686 = shalt.err (!%p3683_p9)
}
  0x6c   :  { %s4002_s2 = smov 128   ;;  %s4003_s7 = smov 8  }
  0x6d   :  { %188 = dma.hbm_to_vmem [thread:$0]  %s181_s18, 512, %s183_s23, [#allocation9], %s4002_s2, %s4002_s2, %s4003_s7  }
  0x6e   :  { %s4004_s10 = smov [#allocation11]   ;;  %s254_s15 = sshll.u32 %s4214_s17, 4  ;;  %s255_s15 = int_to_ptr.hbm [resolvable:$true] %s254_s15 }
  0x6f   :  { %s226_s11 = sshll.u32 %s4004_s10, 4  ;;  %s3699_s0 = sshra.s32 %s4266_s26, 4  ;;  %s227_s11 = int_to_ptr.vmem [resolvable:$true] %s226_s11  ;;  %s3700_s0 = int_to_ptr.hbm [resolvable:$true] %s3699_s0 }
  0x70   :  { %s3701_s29 = scalar_lea.hbm %s3700_s0, 2  ;;  %s3703_s16 = scalar_lea.hbm %s4194_s3, 2 }
  0x71   :  { %p3702_p10 = scmp.ne.s32.totalorder %s3700_s0, %s3701_s29  ;;  %p3704_p11 = scmp.lt.s32.totalorder %s3700_s0, %s4194_s3 }
  0x72   :  { %p3705_p12 = scmp.lt.s32.totalorder %s3703_s16, %s3701_s29 }
  0x74   :  { %p3706_p13 = por %p3705_p12, %p3704_p11 }
  0x76   :  { %p3707_p0 = pnand %p3706_p13, %p3702_p10 }
  0x78   :  { %3710 = shalt.err (!%p3707_p0)
}
  0x79   :  { %s4005_s22 = smov 16   ;;  %s4006_s18 = smov 1  }
  0x7a   :  { %232 = dma.hbm_to_vmem [thread:$0]  %s4266_s26, 32, %s227_s11, [#allocation12], %s4005_s22, %s4005_s22, %s4006_s18  }
  0x7b   :  { %s4007_s23 = smov [#allocation14]   ;;  %s126_s14 = sshll.u32 %s4074_s8, 4  ;;  %s127_s14 = int_to_ptr.hbm [resolvable:$true] %s126_s14 }
  0x7c   :  { %s256_s28 = sshll.u32 %s4007_s23, 4  ;;  %s3723_s3 = sshra.s32 %s255_s15, 4  ;;  %s257_s28 = int_to_ptr.vmem [resolvable:$true] %s256_s28  ;;  %s3724_s3 = int_to_ptr.hbm [resolvable:$true] %s3723_s3 }
  0x7d   :  { %s3725_s1 = scalar_lea.hbm %s3724_s3, 2  ;;  %s3727_s10 = scalar_lea.hbm %s4214_s17, 2 }
  0x7e   :  { %p3726_p1 = scmp.ne.s32.totalorder %s3724_s3, %s3725_s1  ;;  %p3728_p2 = scmp.lt.s32.totalorder %s3724_s3, %s4214_s17 }
  0x7f   :  { %p3729_p3 = scmp.lt.s32.totalorder %s3727_s10, %s3725_s1 }
  0x81   :  { %p3730_p4 = por %p3729_p3, %p3728_p2 }
  0x83   :  { %p3731_p5 = pnand %p3730_p4, %p3726_p1 }
  0x85   :  { %3734 = shalt.err (!%p3731_p5)
}
  0x86   :  { %262 = dma.hbm_to_vmem [thread:$0]  %s255_s15, 32, %s257_s28, [#allocation15], %s4005_s22, %s4005_s22, %s4006_s18  }
  0x87   :  { %s163_s26 = sshll.u32 %s4124_s21, 4  ;;  %s4008_s11 = smov [#allocation2]   ;;  %s4288_s26 = int_to_ptr.hbm [resolvable:$true] %s163_s26 }
  0x88   :  { %s128_s0 = sshll.u32 %s4008_s11, 4  ;;  %s3747_s29 = sshra.s32 %s127_s14, 4  ;;  %s129_s0 = int_to_ptr.vmem [resolvable:$true] %s128_s0  ;;  %s3748_s29 = int_to_ptr.hbm [resolvable:$true] %s3747_s29 }
  0x89   :  { %s3749_s17 = scalar_lea.hbm %s3748_s29, 1  ;;  %s3751_s16 = scalar_lea.hbm %s4074_s8, 1 }
  0x8a   :  { %p3750_p6 = scmp.ne.s32.totalorder %s3748_s29, %s3749_s17  ;;  %p3752_p7 = scmp.lt.s32.totalorder %s3748_s29, %s4074_s8 }
  0x8b   :  { %p3753_p8 = scmp.lt.s32.totalorder %s3751_s16, %s3749_s17 }
  0x8d   :  { %p3754_p9 = por %p3753_p8, %p3752_p7 }
  0x8f   :  { %p3755_p10 = pnand %p3754_p9, %p3750_p6 }
  0x91   :  { %3758 = shalt.err (!%p3755_p10)
}
  0x92   :  { %131 = dma.hbm_to_vmem [thread:$0]  %s127_s14, 16, %s129_s0, [#allocation3]  }
  0x93   :  { %s4009_s15 = smov [#allocation7]   ;;  %s199_s28 = sshll.u32 %s4159_s25, 4  ;;  %s4293_s28 = int_to_ptr.hbm [resolvable:$true] %s199_s28 }
  0x94   :  { %s165_s23 = sshll.u32 %s4009_s15, 4  ;;  %s3771_s3 = sshra.s32 %s4288_s26, 4  ;;  %s166_s23 = int_to_ptr.vmem [resolvable:$true] %s165_s23  ;;  %s3772_s3 = int_to_ptr.hbm [resolvable:$true] %s3771_s3 }
  0x95   :  { %s3773_s1 = scalar_lea.hbm %s3772_s3, 32  ;;  %s3775_s8 = scalar_lea.hbm %s4124_s21, 32 }
  0x96   :  { %p3774_p11 = scmp.ne.s32.totalorder %s3772_s3, %s3773_s1  ;;  %p3776_p12 = scmp.lt.s32.totalorder %s3772_s3, %s4124_s21 }
  0x97   :  { %p3777_p13 = scmp.lt.s32.totalorder %s3775_s8, %s3773_s1 }
  0x99   :  { %p3778_p0 = por %p3777_p13, %p3776_p12 }
  0x9b   :  { %p3779_p1 = pnand %p3778_p0, %p3774_p11 }
  0x9d   :  { %3782 = shalt.err (!%p3779_p1)
}
  0x9e   :  { %171 = dma.hbm_to_vmem [thread:$0]  %s4288_s26, 512, %s166_s23, [#allocation6], %s4002_s2, %s4002_s2, %s4003_s7  }
  0x9f   :  { %s239_s14 = sshll.u32 %s4204_s9, 4  ;;  %s4010_s10 = smov [#allocation10]   ;;  %s4303_s14 = int_to_ptr.hbm [resolvable:$true] %s239_s14 }
  0xa0   :  { %s201_s11 = sshll.u32 %s4010_s10, 4  ;;  %s3795_s21 = sshra.s32 %s4293_s28, 4  ;;  %s202_s11 = int_to_ptr.vmem [resolvable:$true] %s201_s11  ;;  %s3796_s21 = int_to_ptr.hbm [resolvable:$true] %s3795_s21 }
  0xa1   :  { %s3797_s0 = scalar_lea.hbm %s3796_s21, 32  ;;  %s3799_s29 = scalar_lea.hbm %s4159_s25, 32 }
  0xa2   :  { %p3798_p2 = scmp.ne.s32.totalorder %s3796_s21, %s3797_s0  ;;  %p3800_p3 = scmp.lt.s32.totalorder %s3796_s21, %s4159_s25 }
  0xa3   :  { %p3801_p4 = scmp.lt.s32.totalorder %s3799_s29, %s3797_s0 }
  0xa5   :  { %p3802_p5 = por %p3801_p4, %p3800_p3 }
  0xa7   :  { %p3803_p6 = pnand %p3802_p5, %p3798_p2 }
  0xa9   :  { %3806 = shalt.err (!%p3803_p6)
}
  0xaa   :  { %207 = dma.hbm_to_vmem [thread:$0]  %s4293_s28, 512, %s202_s11, [#allocation9], %s4002_s2, %s4002_s2, %s4003_s7  }
  0xab   :  { %s4011_s26 = smov [#allocation13]   ;;  %s269_s16 = sshll.u32 %s4224_s4, 4  ;;  %s4313_s16 = int_to_ptr.hbm [resolvable:$true] %s269_s16 }
  0xac   :  { %s241_s17 = sshll.u32 %s4011_s26, 4  ;;  %s3819_s25 = sshra.s32 %s4303_s14, 4  ;;  %s242_s17 = int_to_ptr.vmem [resolvable:$true] %s241_s17  ;;  %s3820_s25 = int_to_ptr.hbm [resolvable:$true] %s3819_s25 }
  0xad   :  { %s3821_s15 = scalar_lea.hbm %s3820_s25, 2  ;;  %s3823_s23 = scalar_lea.hbm %s4204_s9, 2 }
  0xae   :  { %p3822_p7 = scmp.ne.s32.totalorder %s3820_s25, %s3821_s15  ;;  %p3824_p8 = scmp.lt.s32.totalorder %s3820_s25, %s4204_s9 }
  0xaf   :  { %p3825_p9 = scmp.lt.s32.totalorder %s3823_s23, %s3821_s15 }
  0xb1   :  { %p3826_p10 = por %p3825_p9, %p3824_p8 }
  0xb3   :  { %p3827_p11 = pnand %p3826_p10, %p3822_p7 }
  0xb5   :  { %3830 = shalt.err (!%p3827_p11)
}
  0xb6   :  { %247 = dma.hbm_to_vmem [thread:$0]  %s4303_s14, 32, %s242_s17, [#allocation12], %s4005_s22, %s4005_s22, %s4006_s18  }
  0xb7   :  { %s282_s28 = sshll.u32 %s4229_s13, 4  ;;  %s4012_s3 = smov [#allocation16]   ;;  %s4323_s28 = int_to_ptr.hbm [resolvable:$true] %s282_s28 }
  0xb8   :  { %s271_s1 = sshll.u32 %s4012_s3, 4  ;;  %s3843_s9 = sshra.s32 %s4313_s16, 4  ;;  %s272_s1 = int_to_ptr.vmem [resolvable:$true] %s271_s1  ;;  %s3844_s9 = int_to_ptr.hbm [resolvable:$true] %s3843_s9 }
  0xb9   :  { %s3845_s8 = scalar_lea.hbm %s3844_s9, 2  ;;  %s3847_s10 = scalar_lea.hbm %s4224_s4, 2 }
  0xba   :  { %p3846_p12 = scmp.ne.s32.totalorder %s3844_s9, %s3845_s8  ;;  %p3848_p13 = scmp.lt.s32.totalorder %s3844_s9, %s4224_s4 }
  0xbb   :  { %p3849_p0 = scmp.lt.s32.totalorder %s3847_s10, %s3845_s8 }
  0xbd   :  { %p3850_p1 = por %p3849_p0, %p3848_p13 }
  0xbf   :  { %p3851_p2 = pnand %p3850_p1, %p3846_p12 }
  0xc1   :  { %3854 = shalt.err (!%p3851_p2)
}
  0xc2   :  { %277 = dma.hbm_to_vmem [thread:$0]  %s4313_s16, 32, %s272_s1, [#allocation15], %s4005_s22, %s4005_s22, %s4006_s18  }
  0xc3   :  { %s4013_s14 = smov [#allocation17]   ;;  %s3867_s21 = sshra.s32 %s4323_s28, 4  ;;  %s3868_s21 = int_to_ptr.hbm [resolvable:$true] %s3867_s21 }
  0xc4   :  { %s284_s11 = sshll.u32 %s4013_s14, 4  ;;  %s3869_s0 = scalar_lea.hbm %s3868_s21, 32  ;;  %s285_s11 = int_to_ptr.vmem [resolvable:$true] %s284_s11 }
  0xc5   :  { %p3870_p3 = scmp.ne.s32.totalorder %s3868_s21, %s3869_s0  ;;  %s3871_s4 = scalar_lea.hbm %s4229_s13, 32 }
  0xc6   :  { %p3872_p4 = scmp.lt.s32.totalorder %s3868_s21, %s4229_s13  ;;  %p3873_p5 = scmp.lt.s32.totalorder %s3871_s4, %s3869_s0 }
  0xc8   :  { %p3874_p6 = por %p3873_p5, %p3872_p4 }
  0xca   :  { %p3875_p7 = pnand %p3874_p6, %p3870_p3 }
  0xcc   :  { %3878 = shalt.err (!%p3875_p7)
}
  0xcd   :  { %290 = dma.hbm_to_vmem [thread:$0]  %s4323_s28, 512, %s285_s11, [#allocation18], %s4002_s2, %s4002_s2, %s4003_s7  }
  0xce   :  { %3939 = dma.done.wait [#allocation3], 16  }
  0xcf   :  { %3940 = vsyncadd [#allocation3], 4294967280 }
  0xd0   :  { %3941 = dma.done.wait [#allocation6], 528  }
  0xd1   :  { %3942 = vsyncadd [#allocation6], 4294966768 }
  0xd2   :  { %3943 = dma.done.wait [#allocation9], 1024  }
  0xd3   :  { %3944 = vsyncadd [#allocation9], 4294966272 }
  0xd4   :  { %3945 = dma.done.wait [#allocation12], 64  }
  0xd5   :  { %3946 = vsyncadd [#allocation12], 4294967232 }
  0xd6   :  { %3947 = dma.done.wait [#allocation15], 64  }
  0xd7   :  { %3948 = vsyncadd [#allocation15], 4294967232 }
  0xd8   :  { %3949 = dma.done.wait [#allocation18], 512  }
  0xd9   :  { %3950 = vsyncadd [#allocation18], 4294966784  ;;  %v398_v0 = vld [vmem:[%s4089_s24 + $0x18] sm:$0xff]  ;;  %v397_v1 = vld [vmem:[%s4089_s24 + $0x10] sm:$0xff]  ;;  %vm454_vm0 = vcmask 261120   ;;  %v4014_v9 = vmov 0.0  }
  0xda   :  { %493 = vmatpush.msra.mxu2 %v398_v0  ;;  %v396_v2 = vld [vmem:[%s4089_s24 + $0x8] sm:$0xff]  ;;  %v402_v3 = vld [vmem:[%s4094_s30 + $0x18] sm:$0xff]  ;;  %v395_v4 = vld [vmem:[%s4089_s24] sm:$0xff]  ;;  %s4015_s13 = smov 64   ;;  %s4924_s24 = sld [smem:[#allocation38_spill]]  ;;  %vm820_vm13 = vcmask 523264  }
  0xdb   :  { %470 = vmatpush.msra.mxu1 %v402_v3  ;;  %v401_v5 = vld [vmem:[%s4094_s30 + $0x10] sm:$0xff]  ;;  %v400_v6 = vld [vmem:[%s4094_s30 + $0x8] sm:$0xff]  ;;  %556 = vmatpush.msra.mxu3 %v402_v3  ;;  %v4347_v7 = vld [vmem:[%s4084_s19] sm:$0x3]  ;;  %s4923_s19 = sld [smem:[#allocation39_spill]]  ;;  %s4020_s14 = smov 80  }
  0xdc   :  { %494 = vmatpush.msra.mxu2 %v397_v1  ;;  %v399_v8 = vld [vmem:[%s4094_s30] sm:$0xff]  ;;  %v564_v10 = vrot.slane %v4347_v7, 1  ;;  %s4016_s30 = smov 32   ;;  %s4926_s22 = sld [smem:[#allocation41_spill]] }
  0xdd   :  { %471 = vmatpush.msra.mxu1 %v401_v5  ;;  %557 = vmatpush.msra.mxu3 %v401_v5  ;;  %v4358_v12 = vld [vmem:[%s4099_s6] sm:$0x1]  ;;  %s4925_s6 = sld [smem:[#allocation40_spill]]  ;;  %s4021_s11 = smov 96  }
  0xde   :  { %495 = vmatpush.msra.mxu2 %v396_v2  ;;  %s4927_s18 = sld [smem:[#allocation42_spill]]  ;;  %s4022_s21 = smov 112  }
  0xdf   :  { %472 = vmatpush.msra.mxu1 %v400_v6  ;;  %558 = vmatpush.msra.mxu3 %v400_v6  ;;  %s4928_s29 = sld [smem:[#allocation30_spill]]  ;;  %s4023_s0 = smov 48  }
  0xe0   :  { %496 = vmatpush.msra.mxu2 %v395_v4  ;;  %v407_v39 = vld [vmem:[%s4924_s24 + $0x18] sm:$0xff]  ;;  %v406_v41 = vld [vmem:[%s4924_s24 + $0x10] sm:$0xff]  ;;  %v405_v43 = vld [vmem:[%s4924_s24 + $0x8] sm:$0xff]  ;;  %s4929_s26 = sld [smem:[#allocation35_spill]] }
  0xe1   :  { %3270 = vmatmul.msk.f32.vlgmr.msra.gmra.mxu2 %vm454_vm0, %v4347_v7  ;;  %473 = vmatpush.msra.mxu1 %v399_v8  ;;  %v411_v38 = vld [vmem:[%s4923_s19 + $0x18] sm:$0xff]  ;;  %v410_v40 = vld [vmem:[%s4923_s19 + $0x10] sm:$0xff]  ;;  %v409_v42 = vld [vmem:[%s4923_s19 + $0x8] sm:$0xff]  ;;  %s4930_s17 = sld [smem:[#allocation43_spill]] }
  0xe2   :  { %474 = vmatmul.f32.vlgmr.msra.gmra.mxu1 %v4014_v9  ;;  %559 = vmatpush.msra.mxu3 %v399_v8  ;;  %v408_v44 = vld [vmem:[%s4923_s19] sm:$0xff]  ;;  %s4931_s16 = sld [smem:[#allocation44_spill]] }
  0xe3   :  { %579 = vmatpush.msrb.mxu1 %v398_v0  ;;  %637 = vmatpush.msrb.mxu2 %v411_v38  ;;  %v404_v45 = vld [vmem:[%s4924_s24] sm:$0xff]  ;;  %s4932_s25 = sld [smem:[#allocation32_spill]] }
  0xe4   :  { %657 = vmatpush.msrb.mxu3 %v407_v39  ;;  %v412_v49 = vld [vmem:[%s4925_s6] sm:$0x1]  ;;  %s4933_s15 = sld [smem:[#allocation31_spill]] }
  0xe5   :  { %580 = vmatpush.msrb.mxu1 %v397_v1  ;;  %638 = vmatpush.msrb.mxu2 %v410_v40  ;;  %s4934_s23 = sld [smem:[#allocation45_spill]] }
  0xe6   :  { %658 = vmatpush.msrb.mxu3 %v406_v41  ;;  %s4935_s28 = sld [smem:[#allocation46_spill]] }
  0xe7   :  { %581 = vmatpush.msrb.mxu1 %v396_v2  ;;  %639 = vmatpush.msrb.mxu2 %v409_v42  ;;  %s4936_s3 = sld [smem:[#allocation47_spill]] }
  0xe8   :  { %659 = vmatpush.msrb.mxu3 %v405_v43  ;;  %s4937_s1 = sld [smem:[#allocation36_spill]] }
  0xe9   :  { %582 = vmatpush.msrb.mxu1 %v395_v4  ;;  %640 = vmatpush.msrb.mxu2 %v408_v44  ;;  %s4938_s9 = sld [smem:[#allocation37_spill]] }
  0xea   :  { %3273 = vmatmul.msk.f32.vlgmr.msrb.gmra.mxu1 %vm454_vm0, %v564_v10  ;;  %660 = vmatpush.msrb.mxu3 %v404_v45  ;;  %s4939_s8 = sld [smem:[#allocation48_spill]] }
  0xeb   :  { %720 = vmatpush.msra.mxu1 %v411_v38  ;;  %641 = vmatmul.f32.vlgmr.msrb.gmra.mxu2 %v4014_v9  ;;  %s4940_s10 = sld [smem:[#allocation49_spill]] }
  0xec   :  { %740 = vmatpush.msra.mxu2 %v407_v39  ;;  %s4941_s4 = sld [smem:[#allocation33_spill]] }
  0xed   :  { %721 = vmatpush.msra.mxu1 %v410_v40  ;;  %s4942_s19 = sld [smem:[#allocation50_spill]] }
  0xee   :  { %741 = vmatpush.msra.mxu2 %v406_v41  ;;  %s4943_s24 = sld [smem:[#allocation51_spill]] }
  0xef   :  { %722 = vmatpush.msra.mxu1 %v409_v42  ;;  %s4945_s6 = sld [smem:[#allocation52_spill]] }
  0xf0   :  { %742 = vmatpush.msra.mxu2 %v405_v43  ;;  %v420_v43 = vld [vmem:[%s4926_s22 + $0x38] sm:$0xff] }
  0xf1   :  { %723 = vmatpush.msra.mxu1 %v408_v44  ;;  %v424_v44 = vld [vmem:[#allocation7 + $0x18] sm:$0xff] }
  0xf2   :  { %743 = vmatpush.msra.mxu2 %v404_v45  ;;  %v419_v45 = vld [vmem:[%s4926_s22 + $0x30] sm:$0xff] }
  0xf3   :  { %3278 = vmatmul.msk.f32.vlgmr.msra.gmra.mxu2 %vm454_vm0, %v4347_v7  ;;  %832 = vmatpush.msrb.mxu1 %v420_v43 }
  0xf4   :  { %899 = vmatpush.msrb.mxu2 %v424_v44 }
  0xf5   :  { %833 = vmatpush.msrb.mxu1 %v419_v45 }
 0x15f   :  { %v475_v11 = vpop.f32.mrf.mxu1 }
 0x164   :  { %v498_v13 = vpop.f32.mrf.mxu2 }
 0x165   :  { %v499_v14 = vadd.f32 %v498_v13, %v475_v11 }
 0x167   :  { %v501_v15 = vadd.f32 %v499_v14, %v4358_v12  ;;  %v584_v14 = vpop.f32.mrf.mxu1 }
 0x169   :  { %3491 = vtanh.f32 %v501_v15  ;;  %v3271_v17 = vmul.f32 -1.442695, %v501_v15 }
 0x16b   :  { %3493 = vpow2.f32 %v3271_v17 }
 0x16e   :  { %v642_v48 = vpop.f32.mrf.mxu2 }
 0x16f   :  { %v3492_v16 = vpop.eup %3491 }
 0x170   :  { %524 = vrot.lane.b32.xlu0 %v3492_v16, %s4015_s13 }
 0x171   :  { %v3494_v18 = vpop.eup %3493 }
 0x172   :  { %v505_v19 = vadd.f32 1.0, %v3494_v18 }
 0x174   :  { %3495 = vrcp.f32 %v505_v19  ;;  %v517_v25 = vand.u32 2147483648, %v505_v19  ;;  %vm511_vm2 = vweird.f32 %v505_v19  ;;  %v515_v26 = vand.u32 2147483647, %v505_v19 }
 0x176   :  { %v518_v28 = vor.u32 1.1754944e-38, %v517_v25  ;;  %vm516_vm4 = vcmp.eq.f32.partialorder %v515_v26, 8.507059e+37  ;;  %v745_v15 = vpop.f32.mrf.mxu2 }
 0x17a   :  { %v3496_v20 = vpop.eup %3495 }
 0x17b   :  { %v507_v21 = vmul.f32 %v3496_v20, %v505_v19  ;;  %vm512_vm1 = vweird.f32 %v3496_v20 }
 0x17c   :  { %vm513_vm3 = vmor %vm511_vm2, %vm512_vm1 }
 0x17d   :  { %v508_v22 = vsub.f32 1.0, %v507_v21 }
 0x17f   :  { %v509_v23 = vmul.f32 %v3496_v20, %v508_v22 }
 0x181   :  { %v510_v24 = vadd.f32 %v3496_v20, %v509_v23 }
 0x183   :  { %v514_v27 = vsel %vm513_vm3, %v3496_v20, %v510_v24 }
 0x184   :  { %v519_v30 = vsel %vm516_vm4, %v518_v28, %v514_v27 }
 0x185   :  { %v522_v32 = vmul.f32 0.0, %v519_v30 }
 0x1e2   :  { %v525_v29 = vpop.permute.xlu0 %524 }
 0x1e3   :  { %v527_v31 = vmul.f32 %v525_v29, %v519_v30 }
 0x1e5   :  { %529 = vrot.lane.b32.xlu0 %v527_v31, %s4016_s30 }
 0x257   :  { %v530_v33 = vpop.permute.xlu0 %529 }
 0x258   :  { %v4363_v34 = vadd.f32 %v530_v33, %v522_v32 }
 0x25a   :  { %3497 = vtanh.f32 %v4363_v34 }
 0x260   :  { %v3498_v35 = vpop.eup %3497 }
 0x261   :  { %535 = vrot.lane.b32.xlu1 %v3498_v35, %s4015_s13 }
 0x2d3   :  { %v536_v36 = vpop.permute.xlu1 %535 }
 0x2d4   :  { %v538_v37 = vmul.f32 %v536_v36, %v519_v30 }
 0x2d6   :  { %540 = vrot.lane.b32.xlu1 %v538_v37, %s4016_s30 }
 0x348   :  { %v4379_v46 = vpop.permute.xlu1 %540 }
 0x349   :  { %3272 = vmatmul.msk.f32.vlgmr.msra.gmra.mxu3 %vm454_vm0, %v4379_v46 }
 0x34a   :  { %812 = vmatpush.msra.mxu3 %v424_v44  ;;  %v371_v44 = vld [vmem:[%s4929_s26 + $0x78] sm:$0xff] }
 0x34b   :  { %372 = vmatpush.msra.mxu0 %v371_v44 }
 0x351   :  { %3275 = vmatmul.msk.f32.vlgmr.msrb.gmra.mxu3 %vm454_vm0, %v564_v10 }
 0x3cc   :  { %v4386_v47 = vpop.f32.mrf.mxu3 }
 0x3cd   :  { %v585_v39 = vadd.f32 %v584_v14, %v4386_v47  ;;  %v418_v47 = vld [vmem:[%s4926_s22 + $0x28] sm:$0xff] }
 0x3ce   :  { %834 = vmatpush.msrb.mxu1 %v418_v47 }
 0x3cf   :  { %v587_v40 = vadd.f32 %v585_v39, %v4358_v12  ;;  %v417_v12 = vld [vmem:[%s4926_s22 + $0x20] sm:$0xff]  ;;  %v341_v39 = vld [vmem:[%s4928_s29 + $0x8] sm:$0xff] }
 0x3d0   :  { %835 = vmatpush.msrb.mxu1 %v417_v12 }
 0x3d4   :  { %v662_v50 = vpop.f32.mrf.mxu3 }
 0x3d5   :  { %v663_v51 = vadd.f32 %v662_v50, %v642_v48  ;;  %v423_v48 = vld [vmem:[#allocation7 + $0x10] sm:$0xff]  ;;  %v421_v50 = vld [vmem:[#allocation7] sm:$0xff] }
 0x3d6   :  { %813 = vmatpush.msra.mxu3 %v423_v48  ;;  %900 = vmatpush.msrb.mxu2 %v423_v48  ;;  %v369_v48 = vld [vmem:[%s4929_s26 + $0x68] sm:$0xff] }
 0x3d7   :  { %v665_v52 = vadd.f32 %v663_v51, %v412_v49  ;;  %v416_v51 = vld [vmem:[%s4926_s22 + $0x18] sm:$0xff] }
 0x3d8   :  { %836 = vmatpush.msrb.mxu1 %v416_v51 }
 0x3d9   :  { %3499 = vtanh.f32 %v665_v52  ;;  %v3276_v54 = vmul.f32 -1.442695, %v665_v52  ;;  %v415_v52 = vld [vmem:[%s4926_s22 + $0x10] sm:$0xff] }
 0x3da   :  { %837 = vmatpush.msrb.mxu1 %v415_v52 }
 0x3db   :  { %3501 = vpow2.f32 %v3276_v54 }
 0x3df   :  { %v3500_v53 = vpop.eup %3499 }
 0x3e0   :  { %688 = vrot.lane.b32.xlu2 %v3500_v53, %s4015_s13  ;;  %v414_v53 = vld [vmem:[%s4926_s22 + $0x8] sm:$0xff] }
 0x3e1   :  { %v3502_v55 = vpop.eup %3501  ;;  %838 = vmatpush.msrb.mxu1 %v414_v53 }
 0x3e2   :  { %v669_v56 = vadd.f32 1.0, %v3502_v55 }
 0x3e4   :  { %3503 = vrcp.f32 %v669_v56  ;;  %v681_v62 = vand.u32 2147483648, %v669_v56  ;;  %vm675_vm6 = vweird.f32 %v669_v56  ;;  %v679_v63 = vand.u32 2147483647, %v669_v56 }
 0x3e6   :  { %v682_v1 = vor.u32 1.1754944e-38, %v681_v62  ;;  %vm680_vm8 = vcmp.eq.f32.partialorder %v679_v63, 8.507059e+37 }
 0x3ea   :  { %v3504_v57 = vpop.eup %3503 }
 0x3eb   :  { %v671_v58 = vmul.f32 %v3504_v57, %v669_v56  ;;  %vm676_vm5 = vweird.f32 %v3504_v57  ;;  %v413_v56 = vld [vmem:[%s4926_s22] sm:$0xff]  ;;  %s4946_s22 = sld [smem:[#allocation54_spill]] }
 0x3ec   :  { %vm677_vm7 = vmor %vm675_vm6, %vm676_vm5  ;;  %839 = vmatpush.msrb.mxu1 %v413_v56 }
 0x3ed   :  { %v672_v59 = vsub.f32 1.0, %v671_v58 }
 0x3ef   :  { %v673_v60 = vmul.f32 %v3504_v57, %v672_v59  ;;  %v3274_v59 = vmul.f32 -1.442695, %v587_v40 }
 0x3f1   :  { %v674_v61 = vadd.f32 %v3504_v57, %v673_v60 }
 0x3f3   :  { %v678_v0 = vsel %vm677_vm7, %v3504_v57, %v674_v61 }
 0x3f4   :  { %v683_v3 = vsel %vm680_vm8, %v682_v1, %v678_v0  ;;  %v4420_v1 = vld [vmem:[%s4927_s18] sm:$0x1]  ;;  %s4947_s18 = sld [smem:[#allocation55_spill]] }
 0x3f5   :  { %v686_v5 = vmul.f32 0.0, %v683_v3 }
 0x43a   :  { %v689_v2 = vpop.permute.xlu2 %688 }
 0x43b   :  { %v691_v4 = vmul.f32 %v689_v2, %v683_v3 }
 0x43d   :  { %693 = vrot.lane.b32.xlu2 %v691_v4, %s4016_s30 }
 0x497   :  { %v694_v6 = vpop.permute.xlu2 %693 }
 0x498   :  { %v696_v7 = vadd.f32 %v694_v6, %v686_v5 }
 0x49a   :  { %3505 = vtanh.f32 %v696_v7 }
 0x4a0   :  { %v3506_v8 = vpop.eup %3505 }
 0x4a1   :  { %699 = vrot.lane.b32.xlu0 %v3506_v8, %s4015_s13 }
 0x513   :  { %v700_v10 = vpop.permute.xlu0 %699 }
 0x514   :  { %v4392_v11 = vmul.f32 %v700_v10, %v683_v3 }
 0x516   :  { %704 = vrot.lane.b32.xlu1 %v4392_v11, %s4016_s30 }
 0x588   :  { %v705_v13 = vpop.permute.xlu1 %704 }
 0x589   :  { %3277 = vmatmul.msk.f32.vlgmr.msra.gmra.mxu1 %vm454_vm0, %v705_v13 }
 0x606   :  { %v725_v16 = vpop.f32.mrf.mxu1 }
 0x607   :  { %v746_v17 = vadd.f32 %v745_v15, %v725_v16 }
 0x609   :  { %v748_v18 = vadd.f32 %v746_v17, %v412_v49  ;;  %v422_v49 = vld [vmem:[#allocation7 + $0x8] sm:$0xff] }
 0x60a   :  { %814 = vmatpush.msra.mxu3 %v422_v49  ;;  %901 = vmatpush.msrb.mxu2 %v422_v49  ;;  %v367_v49 = vld [vmem:[%s4929_s26 + $0x58] sm:$0xff] }
 0x60b   :  { %3507 = vtanh.f32 %v748_v18  ;;  %v3279_v20 = vmul.f32 -1.442695, %v748_v18 }
 0x60c   :  { %815 = vmatpush.msra.mxu3 %v421_v50  ;;  %902 = vmatpush.msrb.mxu2 %v421_v50  ;;  %v435_v50 = vld [vmem:[#allocation8 + $0x8] sm:$0xff] }
 0x60d   :  { %3509 = vpow2.f32 %v3279_v20  ;;  %816 = vmatmul.f32.vlgmr.msra.gmra.mxu3 %v4014_v9 }
 0x60e   :  { %918 = vmatpush.msrb.mxu3 %v420_v43 }
 0x610   :  { %919 = vmatpush.msrb.mxu3 %v419_v45  ;;  %v370_v45 = vld [vmem:[%s4929_s26 + $0x70] sm:$0xff] }
 0x611   :  { %v3508_v19 = vpop.eup %3507  ;;  %373 = vmatpush.msra.mxu0 %v370_v45 }
 0x612   :  { %771 = vrot.lane.b32.xlu2 %v3508_v19, %s4015_s13  ;;  %920 = vmatpush.msrb.mxu3 %v418_v47  ;;  %v437_v47 = vld [vmem:[#allocation8 + $0x18] sm:$0xff] }
 0x613   :  { %v3510_v21 = vpop.eup %3509  ;;  %374 = vmatpush.msra.mxu0 %v369_v48  ;;  %980 = vmatpush.msra.mxu2 %v437_v47 }
 0x614   :  { %v752_v22 = vadd.f32 1.0, %v3510_v21  ;;  %921 = vmatpush.msrb.mxu3 %v417_v12  ;;  %v436_v12 = vld [vmem:[#allocation8 + $0x10] sm:$0xff]  ;;  %1063 = vmatpush.msra.mxu1 %v437_v47 }
 0x615   :  { %981 = vmatpush.msra.mxu2 %v436_v12 }
 0x616   :  { %3511 = vrcp.f32 %v752_v22  ;;  %v764_v28 = vand.u32 2147483648, %v752_v22  ;;  %vm758_vm10 = vweird.f32 %v752_v22  ;;  %v762_v29 = vand.u32 2147483647, %v752_v22  ;;  %922 = vmatpush.msrb.mxu3 %v416_v51  ;;  %v366_v51 = vld [vmem:[%s4929_s26 + $0x50] sm:$0xff]  ;;  %1064 = vmatpush.msra.mxu1 %v436_v12 }
 0x617   :  { %982 = vmatpush.msra.mxu2 %v435_v50 }
 0x618   :  { %v765_v31 = vor.u32 1.1754944e-38, %v764_v28  ;;  %vm763_vm12 = vcmp.eq.f32.partialorder %v762_v29, 8.507059e+37  ;;  %923 = vmatpush.msrb.mxu3 %v415_v52  ;;  %v365_v52 = vld [vmem:[%s4929_s26 + $0x48] sm:$0xff]  ;;  %1065 = vmatpush.msra.mxu1 %v435_v50 }
 0x61a   :  { %924 = vmatpush.msrb.mxu3 %v414_v53  ;;  %v364_v53 = vld [vmem:[%s4929_s26 + $0x40] sm:$0xff] }
 0x61c   :  { %v3512_v23 = vpop.eup %3511  ;;  %925 = vmatpush.msrb.mxu3 %v413_v56  ;;  %v361_v56 = vld [vmem:[%s4929_s26 + $0x28] sm:$0xff] }
 0x61d   :  { %v754_v24 = vmul.f32 %v3512_v23, %v752_v22  ;;  %vm759_vm9 = vweird.f32 %v3512_v23 }
 0x61e   :  { %vm760_vm11 = vmor %vm758_vm10, %vm759_vm9 }
 0x61f   :  { %v755_v25 = vsub.f32 1.0, %v754_v24  ;;  %v4017_v24 = vmov 0  }
 0x620   :  { %3439 = vset.pattern.permute.xlu2 %v4017_v24  ;;  %3438 = vset.pattern.permute.xlu0 %v4017_v24 }
 0x621   :  { %v756_v26 = vmul.f32 %v3512_v23, %v755_v25  ;;  %3440 = vset.pattern.permute.xlu1 %v4017_v24 }
 0x623   :  { %v757_v27 = vadd.f32 %v3512_v23, %v756_v26 }
 0x625   :  { %v761_v30 = vsel %vm760_vm11, %v3512_v23, %v757_v27 }
 0x626   :  { %v766_v33 = vsel %vm763_vm12, %v765_v31, %v761_v30 }
 0x627   :  { %v769_v36 = vmul.f32 %v766_v33, %v696_v7 }
 0x66c   :  { %v772_v32 = vpop.permute.xlu2 %771 }
 0x66d   :  { %v774_v35 = vmul.f32 %v772_v32, %v766_v33 }
 0x66f   :  { %776 = vrot.lane.b32.xlu0 %v774_v35, %s4016_s30 }
 0x690   :  { %v817_v0 = vpop.f32.mrf.mxu3 }
 0x6e1   :  { %v777_v37 = vpop.permute.xlu0 %776 }
 0x6e2   :  { %v779_v38 = vadd.f32 %v777_v37, %v769_v36 }
 0x6e4   :  { %3513 = vtanh.f32 %v779_v38 }
 0x6e5   :  { %3515 = vtanh.f32 %v587_v40 }
 0x6e6   :  { %3517 = vpow2.f32 %v3274_v59  ;;  %v342_v59 = vlaneseq }
 0x6ea   :  { %v3514_v41 = vpop.eup %3513 }
 0x6eb   :  { %782 = vrot.lane.b32.xlu1 %v3514_v41, %s4015_s13  ;;  %v3516_v42 = vpop.eup %3515  ;;  %v340_v41 = vld [vmem:[%s4928_s29] sm:$0xff]  ;;  %s4948_s29 = sld [smem:[#allocation34_spill]] }
 0x6ec   :  { %v3518_v60 = vpop.eup %3517 }
 0x6ed   :  { %v591_v61 = vadd.f32 1.0, %v3518_v60 }
 0x6ef   :  { %3519 = vrcp.f32 %v591_v61  ;;  %v603_v8 = vand.u32 2147483648, %v591_v61  ;;  %vm597_vm15 = vweird.f32 %v591_v61  ;;  %v601_v10 = vand.u32 2147483647, %v591_v61 }
 0x6f1   :  { %v604_v15 = vor.u32 1.1754944e-38, %v603_v8  ;;  %vm602_vm2 = vcmp.eq.f32.partialorder %v601_v10, 8.507059e+37  ;;  %v432_v8 = vld [vmem:[%s4930_s17 + $0x30] sm:$0xff]  ;;  %v431_v10 = vld [vmem:[%s4930_s17 + $0x28] sm:$0xff] }
 0x6f3   :  { %610 = vrot.lane.b32.xlu1 %v3516_v42, %s4015_s13 }
 0x6f5   :  { %v3520_v62 = vpop.eup %3519 }
 0x6f6   :  { %v593_v63 = vmul.f32 %v3520_v62, %v591_v61  ;;  %vm598_vm14 = vweird.f32 %v3520_v62 }
 0x6f7   :  { %vm599_vm1 = vmor %vm597_vm15, %vm598_vm14 }
 0x6f8   :  { %v594_v4 = vsub.f32 1.0, %v593_v63  ;;  %v358_v63 = vld [vmem:[%s4929_s26 + $0x10] sm:$0xff] }
 0x75d   :  { %v783_v54 = vpop.permute.xlu1 %782 }
 0x75e   :  { %v785_v55 = vmul.f32 %v783_v54, %v766_v33  ;;  %v363_v54 = vld [vmem:[%s4929_s26 + $0x38] sm:$0xff] }
 0x760   :  { %788 = vrot.lane.b32.xlu2 %v785_v55, %s4015_s13  ;;  %v362_v55 = vld [vmem:[%s4929_s26 + $0x30] sm:$0xff] }
 0x765   :  { %v611_v14 = vpop.permute.xlu1 %610 }
 0x7ba   :  { %v789_v57 = vpop.permute.xlu2 %788 }
 0x7bb   :  { %v4415_v58 = vsel %vm454_vm0, %v4379_v46, %v789_v57  ;;  %v595_v46 = vmul.f32 %v3520_v62, %v594_v4  ;;  %v360_v57 = vld [vmem:[%s4929_s26 + $0x20] sm:$0xff] }
 0x7bc   :  { %3280 = vmatmul.msk.f32.vlgmr.msrb.gmra.mxu1 %vm820_vm13, %v4415_v58 }
 0x7bd   :  { %v596_v6 = vadd.f32 %v3520_v62, %v595_v46 }
 0x7bf   :  { %v600_v13 = vsel %vm599_vm1, %v3520_v62, %v596_v6  ;;  %v359_v62 = vld [vmem:[%s4929_s26 + $0x18] sm:$0xff] }
 0x7c0   :  { %v4424_v16 = vsel %vm602_vm2, %v604_v15, %v600_v13  ;;  %v433_v6 = vld [vmem:[%s4930_s17 + $0x38] sm:$0xff]  ;;  %v430_v15 = vld [vmem:[%s4930_s17 + $0x20] sm:$0xff] }
 0x7c1   :  { %v613_v17 = vmul.f32 %v611_v14, %v4424_v16  ;;  %v608_v35 = vmul.f32 %v4424_v16, %v4363_v34  ;;  %v434_v14 = vld [vmem:[#allocation8] sm:$0xff] }
 0x7c2   :  { %983 = vmatpush.msra.mxu2 %v434_v14  ;;  %1066 = vmatpush.msra.mxu1 %v434_v14 }
 0x839   :  { %v841_v2 = vpop.f32.mrf.mxu1 }
 0x83a   :  { %v842_v3 = vadd.f32 %v841_v2, %v817_v0  ;;  %v4459_v0 = vand.u32 127, %v342_v59 }
 0x83c   :  { %v844_v5 = vadd.f32 %v842_v3, %v4420_v1  ;;  %v357_v3 = vld [vmem:[%s4929_s26 + $0x8] sm:$0xff] }
 0x83e   :  { %3521 = vtanh.f32 %v844_v5  ;;  %v3281_v18 = vmul.f32 -1.442695, %v844_v5  ;;  %v356_v5 = vld [vmem:[%s4929_s26] sm:$0xff] }
 0x840   :  { %3523 = vpow2.f32 %v3281_v18  ;;  %v427_v18 = vld [vmem:[%s4930_s17 + $0x8] sm:$0xff] }
 0x844   :  { %v3522_v7 = vpop.eup %3521 }
 0x845   :  { %867 = vrot.lane.b32.xlu0 %v3522_v7, %s4015_s13  ;;  %v4018_v7 = vmov 1.0  }
 0x846   :  { %v3524_v19 = vpop.eup %3523 }
 0x847   :  { %v848_v20 = vadd.f32 1.0, %v3524_v19  ;;  %v426_v19 = vld [vmem:[%s4930_s17] sm:$0xff] }
 0x849   :  { %3525 = vrcp.f32 %v848_v20  ;;  %v860_v27 = vand.u32 2147483648, %v848_v20  ;;  %vm854_vm4 = vweird.f32 %v848_v20  ;;  %v858_v28 = vand.u32 2147483647, %v848_v20 }
 0x84b   :  { %v861_v30 = vor.u32 1.1754944e-38, %v860_v27  ;;  %vm859_vm6 = vcmp.eq.f32.partialorder %v858_v28, 8.507059e+37 }
 0x84d   :  { %615 = vrot.lane.b32.xlu0 %v613_v17, %s4016_s30  ;;  %v428_v17 = vld [vmem:[%s4930_s17 + $0x10] sm:$0xff] }
 0x84f   :  { %v3526_v21 = vpop.eup %3525 }
 0x850   :  { %v850_v22 = vmul.f32 %v3526_v21, %v848_v20  ;;  %vm855_vm3 = vweird.f32 %v3526_v21 }
 0x851   :  { %vm856_vm5 = vmor %vm854_vm4, %vm855_vm3  ;;  %vm1208_vm4 = vcmask 64512  }
 0x852   :  { %v851_v23 = vsub.f32 1.0, %v850_v22 }
 0x854   :  { %v852_v25 = vmul.f32 %v3526_v21, %v851_v23 }
 0x855   :  { %345 = vperm.xlu0 %3438, %v340_v41  }
 0x856   :  { %v853_v26 = vadd.f32 %v3526_v21, %v852_v25 }
 0x858   :  { %v857_v29 = vsel %vm856_vm5, %v3526_v21, %v853_v26 }
 0x859   :  { %v862_v32 = vsel %vm859_vm6, %v861_v30, %v857_v29  ;;  %v4492_v29 = vld [vmem:[%s4931_s16] sm:$0x1] }
 0x85a   :  { %v865_v40 = vmul.f32 0.0, %v862_v32 }
 0x8b7   :  { %v868_v31 = vpop.permute.xlu0 %867 }
 0x8b8   :  { %v870_v33 = vmul.f32 %v868_v31, %v862_v32 }
 0x8ba   :  { %872 = vrot.lane.b32.xlu2 %v870_v33, %s4016_s30 }
 0x8bf   :  { %v616_v36 = vpop.permute.xlu0 %615 }
 0x8c0   :  { %v618_v37 = vadd.f32 %v616_v36, %v608_v35 }
 0x8c2   :  { %3527 = vtanh.f32 %v618_v37 }
 0x8c7   :  { %v346_v4 = vpop.permute.xlu0 %345 }
 0x8c8   :  { %v3528_v38 = vpop.eup %3527  ;;  %vm350_vm7 = vcmp.eq.s32.totalorder %v4459_v0, %v346_v4 }
 0x8c9   :  { %621 = vrot.lane.b32.xlu2 %v3528_v38, %s4015_s13 }
 0x8d1   :  { %348 = vperm.xlu2 %3439, %v341_v39  }
 0x8d9   :  { %796 = vrot.lane.b32.xlu2 %v4392_v11, %s4015_s13  ;;  %v368_v11 = vld [vmem:[%s4929_s26 + $0x60] sm:$0xff] }
 0x8da   :  { %375 = vmatpush.msra.mxu0 %v368_v11 }
 0x8dc   :  { %376 = vmatpush.msra.mxu0 %v367_v49 }
 0x8de   :  { %377 = vmatpush.msra.mxu0 %v366_v51 }
 0x8e0   :  { %378 = vmatpush.msra.mxu0 %v365_v52 }
 0x8e2   :  { %379 = vmatpush.msra.mxu0 %v364_v53 }
 0x8e4   :  { %380 = vmatpush.msra.mxu0 %v363_v54 }
 0x8e6   :  { %381 = vmatpush.msra.mxu0 %v362_v55 }
 0x8e8   :  { %382 = vmatpush.msra.mxu0 %v361_v56 }
 0x8ea   :  { %383 = vmatpush.msra.mxu0 %v360_v57 }
 0x8ec   :  { %384 = vmatpush.msra.mxu0 %v359_v62 }
 0x8ee   :  { %385 = vmatpush.msra.mxu0 %v358_v63 }
 0x8f0   :  { %386 = vmatpush.msra.mxu0 %v357_v3 }
 0x8f2   :  { %387 = vmatpush.msra.mxu0 %v356_v5 }
 0x8f3   :  { %3268 = vmatmul.msk.f32.vlgmr.msra.gmra.mxu0 %vm350_vm7, %v4018_v7 }
 0x8f4   :  { %996 = vmatpush.msrb.mxu0 %v433_v6 }
 0x8f6   :  { %997 = vmatpush.msrb.mxu0 %v432_v8 }
 0x8f8   :  { %998 = vmatpush.msrb.mxu0 %v431_v10 }
 0x8fa   :  { %999 = vmatpush.msrb.mxu0 %v430_v15 }
 0x914   :  { %v873_v42 = vpop.permute.xlu2 %872 }
 0x915   :  { %v4439_v34 = vadd.f32 %v873_v42, %v865_v40 }
 0x917   :  { %3529 = vtanh.f32 %v4439_v34 }
 0x91d   :  { %v3530_v43 = vpop.eup %3529 }
 0x91e   :  { %878 = vrot.lane.b32.xlu1 %v3530_v43, %s4015_s13 }
 0x923   :  { %v622_v2 = vpop.permute.xlu2 %621 }
 0x924   :  { %v624_v46 = vmul.f32 %v622_v2, %v4424_v16  ;;  %v429_v16 = vld [vmem:[%s4930_s17 + $0x18] sm:$0xff] }
 0x925   :  { %1000 = vmatpush.msrb.mxu0 %v429_v16 }
 0x927   :  { %1001 = vmatpush.msrb.mxu0 %v428_v17 }
 0x929   :  { %1002 = vmatpush.msrb.mxu0 %v427_v18 }
 0x92b   :  { %v349_v13 = vpop.permute.xlu2 %348  ;;  %1003 = vmatpush.msrb.mxu0 %v426_v19 }
 0x92c   :  { %vm351_vm8 = vcmp.eq.s32.totalorder %v4459_v0, %v349_v13 }
 0x92d   :  { %3269 = vmatmul.msk.f32.gmra.mxu0 %vm351_vm8, %v4018_v7 }
 0x933   :  { %v797_v21 = vpop.permute.xlu2 %796 }
 0x970   :  { %v4487_v25 = vpop.f32.mrf.mxu0 }
 0x990   :  { %v879_v60 = vpop.permute.xlu1 %878 }
 0x991   :  { %v881_v61 = vmul.f32 %v879_v60, %v862_v32 }
 0x993   :  { %883 = vrot.lane.b32.xlu1 %v881_v61, %s4016_s30 }
 0x99b   :  { %793 = vrot.lane.b32.xlu1 %v624_v46, %s4016_s30 }
 0x9aa   :  { %v4489_v26 = vpop.f32.mrf.mxu0 }
 0xa05   :  { %v4477_v20 = vpop.permute.xlu1 %883 }
 0xa06   :  { %3282 = vmatmul.msk.f32.vlgmr.msrb.gmra.mxu2 %vm454_vm0, %v4477_v20 }
 0xa07   :  { %1079 = vmatpush.msrb.mxu2 %v433_v6 }
 0xa09   :  { %1080 = vmatpush.msrb.mxu2 %v432_v8 }
 0xa0b   :  { %1081 = vmatpush.msrb.mxu2 %v431_v10 }
 0xa0d   :  { %1082 = vmatpush.msrb.mxu2 %v430_v15  ;;  %v794_v22 = vpop.permute.xlu1 %793  ;;  %v4506_v15 = vld [vmem:[%s4932_s25] sm:$0xff] }
 0xa0e   :  { %v799_v23 = vsel %vm454_vm0, %v794_v22, %v797_v21  ;;  %984 = vmatmul.f32.vlgmr.msra.gmra.mxu2 %v4014_v9  ;;  %1227 = vmatpush.msrb.mxu1 %v4506_v15  ;;  %vm1267_vm5 = vcmp.gt.f32.partialorder %v4506_v15, 0.5 }
 0xa0f   :  { %3283 = vmatmul.msk.f32.vlgmr.msrb.gmra.mxu3 %vm820_vm13, %v799_v23  ;;  %3285 = vmatmul.msk.f32.vlgmr.msrb.gmra.mxu0 %vm820_vm13, %v799_v23 }
 0xa10   :  { %1083 = vmatpush.msrb.mxu2 %v429_v16  ;;  %v1204_v16 = vshrl.u32 %v342_v59, 7 }
 0xa12   :  { %1084 = vmatpush.msrb.mxu2 %v428_v17  ;;  %vm1205_vm3 = vcmp.le.s32.totalorder %v4459_v0, %v1204_v16 }
 0xa14   :  { %1085 = vmatpush.msrb.mxu2 %v427_v18  ;;  %v4513_v18 = vsel %vm1205_vm3, 1.0, %v4014_v9 }
 0xa16   :  { %1086 = vmatpush.msrb.mxu2 %v426_v19 }
 0xa17   :  { %3288 = vmatmul.msk.f32.vlgmr.msrb.gmra.mxu2 %vm820_vm13, %v4415_v58 }
 0xa89   :  { %v904_v27 = vpop.f32.mrf.mxu2 }
 0xa8c   :  { %v1005_v28 = vpop.f32.mrf.mxu0 }
 0xa91   :  { %v985_v30 = vpop.f32.mrf.mxu2 }
 0xa92   :  { %v1006_v31 = vadd.f32 %v1005_v28, %v985_v30  ;;  %v927_v41 = vpop.f32.mrf.mxu3 }
 0xa93   :  { %v928_v45 = vadd.f32 %v927_v41, %v904_v27 }
 0xa94   :  { %v1008_v32 = vadd.f32 %v1006_v31, %v4492_v29 }
 0xa95   :  { %v930_v47 = vadd.f32 %v928_v45, %v4420_v1 }
 0xa96   :  { %3531 = vtanh.f32 %v1008_v32  ;;  %v3286_v35 = vmul.f32 -1.442695, %v1008_v32  ;;  %v1269_v32 = vsel %vm1267_vm5, 1, %v4017_v24 }
 0xa97   :  { %v3284_v56 = vmul.f32 -1.442695, %v930_v47 }
 0xa98   :  { %3533 = vpow2.f32 %v3286_v35 }
 0xa9a   :  { %v1088_v19 = vpop.f32.mrf.mxu2 }
 0xa9c   :  { %v3532_v33 = vpop.eup %3531 }
 0xa9d   :  { %1031 = vrot.lane.b32.xlu0 %v3532_v33, %s4015_s13  ;;  %v4530_v33 = vld [vmem:[%s4933_s15] sm:$0xff] }
 0xa9e   :  { %v3534_v36 = vpop.eup %3533  ;;  %v1349_v35 = vcvt.s32.f32 %v4530_v33 }
 0xa9f   :  { %v1012_v58 = vadd.f32 1.0, %v3534_v36 }
 0xaa1   :  { %3535 = vrcp.f32 %v1012_v58  ;;  %v1024_v43 = vand.u32 2147483648, %v1012_v58  ;;  %vm1018_vm10 = vweird.f32 %v1012_v58  ;;  %v1022_v44 = vand.u32 2147483647, %v1012_v58 }
 0xaa2   :  { %3537 = vtanh.f32 %v930_v47 }
 0xaa3   :  { %v1025_v11 = vor.u32 1.1754944e-38, %v1024_v43  ;;  %vm1023_vm12 = vcmp.eq.f32.partialorder %v1022_v44, 8.507059e+37 }
 0xaa7   :  { %v3536_v37 = vpop.eup %3535 }
 0xaa8   :  { %v1014_v38 = vmul.f32 %v3536_v37, %v1012_v58  ;;  %vm1019_vm9 = vweird.f32 %v3536_v37  ;;  %v3538_v51 = vpop.eup %3537 }
 0xaa9   :  { %vm1020_vm11 = vmor %vm1018_vm10, %vm1019_vm9 }
 0xaaa   :  { %v1015_v39 = vsub.f32 1.0, %v1014_v38 }
 0xaac   :  { %v1016_v40 = vmul.f32 %v3536_v37, %v1015_v39 }
 0xaae   :  { %v1017_v42 = vadd.f32 %v3536_v37, %v1016_v40 }
 0xab0   :  { %v1021_v48 = vsel %vm1020_vm11, %v3536_v37, %v1017_v42  ;;  %vm1146_vm11 = vcmask 1040384  }
 0xab1   :  { %v1026_v12 = vsel %vm1023_vm12, %v1025_v11, %v1021_v48 }
 0xab2   :  { %v1029_v52 = vmul.f32 0.0, %v1026_v12 }
 0xb0f   :  { %v1032_v49 = vpop.permute.xlu0 %1031 }
 0xb10   :  { %v1034_v50 = vmul.f32 %v1032_v49, %v1026_v12 }
 0xb12   :  { %1036 = vrot.lane.b32.xlu1 %v1034_v50, %s4016_s30 }
 0xb1a   :  { %953 = vrot.lane.b32.xlu1 %v3538_v51, %s4015_s13 }
 0xb84   :  { %v1037_v53 = vpop.permute.xlu1 %1036 }
 0xb85   :  { %v4499_v54 = vadd.f32 %v1037_v53, %v1029_v52 }
 0xb87   :  { %3539 = vtanh.f32 %v4499_v54 }
 0xb88   :  { %3541 = vpow2.f32 %v3284_v56 }
 0xb8c   :  { %v954_v10 = vpop.permute.xlu1 %953 }
 0xb8d   :  { %v3540_v55 = vpop.eup %3539 }
 0xb8e   :  { %1042 = vrot.lane.b32.xlu2 %v3540_v55, %s4015_s13  ;;  %v3542_v1 = vpop.eup %3541  ;;  %v1331_v55 = vsub.f32 1.0, %v4506_v15 }
 0xb8f   :  { %v934_v57 = vadd.f32 1.0, %v3542_v1 }
 0xb91   :  { %3543 = vrcp.f32 %v934_v57  ;;  %v946_v5 = vand.u32 2147483648, %v934_v57  ;;  %vm940_vm15 = vweird.f32 %v934_v57  ;;  %v944_v46 = vand.u32 2147483647, %v934_v57 }
 0xb93   :  { %v947_v8 = vor.u32 1.1754944e-38, %v946_v5  ;;  %vm945_vm2 = vcmp.eq.f32.partialorder %v944_v46, 8.507059e+37  ;;  %v440_v46 = vld [vmem:[%s4934_s23] sm:$0xff] }
 0xb97   :  { %v3544_v60 = vpop.eup %3543 }
 0xb98   :  { %v936_v61 = vmul.f32 %v3544_v60, %v934_v57  ;;  %vm941_vm14 = vweird.f32 %v3544_v60 }
 0xb99   :  { %vm942_vm1 = vmor %vm940_vm15, %vm941_vm14 }
 0xb9a   :  { %v937_v62 = vsub.f32 1.0, %v936_v61  ;;  %v447_v61 = vld [vmem:[%s4934_s23 + $0x38] sm:$0xff] }
 0xb9b   :  { %1162 = vmatpush.msra.mxu3 %v447_v61 }
 0xb9c   :  { %v938_v63 = vmul.f32 %v3544_v60, %v937_v62  ;;  %v446_v62 = vld [vmem:[%s4934_s23 + $0x30] sm:$0xff] }
 0xb9d   :  { %1163 = vmatpush.msra.mxu3 %v446_v62  ;;  %v4019_v62 = vmov 32.0  }
 0xb9e   :  { %v939_v3 = vadd.f32 %v3544_v60, %v938_v63  ;;  %v444_v63 = vld [vmem:[%s4934_s23 + $0x20] sm:$0xff] }
 0xba0   :  { %v943_v6 = vsel %vm942_vm1, %v3544_v60, %v939_v3  ;;  %v442_v3 = vld [vmem:[%s4934_s23 + $0x10] sm:$0xff]  ;;  %vm1292_vm1 = vcmask 1041408  }
 0xba1   :  { %v948_v13 = vsel %vm945_vm2, %v947_v8, %v943_v6  ;;  %v452_v6 = vld [vmem:[#allocation10 + $0x18] sm:$0xff]  ;;  %vm1285_vm2 = vcmask 15360  }
 0xba2   :  { %v956_v14 = vmul.f32 %v954_v10, %v948_v13  ;;  %v951_v27 = vmul.f32 %v948_v13, %v4439_v34  ;;  %1193 = vmatpush.msra.mxu0 %v452_v6 }
 0xbe8   :  { %v1043_v2 = vpop.permute.xlu2 %1042 }
 0xbe9   :  { %v1045_v4 = vmul.f32 %v1043_v2, %v1026_v12  ;;  %v443_v2 = vld [vmem:[%s4934_s23 + $0x18] sm:$0xff] }
 0xbeb   :  { %1047 = vrot.lane.b32.xlu0 %v1045_v4, %s4016_s30 }
 0xbf3   :  { %958 = vrot.lane.b32.xlu0 %v956_v14, %s4016_s30 }
 0xc5d   :  { %v1048_v17 = vpop.permute.xlu0 %1047 }
 0xc5e   :  { %3287 = vmatmul.msk.f32.vlgmr.msra.gmra.mxu1 %vm454_vm0, %v1048_v17 }
 0xc65   :  { %v959_v59 = vpop.permute.xlu0 %958 }
 0xc66   :  { %3293 = vmatmul.msk.f32.vlgmr.msrb.gmra.mxu1 %vm1208_vm4, %v4513_v18  ;;  %v961_v28 = vadd.f32 %v959_v59, %v951_v27 }
 0xcdb   :  { %v1068_v21 = vpop.f32.mrf.mxu1 }
 0xcdc   :  { %v1089_v22 = vadd.f32 %v1088_v19, %v1068_v21  ;;  %v451_v19 = vld [vmem:[#allocation10 + $0x10] sm:$0xff]  ;;  %v450_v21 = vld [vmem:[#allocation10 + $0x8] sm:$0xff] }
 0xcdd   :  { %1194 = vmatpush.msra.mxu0 %v451_v19 }
 0xcde   :  { %v1091_v23 = vadd.f32 %v1089_v22, %v4492_v29  ;;  %v4526_v29 = vld [vmem:[%s4932_s25 + $0x8] sm:$0xff] }
 0xcdf   :  { %v1332_v34 = vsub.f32 1.0, %v4526_v29  ;;  %vm1268_vm10 = vcmp.gt.f32.partialorder %v4526_v29, 0.5  ;;  %1195 = vmatpush.msra.mxu0 %v450_v21  ;;  %v449_v22 = vld [vmem:[#allocation10] sm:$0xff] }
 0xce0   :  { %3545 = vtanh.f32 %v1091_v23  ;;  %v3289_v36 = vmul.f32 -1.442695, %v1091_v23  ;;  %v1270_v53 = vsel %vm1268_vm10, 1, %v4017_v24  ;;  %v445_v24 = vld [vmem:[%s4934_s23 + $0x28] sm:$0xff]  ;;  %v3466_v23 = vld [vmem:[%s4935_s28] ss:$0 sm:$0xff] }
 0xce1   :  { %3547 = vtanh.f32 %v961_v28  ;;  %1164 = vmatpush.msra.mxu3 %v445_v24  ;;  %1196 = vmatpush.msra.mxu0 %v449_v22 }
 0xce2   :  { %3549 = vpow2.f32 %v3289_v36 }
 0xce3   :  { %v1229_v51 = vpop.f32.mrf.mxu1  ;;  %1165 = vmatpush.msra.mxu3 %v444_v63  ;;  %1248 = vmatpush.msrb.mxu0 %v4526_v29 }
 0xce4   :  { %v3294_v52 = vadd.f32 -1.0, %v1229_v51 }
 0xce5   :  { %1166 = vmatpush.msra.mxu3 %v443_v2 }
 0xce6   :  { %v3546_v30 = vpop.eup %3545 }
 0xce7   :  { %1114 = vrot.lane.b32.xlu2 %v3546_v30, %s4015_s13  ;;  %v3548_v31 = vpop.eup %3547  ;;  %1167 = vmatpush.msra.mxu3 %v442_v3 }
 0xce8   :  { %v3550_v58 = vpop.eup %3549 }
 0xce9   :  { %v1095_v37 = vadd.f32 1.0, %v3550_v58  ;;  %v3467_v58 = vld [vmem:[%s4936_s3] ss:$0 sm:$0xff] }
 0xceb   :  { %3551 = vrcp.f32 %v1095_v37  ;;  %v1107_v43 = vand.u32 2147483648, %v1095_v37  ;;  %vm1101_vm7 = vweird.f32 %v1095_v37  ;;  %v1105_v44 = vand.u32 2147483647, %v1095_v37 }
 0xced   :  { %v1108_v48 = vor.u32 1.1754944e-38, %v1107_v43  ;;  %vm1106_vm9 = vcmp.eq.f32.partialorder %v1105_v44, 8.507059e+37 }
 0xcef   :  { %964 = vrot.lane.b32.xlu2 %v3548_v31, %s4015_s13 }
 0xcf1   :  { %v3552_v38 = vpop.eup %3551 }
 0xcf2   :  { %v1097_v39 = vmul.f32 %v3552_v38, %v1095_v37  ;;  %vm1102_vm6 = vweird.f32 %v3552_v38 }
 0xcf3   :  { %vm1103_vm8 = vmor %vm1101_vm7, %vm1102_vm6 }
 0xcf4   :  { %v1098_v40 = vsub.f32 1.0, %v1097_v39 }
 0xcf6   :  { %v1099_v41 = vmul.f32 %v3552_v38, %v1098_v40 }
 0xcf7   :  { %1139 = vrot.lane.b32.xlu2 %v1045_v4, %s4015_s13 }
 0xcf8   :  { %v1100_v42 = vadd.f32 %v3552_v38, %v1099_v41  ;;  %v1351_v41 = vsub.f32 1.0, %v1349_v35 }
 0xcfa   :  { %v1104_v45 = vsel %vm1103_vm8, %v3552_v38, %v1100_v42 }
 0xcfb   :  { %v1109_v47 = vsel %vm1106_vm9, %v1108_v48, %v1104_v45 }
 0xcfc   :  { %v1112_v56 = vmul.f32 %v1109_v47, %v4499_v54  ;;  %v441_v54 = vld [vmem:[%s4934_s23 + $0x8] sm:$0xff] }
 0xcfd   :  { %1168 = vmatpush.msra.mxu3 %v441_v54 }
 0xcff   :  { %1272 = vperm.xlu2 %3439, %v1269_v32   ;;  %1169 = vmatpush.msra.mxu3 %v440_v46  ;;  %v1254_v32 = vcvt.s32.f32 %v4459_v0 }
 0xd07   :  { %1321 = vperm.xlu2 %3439, %v4506_v15  }
 0xd0f   :  { %1340 = vperm.xlu2 %3439, %v1332_v34  }
 0xd17   :  { %1370 = vperm.xlu2 %3439, %v1349_v35  }
 0xd41   :  { %v1115_v11 = vpop.permute.xlu2 %1114 }
 0xd42   :  { %v1117_v49 = vmul.f32 %v1115_v11, %v1109_v47 }
 0xd44   :  { %1119 = vrot.lane.b32.xlu1 %v1117_v49, %s4016_s30 }
 0xd49   :  { %v965_v12 = vpop.permute.xlu2 %964 }
 0xd4a   :  { %v967_v50 = vmul.f32 %v965_v12, %v948_v13 }
 0xd4c   :  { %1136 = vrot.lane.b32.xlu1 %v967_v50, %s4016_s30  ;;  %v3468_v50 = vld [vmem:[%s4937_s1] ss:$0 sm:$0xff]  ;;  %s4944_s30 = sld [smem:[#allocation53_spill]] }
 0xd51   :  { %v1140_v10 = vpop.permute.xlu2 %1139 }
 0xd54   :  { %1257 = vperm.xlu1 %3440, %v3294_v52  }
 0xd59   :  { %v1273_v36 = vpop.permute.xlu2 %1272 }
 0xd5a   :  { %vm1277_vm14 = vcmp.eq.s32.totalorder %v1273_v36, 1 }
 0xd5c   :  { %1275 = vperm.xlu1 %3440, %v1270_v53   ;;  %v1383_v53 = vld [vmem:[%s4938_s9] sm:$0xff] }
 0xd61   :  { %v1322_v42 = vpop.permute.xlu2 %1321 }
 0xd64   :  { %1335 = vperm.xlu1 %3440, %v1331_v55  }
 0xd69   :  { %v1341_v48 = vpop.permute.xlu2 %1340 }
 0xd71   :  { %v1371_v12 = vpop.permute.xlu2 %1370 }
 0xdb6   :  { %v1120_v1 = vpop.permute.xlu1 %1119 }
 0xdb7   :  { %v1122_v57 = vadd.f32 %v1120_v1, %v1112_v56 }
 0xdb9   :  { %3553 = vtanh.f32 %v1122_v57 }
 0xdba   :  { %3555 = vrcp.f32 %v4019_v62 }
 0xdbe   :  { %v1137_v8 = vpop.permute.xlu1 %1136 }
 0xdbf   :  { %v3554_v60 = vpop.eup %3553  ;;  %v1142_v13 = vsel %vm454_vm0, %v1137_v8, %v1140_v10 }
 0xdc0   :  { %1125 = vrot.lane.b32.xlu0 %v3554_v60, %s4015_s13  ;;  %v1144_v14 = vrot.slane %v1142_v13, 7  ;;  %v3556_v24 = vpop.eup %3555 }
 0xdc1   :  { %v1397_v63 = vmul.f32 32.0, %v3556_v24  ;;  %vm1401_vm7 = vweird.f32 %v3556_v24 }
 0xdc3   :  { %v1398_v2 = vsub.f32 1.0, %v1397_v63 }
 0xdc6   :  { %v1258_v34 = vpop.permute.xlu1 %1257 }
 0xdc7   :  { %vm1265_vm12 = vcmp.eq.f32.partialorder %v1254_v32, %v1258_v34 }
 0xdc8   :  { %vm1279_vm15 = vmand %vm1265_vm12, %vm1277_vm14 }
 0xdc9   :  { %v3297_v39 = vsel %vm1279_vm15, 1.0, %v4014_v9  ;;  %vm1525_vm15 = vcmask 130048  }
 0xdce   :  { %v1276_v43 = vpop.permute.xlu1 %1275 }
 0xdcf   :  { %vm1278_vm3 = vcmp.eq.s32.totalorder %v1276_v43, 1 }
 0xdd6   :  { %v1336_v33 = vpop.permute.xlu1 %1335 }
 0xdd7   :  { %v1343_v49 = vmul.f32 %v1336_v33, %v4487_v25 }
 0xe32   :  { %v1126_v4 = vpop.permute.xlu0 %1125 }
 0xe33   :  { %v1128_v5 = vmul.f32 %v1126_v4, %v1109_v47  ;;  %v3465_v47 = vld [vmem:[%s4937_s1 + $0x1] ss:$0 sm:$0xff]  ;;  %v1399_v4 = vmul.f32 %v3556_v24, %v1398_v2  ;;  %v3471_v2 = vld [vmem:[%s4940_s10] ss:$0 sm:$0xff] }
 0xe34   :  { %v1379_v55 = vmul.f32 %v3465_v47, %v1371_v12 }
 0xe35   :  { %1131 = vrot.lane.b32.xlu0 %v1128_v5, %s4015_s13  ;;  %v1344_v5 = vmul.f32 %v1341_v48, %v4489_v26  ;;  %v1400_v13 = vadd.f32 %v3556_v24, %v1399_v4 }
 0xea7   :  { %v1132_v15 = vpop.permute.xlu0 %1131 }
 0xea8   :  { %v1134_v16 = vsel %vm454_vm0, %v4477_v20, %v1132_v15  ;;  %v1348_v20 = vld [vmem:[%s4933_s15 + $0x8] sm:$0xff]  ;;  %s3907_s15 = scalar_lea.hbm %s4254_s27, 16 }
 0xea9   :  { %v1147_v17 = vsel %vm1146_vm11, %v1134_v16, %v1144_v14  ;;  %v1350_v30 = vcvt.s32.f32 %v1348_v20 }
 0xeaa   :  { %3290 = vmatmul.msk.f32.vlgmr.msra.gmra.mxu3 %vm820_vm13, %v1147_v17  ;;  %v4576_v17 = vsel %vm1401_vm7, %v3556_v24, %v1400_v13 }
 0xeab   :  { %v1352_v31 = vsub.f32 1.0, %v1350_v30 }
 0xead   :  { %1361 = vperm.xlu1 %3440, %v1352_v31  }
 0xf1f   :  { %v1362_v25 = vpop.permute.xlu1 %1361 }
 0xf20   :  { %v1366_v8 = vmul.f32 %v3468_v50, %v1362_v25 }
 0xf2d   :  { %v1171_v59 = vpop.f32.mrf.mxu3 }
 0xf2e   :  { %v1172_v27 = vadd.f32 %v3466_v23, %v1171_v59 }
 0xf30   :  { %v1174_v28 = vmax.f32 %v1172_v27, 0.0 }
 0xf32   :  { %3291 = vmatmul.msk.f32.vlgmr.msra.gmra.mxu0 %vm454_vm0, %v1174_v28 }
 0xf3a   :  { %3295 = vmatmul.msk.f32.vlgmr.msrb.gmra.mxu0 %vm1208_vm4, %v4513_v18 }
 0xfaf   :  { %v1198_v37 = vpop.f32.mrf.mxu0 }
 0xfb0   :  { %v1199_v38 = vadd.f32 %v3467_v58, %v1198_v37  ;;  %v1453_v58 = vld [vmem:[%s4939_s8 + $0x10] sm:$0xff]  ;;  %v1454_v37 = vld [vmem:[%s4939_s8 + $0x18] sm:$0xff] }
 0xfb2   :  { %3299 = vmatpush.msk.msra.mxu1 %vm1292_vm1, %v1199_v38  ;;  %v1457_v38 = vpack.c.bf16 %v1454_v37, %v1453_v58  ;;  %vm1578_vm1 = vcmask 1043456  }
 0xfb3   :  { %3300 = vmatmul.msk.f32.vlgmr.msra.gmra.mxu1 %vm1285_vm2, %v3297_v39 }
 0xfb4   :  { %1471 = vmatpush.bf16.msra.mxu2 %v1457_v38 }
 0xfb7   :  { %v1250_v18 = vpop.f32.mrf.mxu0 }
 0xfb8   :  { %v3296_v40 = vadd.f32 -1.0, %v1250_v18  ;;  %v1451_v18 = vld [vmem:[%s4939_s8] sm:$0xff] }
 0xfba   :  { %1262 = vperm.xlu0 %3438, %v3296_v40   ;;  %v1452_v40 = vld [vmem:[%s4939_s8 + $0x8] sm:$0xff] }
 0xfc2   :  { %1326 = vperm.xlu0 %3438, %v4526_v29  }
 0xfca   :  { %1356 = vperm.xlu0 %3438, %v1351_v41   ;;  %v1456_v41 = vpack.c.bf16 %v1452_v40, %v1451_v18 }
 0xfcc   :  { %1472 = vmatpush.bf16.msra.mxu2 %v1456_v41 }
 0xfd2   :  { %1375 = vperm.xlu0 %3438, %v1350_v30  }
0x102c   :  { %v1263_v44 = vpop.permute.xlu0 %1262 }
0x102d   :  { %vm1266_vm5 = vcmp.eq.f32.partialorder %v1254_v32, %v1263_v44 }
0x102e   :  { %vm1280_vm6 = vmand %vm1266_vm5, %vm1278_vm3 }
0x102f   :  { %v3298_v45 = vsel %vm1280_vm6, 1.0, %v4014_v9 }
0x1030   :  { %3301 = vmatmul.msk.f32.gmra.mxu1 %vm1285_vm2, %v3298_v45  ;;  %v1313_v29 = vpop.f32.mrf.mxu1 }
0x1031   :  { %v1329_v35 = vmul.f32 %v1322_v42, %v1313_v29 }
0x1033   :  { %v1345_v51 = vadd.f32 %v1343_v49, %v1329_v35 }
0x1034   :  { %v1327_v11 = vpop.permute.xlu0 %1326 }
0x1035   :  { %v1384_v57 = vadd.f32 %v1383_v53, %v1345_v51 }
0x103c   :  { %v1357_v52 = vpop.permute.xlu0 %1356 }
0x103d   :  { %v1365_v56 = vmul.f32 %v3468_v50, %v1357_v52  ;;  %v3469_v52 = vld [vmem:[#allocation2] ss:$0 sm:$0xff] }
0x103f   :  { %v1381_v1 = vadd.f32 %v1379_v55, %v1365_v56 }
0x1041   :  { %v1386_v60 = vadd.f32 %v1384_v57, %v1381_v1  ;;  %v3470_v1 = vld [vmem:[#allocation5] ss:$0 sm:$0xff] }
0x1043   :  { %v1390_v61 = vsel %vm454_vm0, %v1386_v60, 0.0 }
0x1044   :  { %1391 = vadd.xlane.f32.xlu1 %v1390_v61  ;;  %v1376_v3 = vpop.permute.xlu0 %1375 }
0x1045   :  { %v1380_v46 = vmul.f32 %v3465_v47, %v1376_v3 }
0x1047   :  { %v1382_v14 = vadd.f32 %v1380_v46, %v1366_v8 }
0x10ad   :  { %v1316_v54 = vpop.f32.mrf.mxu1 }
0x10ae   :  { %v1330_v6 = vmul.f32 %v1327_v11, %v1316_v54 }
0x10b0   :  { %v1346_v10 = vadd.f32 %v1344_v5, %v1330_v6 }
0x10b2   :  { %v1385_v15 = vadd.f32 %v1383_v53, %v1346_v10 }
0x10b4   :  { %v1387_v16 = vadd.f32 %v1385_v15, %v1382_v14 }
0x10b6   :  { %v1393_v19 = vsel %vm454_vm0, %v1387_v16, 0.0 }
0x10b7   :  { %v1392_v21 = vpop.xlane.xlu1 %1391  ;;  %1394 = vadd.xlane.f32.xlu2 %v1393_v19 }
0x10b8   :  { %v1403_v22 = vmul.f32 %v4576_v17, %v1392_v21 }
0x10ba   :  { %v1405_v26 = vsub.f32 %v1386_v60, %v1403_v22 }
0x10bc   :  { %v1407_v23 = vmul.f32 %v1405_v26, %v1405_v26 }
0x10be   :  { %v1409_v59 = vsel %vm454_vm0, %v1407_v23, 0.0 }
0x10bf   :  { %1410 = vadd.xlane.f32.xlu0 %v1409_v59 }
0x112a   :  { %v1395_v27 = vpop.xlane.xlu2 %1394 }
0x112b   :  { %v1404_v28 = vmul.f32 %v4576_v17, %v1395_v27 }
0x112d   :  { %v1406_v20 = vsub.f32 %v1387_v16, %v1404_v28 }
0x112f   :  { %v1408_v30 = vmul.f32 %v1406_v20, %v1406_v20 }
0x1131   :  { %v1412_v31 = vsel %vm454_vm0, %v1408_v30, 0.0  ;;  %v1483_v30 = vld [vmem:[%s4941_s4] sm:$0x1] }
0x1132   :  { %1413 = vadd.xlane.f32.xlu2 %v1412_v31  ;;  %v1411_v32 = vpop.xlane.xlu0 %1410  ;;  %v1484_v31 = vsub.f32 1.0, %v1483_v30  ;;  %v1481_v30 = vld [vmem:[%s4942_s19 + $0x10] sm:$0xff] }
0x1133   :  { %v1415_v34 = vmul.f32 %v1411_v32, %v4576_v17 }
0x1134   :  { %v1485_v32 = vmul.f32 -1e+09, %v1484_v31  ;;  %v1482_v31 = vld [vmem:[%s4942_s19 + $0x18] sm:$0xff] }
0x1135   :  { %v1417_v36 = vadd.f32 1e-12, %v1415_v34 }
0x1136   :  { %v4615_v34 = vperm.slane %v1485_v32, 0  ;;  %v1720_v32 = vpack.c.bf16 %v1482_v31, %v1481_v30 }
0x1137   :  { %3557 = vrsqrt.f32 %v1417_v36  ;;  %vm1425_vm9 = vweird.f32 %v1417_v36 }
0x113d   :  { %v3558_v39 = vpop.eup %3557 }
0x113e   :  { %v1420_v42 = vmul.f32 %v3558_v39, %v1417_v36  ;;  %vm1426_vm8 = vweird.f32 %v3558_v39 }
0x113f   :  { %vm1427_vm10 = vmor %vm1425_vm9, %vm1426_vm8 }
0x1140   :  { %v1421_v43 = vmul.f32 %v3558_v39, %v1420_v42 }
0x1142   :  { %v1422_v29 = vmul.f32 0.5, %v1421_v43 }
0x1144   :  { %v1423_v11 = vsub.f32 1.5, %v1422_v29 }
0x1146   :  { %v1424_v35 = vmul.f32 %v3558_v39, %v1423_v11 }
0x1148   :  { %v1428_v12 = vsel %vm1427_vm10, %v3558_v39, %v1424_v35 }
0x1149   :  { %v1439_v53 = vmul.f32 %v1428_v12, %v1405_v26 }
0x114b   :  { %v1444_v57 = vmul.f32 %v3469_v52, %v1439_v53 }
0x114d   :  { %v4589_v62 = vadd.f32 %v3470_v1, %v1444_v57 }
0x11a5   :  { %v1414_v44 = vpop.xlane.xlu2 %1413 }
0x11a6   :  { %v1416_v45 = vmul.f32 %v1414_v44, %v4576_v17 }
0x11a8   :  { %v1418_v48 = vadd.f32 1e-12, %v1416_v45 }
0x11aa   :  { %3559 = vrsqrt.f32 %v1418_v48  ;;  %vm1435_vm12 = vweird.f32 %v1418_v48 }
0x11b0   :  { %v3560_v33 = vpop.eup %3559 }
0x11b1   :  { %v1430_v47 = vmul.f32 %v3560_v33, %v1418_v48  ;;  %vm1436_vm11 = vweird.f32 %v3560_v33 }
0x11b2   :  { %vm1437_vm14 = vmor %vm1435_vm12, %vm1436_vm11 }
0x11b3   :  { %v1431_v49 = vmul.f32 %v3560_v33, %v1430_v47 }
0x11b5   :  { %v1432_v50 = vmul.f32 0.5, %v1431_v49 }
0x11b7   :  { %v1433_v51 = vsub.f32 1.5, %v1432_v50 }
0x11b9   :  { %v1434_v55 = vmul.f32 %v3560_v33, %v1433_v51 }
0x11bb   :  { %v1438_v56 = vsel %vm1437_vm14, %v3560_v33, %v1434_v55 }
0x11bc   :  { %v1440_v60 = vmul.f32 %v1438_v56, %v1406_v20 }
0x11be   :  { %v1445_v61 = vmul.f32 %v3469_v52, %v1440_v60 }
0x11c0   :  { %v4591_v24 = vadd.f32 %v3470_v1, %v1445_v61 }
0x11c2   :  { %v1455_v63 = vpack.c.bf16 %v4591_v24, %v4589_v62 }
0x11c4   :  { %3302 = vmatmul.msk.bf16.vlgmr.msra.gmra.mxu2 %vm454_vm0, %v1455_v63 }
0x1247   :  { %v1474_v3 = vpop.f32.mrf.mxu2 }
0x1248   :  { %v1475_v25 = vadd.f32 %v3471_v2, %v1474_v3 }
0x124a   :  { %v4597_v54 = vpack.c.bf16 %v1475_v25, %v1475_v25  ;;  %1617 = vrot.lane.b32.xlu2 %v1475_v25, %s4020_s14  ;;  %1488 = vrot.lane.b32.xlu1 %v1475_v25, %s4021_s11 }
0x124c   :  { %1653 = vrot.lane.b32.xlu0 %v4597_v54, %s4022_s21 }
0x124f   :  { %v1476_v6 = vpop.f32.mrf.mxu2 }
0x1250   :  { %v1477_v8 = vadd.f32 %v3471_v2, %v1476_v6 }
0x1252   :  { %v4605_v10 = vpack.c.bf16 %v1477_v8, %v1477_v8 }
0x12a4   :  { %v1618_v4 = vpop.permute.xlu2 %1617 }
0x12bc   :  { %v1489_v5 = vpop.permute.xlu1 %1488 }
0x12bd   :  { %v3441_v46 = vpack.i.bf16 %v1618_v4, %v1489_v5 }
0x12be   :  { %v1654_v23 = vpop.permute.xlu0 %1653 }
0x12bf   :  { %3442 = vxpose.xlu1.b32.start.end [1/1] (short) (narrow) %v3441_v46, 16 }
0x1321   :  { %1698 = vrot.lane.b32.xlu1 %v4597_v54, %s4023_s0 }
0x1329   :  { %1827 = vrot.lane.b32.xlu1 %v4605_v10, %s4015_s13 }
0x1363   :  { %v3443_v13 = vpop.trf.xlu1 }
0x1364   :  { %v3447_v14 = vunpack.i.h.bf16 %v3443_v13  ;;  %v3444_v15 = vunpack.i.l.bf16 %v3443_v13 }
0x136b   :  { %v3448_v16 = vpop.trf.xlu1 }
0x136c   :  { %v3452_v19 = vunpack.i.h.bf16 %v3448_v16  ;;  %v3449_v21 = vunpack.i.l.bf16 %v3448_v16 }
0x136e   :  { %v1524_v22 = vpack.c.bf16 %v3449_v21, %v3444_v15  ;;  %v1652_v26 = vpack.c.bf16 %v3452_v19, %v3447_v14 }
0x1370   :  { %1536 = vmatpush.bf16.msrb.mxu3 %v1524_v22  ;;  %1665 = vmatpush.bf16.msrb.mxu2 %v1652_v26 }
0x1373   :  { %3303 = vmatmul.msk.bf16.vlgmr.msrb.gmra.mxu3 %vm1525_vm15, %v4597_v54  ;;  %3306 = vmatmul.msk.bf16.vlgmr.msrb.gmra.mxu2 %vm1525_vm15, %v1654_v23 }
0x1393   :  { %v1699_v59 = vpop.permute.xlu1 %1698 }
0x1394   :  { %v1704_v27 = vsel %vm1578_vm1, %v1699_v59, 0 }
0x1395   :  { %1713 = vmatpush.bf16.msra.mxu3 %v1704_v27  ;;  %v1479_v27 = vld [vmem:[%s4942_s19] sm:$0xff] }
0x139b   :  { %v1828_v28 = vpop.permute.xlu1 %1827 }
0x139c   :  { %v1833_v20 = vsel %vm1578_vm1, %v1828_v28, 0  ;;  %v1480_v28 = vld [vmem:[%s4942_s19 + $0x8] sm:$0xff] }
0x139d   :  { %1842 = vmatpush.bf16.msra.mxu2 %v1833_v20  ;;  %v1596_v20 = vpack.c.bf16 %v1480_v28, %v1479_v27 }
0x139f   :  { %1607 = vmatpush.bf16.msrb.mxu1 %v1596_v20  ;;  %1859 = vmatpush.bf16.msrb.mxu3 %v1596_v20 }
0x13a1   :  { %1979 = vmatpush.bf16.msrb.mxu2 %v1720_v32 }
0x13f6   :  { %v1538_v36 = vpop.f32.mrf.mxu3  ;;  %v1667_v58 = vpop.f32.mrf.mxu2 }
0x13f7   :  { %v1542_v37 = vmul.f32 0.25, %v1538_v36  ;;  %v1671_v38 = vmul.f32 0.25, %v1667_v58 }
0x13f9   :  { %v1672_v39 = vadd.f32 %v1671_v38, %v4615_v34  ;;  %v1546_v18 = vadd.f32 %v4615_v34, %v1542_v37 }
0x13fb   :  { %v1673_v40 = vsel %vm1208_vm4, %v1672_v39, -inf  ;;  %v1547_v41 = vsel %vm1208_vm4, %v1546_v18, -inf }
0x13fc   :  { %1674 = vmax.xlane.f32.xlu2 %v1673_v40  ;;  %1548 = vmax.xlane.f32.xlu0 %v1547_v41 }
0x13fe   :  { %v1540_v42 = vpop.f32.mrf.mxu3  ;;  %v1669_v43 = vpop.f32.mrf.mxu2 }
0x146f   :  { %v1675_v44 = vpop.xlane.xlu2 %1674  ;;  %v1549_v45 = vpop.xlane.xlu0 %1548 }
0x1470   :  { %v1676_v48 = vsub.f32 %v1672_v39, %v1675_v44  ;;  %v1550_v29 = vsub.f32 %v1546_v18, %v1549_v45 }
0x1472   :  { %v1677_v11 = vmul.f32 1.442695, %v1676_v48  ;;  %v1551_v33 = vmul.f32 1.442695, %v1550_v29  ;;  %v4642_v29 = vld [vmem:[%s4943_s24] ss:$0 sm:$0xff] }
0x1474   :  { %3561 = vpow2.f32 %v1677_v11 }
0x1475   :  { %3563 = vpow2.f32 %v1551_v33 }
0x147a   :  { %v3562_v35 = vpop.eup %3561 }
0x147b   :  { %v3564_v47 = vpop.eup %3563  ;;  %v1679_v49 = vsel %vm1208_vm4, %v3562_v35, 0.0 }
0x147c   :  { %1680 = vadd.xlane.f32.xlu2 %v1679_v49  ;;  %v1553_v12 = vsel %vm1208_vm4, %v3564_v47, 0.0 }
0x147d   :  { %1554 = vadd.xlane.f32.xlu0 %v1553_v12 }
0x1491   :  { %1573 = vrot.lane.b32.xlu0 %v4597_v54, %s4015_s13 }
0x1494   :  { %1743 = vrot.lane.b32.xlu2 %v1477_v8, %s4021_s11 }
0x1499   :  { %1866 = vrot.lane.b32.xlu0 %v1477_v8, %s4020_s14 }
0x149c   :  { %1902 = vrot.lane.b32.xlu2 %v4605_v10, %s4022_s21 }
0x14ef   :  { %v1681_v50 = vpop.xlane.xlu2 %1680 }
0x14f0   :  { %3565 = vrcp.f32 %v1681_v50  ;;  %v1555_v51 = vpop.xlane.xlu0 %1554  ;;  %v1693_v60 = vand.u32 2147483648, %v1681_v50  ;;  %v1691_v2 = vand.u32 2147483647, %v1681_v50  ;;  %vm1687_vm5 = vweird.f32 %v1681_v50 }
0x14f1   :  { %3567 = vrcp.f32 %v1555_v51  ;;  %v1567_v3 = vand.u32 2147483648, %v1555_v51  ;;  %v1565_v54 = vand.u32 2147483647, %v1555_v51  ;;  %vm1561_vm7 = vweird.f32 %v1555_v51 }
0x14f2   :  { %v1694_v5 = vor.u32 1.1754944e-38, %v1693_v60  ;;  %vm1692_vm8 = vcmp.eq.f32.partialorder %v1691_v2, 8.507059e+37 }
0x14f3   :  { %v1568_v8 = vor.u32 1.1754944e-38, %v1567_v3  ;;  %vm1566_vm10 = vcmp.eq.f32.partialorder %v1565_v54, 8.507059e+37 }
0x14f6   :  { %v3566_v52 = vpop.eup %3565 }
0x14f7   :  { %v3568_v53 = vpop.eup %3567  ;;  %v1683_v55 = vmul.f32 %v3566_v52, %v1681_v50  ;;  %v1744_v56 = vpop.permute.xlu2 %1743  ;;  %vm1688_vm2 = vweird.f32 %v3566_v52  ;;  %v3309_v50 = vld [vmem:[%s4941_s4 + $0x1] sm:$0x1] }
0x14f8   :  { %v1557_v1 = vmul.f32 %v3568_v53, %v1555_v51  ;;  %1746 = vxpose.xlu0.b32.start.end [1/1] (short) (narrow) %v1744_v56, 16  ;;  %vm1562_vm3 = vweird.f32 %v3568_v53  ;;  %vm1689_vm6 = vmor %vm1687_vm5, %vm1688_vm2  ;;  %v1740_v51 = vsub.f32 1.0, %v3309_v50 }
0x14f9   :  { %v1684_v57 = vsub.f32 1.0, %v1683_v55  ;;  %vm1563_vm9 = vmor %vm1561_vm7, %vm1562_vm3 }
0x14fa   :  { %v1558_v61 = vsub.f32 1.0, %v1557_v1 }
0x14fb   :  { %v1685_v63 = vmul.f32 %v3566_v52, %v1684_v57 }
0x14fc   :  { %v1559_v25 = vmul.f32 %v3568_v53, %v1558_v61 }
0x14fd   :  { %v1686_v4 = vadd.f32 %v3566_v52, %v1685_v63 }
0x14fe   :  { %v1560_v46 = vadd.f32 %v3568_v53, %v1559_v25 }
0x14ff   :  { %v1690_v6 = vsel %vm1689_vm6, %v3566_v52, %v1686_v4  ;;  %v1903_v41 = vpop.permute.xlu2 %1902  ;;  %v1741_v52 = vmul.f32 -1e+09, %v1740_v51 }
0x1500   :  { %v1695_v13 = vsel %vm1692_vm8, %v1694_v5, %v1690_v6  ;;  %v1564_v14 = vsel %vm1563_vm9, %v3568_v53, %v1560_v46 }
0x1501   :  { %v1696_v15 = vmul.f32 %v3562_v35, %v1695_v13  ;;  %v1569_v16 = vsel %vm1566_vm10, %v1568_v8, %v1564_v14  ;;  %v4646_v53 = vperm.slane %v1741_v52, 0 }
0x1502   :  { %v1570_v19 = vmul.f32 %v3564_v47, %v1569_v16 }
0x1503   :  { %v1574_v21 = vpop.permute.xlu0 %1573  ;;  %v1697_v22 = vpack.c.bf16 %v1696_v15, %v1696_v15 }
0x1504   :  { %v1580_v26 = vsel %vm1578_vm1, %v1574_v21, 0  ;;  %v1571_v23 = vpack.c.bf16 %v1570_v19, %v1570_v19 }
0x1505   :  { %1589 = vmatpush.bf16.msra.mxu0 %v1580_v26  ;;  %3307 = vmatmul.msk.bf16.vlgmr.msra.gmra.mxu3 %vm1208_vm4, %v1697_v22 }
0x1508   :  { %3304 = vmatmul.msk.bf16.vlgmr.msra.gmra.mxu0 %vm1208_vm4, %v1571_v23 }
0x1509   :  { %1731 = vmatpush.bf16.msrb.mxu0 %v1720_v32 }
0x150b   :  { %v1867_v59 = vpop.permute.xlu0 %1866 }
0x150c   :  { %1869 = vxpose.xlu2.b32.start.end [1/1] (short) (narrow) %v1867_v59, 16 }
0x1585   :  { %v1591_v36 = vpop.f32.mrf.mxu0 }
0x1586   :  { %v1595_v58 = vpack.c.bf16 %v1591_v36, %v1591_v36 }
0x1588   :  { %3305 = vmatmul.msk.bf16.vlgmr.msrb.gmra.mxu1 %vm1525_vm15, %v1595_v58  ;;  %v1715_v37 = vpop.f32.mrf.mxu3 }
0x1589   :  { %v1719_v38 = vpack.c.bf16 %v1715_v37, %v1715_v37 }
0x158b   :  { %3308 = vmatmul.msk.bf16.vlgmr.msrb.gmra.mxu0 %vm1525_vm15, %v1719_v38 }
0x158d   :  { %v1593_v39 = vpop.f32.mrf.mxu0 }
0x1590   :  { %v1717_v18 = vpop.f32.mrf.mxu3 }
0x159c   :  { %v1762_v40 = vpop.trf.xlu0 }
0x15a4   :  { %v1763_v42 = vpop.trf.xlu0 }
0x15a5   :  { %v1885_v43 = vpop.trf.xlu2  ;;  %v1779_v44 = vpack.c.bf16 %v1763_v42, %v1762_v40 }
0x15a7   :  { %1790 = vmatpush.bf16.msra.mxu1 %v1779_v44 }
0x15aa   :  { %3310 = vmatmul.msk.bf16.vlgmr.msra.gmra.mxu1 %vm1525_vm15, %v4605_v10 }
0x15ad   :  { %v1886_v45 = vpop.trf.xlu2 }
0x15ae   :  { %v1901_v48 = vpack.c.bf16 %v1886_v45, %v1885_v43 }
0x15b0   :  { %1914 = vmatpush.bf16.msra.mxu0 %v1901_v48 }
0x15b3   :  { %3313 = vmatmul.msk.bf16.vlgmr.msra.gmra.mxu0 %vm1525_vm15, %v1903_v41 }
0x1605   :  { %v1609_v11 = vpop.f32.mrf.mxu1 }
0x1606   :  { %v1616_v33 = vadd.f32 %v4642_v29, %v1609_v11 }
0x1608   :  { %v1733_v35 = vpop.f32.mrf.mxu0 }
0x1609   :  { %v1737_v47 = vadd.f32 %v1733_v35, %v1616_v33 }
0x160b   :  { %v1986_v19 = vadd.f32 %v1737_v47, %v4589_v62 }
0x160d   :  { %v1611_v49 = vpop.f32.mrf.mxu1  ;;  %v1990_v21 = vsel %vm454_vm0, %v1986_v19, 0.0 }
0x1610   :  { %v1735_v12 = vpop.f32.mrf.mxu0 }
0x1627   :  { %v1792_v55 = vpop.f32.mrf.mxu1 }
0x1628   :  { %v1796_v56 = vmul.f32 0.25, %v1792_v55 }
0x162a   :  { %v1800_v1 = vadd.f32 %v4646_v53, %v1796_v56 }
0x162c   :  { %v1801_v57 = vsel %vm1208_vm4, %v1800_v1, -inf }
0x162d   :  { %1802 = vmax.xlane.f32.xlu0 %v1801_v57 }
0x162f   :  { %v1794_v60 = vpop.f32.mrf.mxu1 }
0x1630   :  { %v1916_v61 = vpop.f32.mrf.mxu0 }
0x1631   :  { %v1920_v63 = vmul.f32 0.25, %v1916_v61 }
0x1633   :  { %v1921_v2 = vadd.f32 %v1920_v63, %v4646_v53 }
0x1635   :  { %v1922_v3 = vsel %vm1208_vm4, %v1921_v2, -inf }
0x1636   :  { %1923 = vmax.xlane.f32.xlu2 %v1922_v3 }
0x1638   :  { %v1918_v25 = vpop.f32.mrf.mxu0 }
0x16a0   :  { %v1803_v54 = vpop.xlane.xlu0 %1802 }
0x16a1   :  { %v1804_v4 = vsub.f32 %v1800_v1, %v1803_v54 }
0x16a3   :  { %v1805_v5 = vmul.f32 1.442695, %v1804_v4 }
0x16a5   :  { %3569 = vpow2.f32 %v1805_v5 }
0x16a9   :  { %v1924_v46 = vpop.xlane.xlu2 %1923 }
0x16aa   :  { %v1925_v6 = vsub.f32 %v1921_v2, %v1924_v46 }
0x16ab   :  { %v3570_v8 = vpop.eup %3569 }
0x16ac   :  { %v1926_v13 = vmul.f32 1.442695, %v1925_v6  ;;  %v1807_v14 = vsel %vm1208_vm4, %v3570_v8, 0.0 }
0x16ad   :  { %1808 = vadd.xlane.f32.xlu1 %v1807_v14 }
0x16ae   :  { %3571 = vpow2.f32 %v1926_v13 }
0x16b4   :  { %v3572_v15 = vpop.eup %3571 }
0x16b5   :  { %v1928_v16 = vsel %vm1208_vm4, %v3572_v15, 0.0 }
0x16b6   :  { %1929 = vadd.xlane.f32.xlu1 %v1928_v16  ;;  %v2046_v16 = vld [vmem:[%s4944_s30 + $0x10] sm:$0xff] }
0x16cf   :  { %1947 = vrot.lane.b32.xlu1 %v4605_v10, %s4023_s0 }
0x16f9   :  { %1991 = vadd.xlane.f32.xlu1 %v1990_v21 }
0x1720   :  { %v1809_v22 = vpop.xlane.xlu1 %1808 }
0x1721   :  { %3573 = vrcp.f32 %v1809_v22  ;;  %v1821_v28 = vand.u32 2147483648, %v1809_v22  ;;  %v1819_v30 = vand.u32 2147483647, %v1809_v22  ;;  %vm1815_vm12 = vweird.f32 %v1809_v22 }
0x1723   :  { %v1822_v10 = vor.u32 1.1754944e-38, %v1821_v28  ;;  %vm1820_vm2 = vcmp.eq.f32.partialorder %v1819_v30, 8.507059e+37 }
0x1727   :  { %v3574_v26 = vpop.eup %3573 }
0x1728   :  { %v1811_v23 = vmul.f32 %v3574_v26, %v1809_v22  ;;  %vm1816_vm11 = vweird.f32 %v3574_v26 }
0x1729   :  { %v1930_v59 = vpop.xlane.xlu1 %1929  ;;  %vm1817_vm14 = vmor %vm1815_vm12, %vm1816_vm11 }
0x172a   :  { %v1812_v27 = vsub.f32 1.0, %v1811_v23  ;;  %3575 = vrcp.f32 %v1930_v59  ;;  %v1942_v41 = vand.u32 2147483648, %v1930_v59  ;;  %vm1936_vm5 = vweird.f32 %v1930_v59  ;;  %v2045_v23 = vld [vmem:[%s4944_s30 + $0x8] sm:$0xff] }
0x172b   :  { %v1940_v42 = vand.u32 2147483647, %v1930_v59 }
0x172c   :  { %v1813_v20 = vmul.f32 %v3574_v26, %v1812_v27  ;;  %v1943_v44 = vor.u32 1.1754944e-38, %v1942_v41 }
0x172d   :  { %vm1941_vm7 = vcmp.eq.f32.partialorder %v1940_v42, 8.507059e+37 }
0x172e   :  { %v1814_v31 = vadd.f32 %v3574_v26, %v1813_v20 }
0x1730   :  { %v3576_v32 = vpop.eup %3575  ;;  %v1818_v62 = vsel %vm1817_vm14, %v3574_v26, %v1814_v31  ;;  %v2044_v26 = vld [vmem:[%s4944_s30] sm:$0xff] }
0x1731   :  { %v1823_v36 = vsel %vm1820_vm2, %v1822_v10, %v1818_v62  ;;  %v1932_v58 = vmul.f32 %v3576_v32, %v1930_v59  ;;  %vm1937_vm3 = vweird.f32 %v3576_v32  ;;  %v2049_v59 = vpack.c.bf16 %v2045_v23, %v2044_v26 }
0x1732   :  { %v1824_v37 = vmul.f32 %v3570_v8, %v1823_v36  ;;  %vm1938_vm6 = vmor %vm1936_vm5, %vm1937_vm3 }
0x1733   :  { %v1933_v38 = vsub.f32 1.0, %v1932_v58 }
0x1734   :  { %v1825_v39 = vpack.c.bf16 %v1824_v37, %v1824_v37 }
0x1735   :  { %v1934_v18 = vmul.f32 %v3576_v32, %v1933_v38 }
0x1736   :  { %3311 = vmatmul.msk.bf16.vlgmr.msra.gmra.mxu2 %vm1208_vm4, %v1825_v39 }
0x1737   :  { %v1935_v40 = vadd.f32 %v3576_v32, %v1934_v18 }
0x1739   :  { %v1939_v43 = vsel %vm1938_vm6, %v3576_v32, %v1935_v40  ;;  %v3473_v40 = vld [vmem:[%s4945_s6] ss:$0 sm:$0xff] }
0x173a   :  { %v1944_v45 = vsel %vm1941_vm7, %v1943_v44, %v1939_v43  ;;  %v3474_v44 = vld [vmem:[#allocation11] ss:$0 sm:$0xff] }
0x173b   :  { %v1945_v48 = vmul.f32 %v3572_v15, %v1944_v45 }
0x173d   :  { %v1946_v35 = vpack.c.bf16 %v1945_v48, %v1945_v48 }
0x1741   :  { %v1948_v11 = vpop.permute.xlu1 %1947 }
0x1742   :  { %v1953_v33 = vsel %vm1578_vm1, %v1948_v11, 0 }
0x1743   :  { %1962 = vmatpush.bf16.msrb.mxu1 %v1953_v33 }
0x1746   :  { %3314 = vmatmul.msk.bf16.vlgmr.msrb.gmra.mxu1 %vm1208_vm4, %v1946_v35 }
0x176c   :  { %v1992_v56 = vpop.xlane.xlu1 %1991 }
0x176d   :  { %v1996_v61 = vmul.f32 %v1992_v56, %v4576_v17  ;;  %v2092_v56 = vld [vmem:[%s4946_s22 + $0x10] sm:$0xff] }
0x176f   :  { %v1998_v3 = vsub.f32 %v1986_v19, %v1996_v61  ;;  %v2047_v19 = vld [vmem:[%s4944_s30 + $0x18] sm:$0xff]  ;;  %v2090_v61 = vld [vmem:[%s4946_s22] sm:$0xff] }
0x1770   :  { %v2050_v21 = vpack.c.bf16 %v2047_v19, %v2046_v16 }
0x1771   :  { %v2000_v4 = vmul.f32 %v1998_v3, %v1998_v3 }
0x1772   :  { %2064 = vmatpush.bf16.msra.mxu3 %v2050_v21 }
0x1773   :  { %v2002_v5 = vsel %vm454_vm0, %v2000_v4, 0.0 }
0x1776   :  { %2065 = vmatpush.bf16.msra.mxu3 %v2049_v59 }
0x17b9   :  { %v1844_v47 = vpop.f32.mrf.mxu2 }
0x17ba   :  { %v1848_v49 = vpack.c.bf16 %v1844_v47, %v1844_v47 }
0x17bc   :  { %3312 = vmatmul.msk.bf16.vlgmr.msrb.gmra.mxu3 %vm1525_vm15, %v1848_v49  ;;  %v2096_v49 = vld [vmem:[%s4946_s22 + $0x30] sm:$0xff] }
0x17c1   :  { %v1846_v12 = vpop.f32.mrf.mxu2 }
0x17c2   :  { %v2097_v12 = vld [vmem:[%s4946_s22 + $0x38] sm:$0xff] }
0x17c3   :  { %v1964_v50 = vpop.f32.mrf.mxu1 }
0x17c4   :  { %v1968_v51 = vpack.c.bf16 %v1964_v50, %v1964_v50  ;;  %v2102_v50 = vpack.c.bf16 %v2097_v12, %v2096_v49 }
0x17c6   :  { %3315 = vmatmul.msk.bf16.vlgmr.msrb.gmra.mxu2 %vm1525_vm15, %v1968_v51  ;;  %2114 = vmatpush.bf16.msrb.mxu0 %v2102_v50  ;;  %v2094_v51 = vld [vmem:[%s4946_s22 + $0x20] sm:$0xff] }
0x17c7   :  { %v3318_v50 = vld [vmem:[%s4939_s8 + $0x20] sm:$0xff] }
0x17cb   :  { %v1966_v52 = vpop.f32.mrf.mxu1 }
0x17cc   :  { %v2095_v52 = vld [vmem:[%s4946_s22 + $0x28] sm:$0xff] }
0x183f   :  { %v1861_v55 = vpop.f32.mrf.mxu3 }
0x1840   :  { %v1865_v57 = vadd.f32 %v4642_v29, %v1861_v55  ;;  %v2101_v55 = vpack.c.bf16 %v2095_v52, %v2094_v51  ;;  %v3319_v51 = vld [vmem:[%s4939_s8 + $0x28] sm:$0xff] }
0x1842   :  { %2115 = vmatpush.bf16.msrb.mxu0 %v2101_v55  ;;  %v2188_v55 = vpack.c.bf16 %v3319_v51, %v3318_v50 }
0x1847   :  { %v1863_v1 = vpop.f32.mrf.mxu3 }
0x1848   :  { %v2093_v1 = vld [vmem:[%s4946_s22 + $0x18] sm:$0xff] }
0x1849   :  { %v1981_v60 = vpop.f32.mrf.mxu2 }
0x184a   :  { %v1985_v63 = vadd.f32 %v1981_v60, %v1865_v57  ;;  %v2100_v57 = vpack.c.bf16 %v2093_v1, %v2092_v56  ;;  %v3475_v60 = vld [vmem:[#allocation13] ss:$0 sm:$0xff] }
0x184c   :  { %v1987_v2 = vadd.f32 %v1985_v63, %v4591_v24  ;;  %2116 = vmatpush.bf16.msrb.mxu0 %v2100_v57  ;;  %v2091_v63 = vld [vmem:[%s4946_s22 + $0x8] sm:$0xff] }
0x184e   :  { %v1993_v25 = vsel %vm454_vm0, %v1987_v2, 0.0 }
0x184f   :  { %1994 = vadd.xlane.f32.xlu0 %v1993_v25 }
0x1851   :  { %v1983_v54 = vpop.f32.mrf.mxu2 }
0x1857   :  { %2003 = vadd.xlane.f32.xlu0 %v2002_v5 }
0x18c2   :  { %v1995_v46 = vpop.xlane.xlu0 %1994 }
0x18c3   :  { %v1997_v29 = vmul.f32 %v1995_v46, %v4576_v17 }
0x18c5   :  { %v1999_v6 = vsub.f32 %v1987_v2, %v1997_v29 }
0x18c7   :  { %v2001_v8 = vmul.f32 %v1999_v6, %v1999_v6 }
0x18c9   :  { %v2005_v24 = vsel %vm454_vm0, %v2001_v8, 0.0 }
0x18ca   :  { %2006 = vadd.xlane.f32.xlu2 %v2005_v24  ;;  %v2004_v13 = vpop.xlane.xlu0 %2003 }
0x18cb   :  { %v2008_v14 = vmul.f32 %v2004_v13, %v4576_v17 }
0x18cd   :  { %v2010_v15 = vadd.f32 1e-12, %v2008_v14 }
0x18cf   :  { %3577 = vrsqrt.f32 %v2010_v15  ;;  %vm2018_vm9 = vweird.f32 %v2010_v15 }
0x18d5   :  { %v3578_v22 = vpop.eup %3577 }
0x18d6   :  { %v2013_v27 = vmul.f32 %v3578_v22, %v2010_v15  ;;  %vm2019_vm8 = vweird.f32 %v3578_v22 }
0x18d7   :  { %vm2020_vm10 = vmor %vm2018_vm9, %vm2019_vm8 }
0x18d8   :  { %v2014_v28 = vmul.f32 %v3578_v22, %v2013_v27 }
0x18da   :  { %v2015_v10 = vmul.f32 0.5, %v2014_v28 }
0x18dc   :  { %v2016_v32 = vsub.f32 1.5, %v2015_v10 }
0x18de   :  { %v2017_v36 = vmul.f32 %v3578_v22, %v2016_v32 }
0x18e0   :  { %v2021_v38 = vsel %vm2020_vm10, %v3578_v22, %v2017_v36 }
0x18e1   :  { %v2032_v41 = vmul.f32 %v2021_v38, %v1998_v3  ;;  %v2099_v3 = vpack.c.bf16 %v2091_v63, %v2090_v61 }
0x18e3   :  { %v2037_v45 = vmul.f32 %v3473_v40, %v2032_v41  ;;  %2117 = vmatpush.bf16.msrb.mxu0 %v2099_v3 }
0x18e5   :  { %v2042_v33 = vadd.f32 %v3474_v44, %v2037_v45 }
0x193d   :  { %v2007_v20 = vpop.xlane.xlu2 %2006 }
0x193e   :  { %v2009_v30 = vmul.f32 %v2007_v20, %v4576_v17 }
0x1940   :  { %v2011_v31 = vadd.f32 1e-12, %v2009_v30  ;;  %v3476_v30 = vld [vmem:[#allocation14] ss:$0 sm:$0xff] }
0x1942   :  { %3579 = vrsqrt.f32 %v2011_v31  ;;  %vm2028_vm12 = vweird.f32 %v2011_v31 }
0x1948   :  { %v3580_v62 = vpop.eup %3579 }
0x1949   :  { %v2023_v58 = vmul.f32 %v3580_v62, %v2011_v31  ;;  %vm2029_vm11 = vweird.f32 %v3580_v62 }
0x194a   :  { %vm2030_vm14 = vmor %vm2028_vm12, %vm2029_vm11 }
0x194b   :  { %v2024_v37 = vmul.f32 %v3580_v62, %v2023_v58 }
0x194d   :  { %v2025_v39 = vmul.f32 0.5, %v2024_v37 }
0x194f   :  { %v2026_v18 = vsub.f32 1.5, %v2025_v39 }
0x1951   :  { %v2027_v42 = vmul.f32 %v3580_v62, %v2026_v18 }
0x1953   :  { %v2031_v43 = vsel %vm2030_vm14, %v3580_v62, %v2027_v42 }
0x1954   :  { %v2033_v48 = vmul.f32 %v2031_v43, %v1999_v6 }
0x1956   :  { %v2038_v11 = vmul.f32 %v3473_v40, %v2033_v48 }
0x1958   :  { %v2043_v35 = vadd.f32 %v3474_v44, %v2038_v11 }
0x195a   :  { %v2048_v47 = vpack.c.bf16 %v2043_v35, %v2042_v33 }
0x195c   :  { %3316 = vmatmul.msk.bf16.vlgmr.msra.gmra.mxu3 %vm454_vm0, %v2048_v47 }
0x19df   :  { %v2067_v2 = vpop.f32.mrf.mxu3 }
0x19e0   :  { %v2068_v25 = vadd.f32 %v3475_v60, %v2067_v2 }
0x19e2   :  { %v2072_v54 = vmul.f32 %v2068_v25, %v2068_v25 }
0x19e4   :  { %v2074_v4 = vmul.f32 %v2072_v54, %v2068_v25 }
0x19e6   :  { %v2076_v5 = vmul.f32 0.044715, %v2074_v4 }
0x19e7   :  { %v2069_v46 = vpop.f32.mrf.mxu3 }
0x19e8   :  { %v2078_v29 = vadd.f32 %v2076_v5, %v2068_v25  ;;  %v2070_v6 = vadd.f32 %v3475_v60, %v2069_v46 }
0x19ea   :  { %v2080_v8 = vmul.f32 0.7978846, %v2078_v29  ;;  %v2073_v24 = vmul.f32 %v2070_v6, %v2070_v6 }
0x19ec   :  { %v2075_v13 = vmul.f32 %v2073_v24, %v2070_v6  ;;  %3581 = vtanh.f32 %v2080_v8  ;;  %v3477_v8 = vld [vmem:[%s4947_s18] ss:$0 sm:$0xff] }
0x19ee   :  { %v2077_v14 = vmul.f32 0.044715, %v2075_v13 }
0x19f0   :  { %v2079_v15 = vadd.f32 %v2077_v14, %v2070_v6 }
0x19f2   :  { %v2081_v16 = vmul.f32 0.7978846, %v2079_v15  ;;  %v3582_v19 = vpop.eup %3581  ;;  %v3478_v15 = vld [vmem:[#allocation16] ss:$0 sm:$0xff] }
0x19f3   :  { %v2084_v21 = vadd.f32 1.0, %v3582_v19 }
0x19f4   :  { %3583 = vtanh.f32 %v2081_v16 }
0x19f5   :  { %v2086_v26 = vmul.f32 0.5, %v2084_v21 }
0x19f7   :  { %v2088_v27 = vmul.f32 %v2086_v26, %v2068_v25 }
0x19fa   :  { %v3584_v22 = vpop.eup %3583 }
0x19fb   :  { %v2085_v23 = vadd.f32 1.0, %v3584_v22 }
0x19fd   :  { %v2087_v59 = vmul.f32 0.5, %v2085_v23 }
0x19ff   :  { %v2089_v28 = vmul.f32 %v2087_v59, %v2070_v6  ;;  %v3479_v59 = vld [vmem:[%s4940_s10 + $0x1] ss:$0 sm:$0xff] }
0x1a01   :  { %v2098_v20 = vpack.c.bf16 %v2089_v28, %v2088_v27 }
0x1a03   :  { %3317 = vmatmul.msk.bf16.vlgmr.msrb.gmra.mxu0 %vm820_vm13, %v2098_v20 }
0x1a80   :  { %v2119_v31 = vpop.f32.mrf.mxu0 }
0x1a81   :  { %v2120_v10 = vadd.f32 %v3476_v30, %v2119_v31 }
0x1a83   :  { %v2124_v32 = vadd.f32 %v2120_v10, %v2042_v33  ;;  %v3320_v33 = vld [vmem:[%s4939_s8 + $0x30] sm:$0xff] }
0x1a85   :  { %v2128_v62 = vsel %vm454_vm0, %v2124_v32, 0.0 }
0x1a86   :  { %2129 = vadd.xlane.f32.xlu0 %v2128_v62 }
0x1a88   :  { %v2121_v36 = vpop.f32.mrf.mxu0 }
0x1a89   :  { %v2122_v58 = vadd.f32 %v3476_v30, %v2121_v36 }
0x1a8b   :  { %v2125_v37 = vadd.f32 %v2122_v58, %v2043_v35  ;;  %v3321_v35 = vld [vmem:[%s4939_s8 + $0x38] sm:$0xff] }
0x1a8c   :  { %v2189_v47 = vpack.c.bf16 %v3321_v35, %v3320_v33 }
0x1a8d   :  { %v2131_v38 = vsel %vm454_vm0, %v2125_v37, 0.0 }
0x1a8e   :  { %2132 = vadd.xlane.f32.xlu2 %v2131_v38  ;;  %2204 = vmatpush.bf16.msra.mxu1 %v2189_v47 }
0x1a92   :  { %2205 = vmatpush.bf16.msra.mxu1 %v2188_v55 }
0x1af9   :  { %v2130_v39 = vpop.xlane.xlu0 %2129 }
0x1afa   :  { %v2134_v18 = vmul.f32 %v2130_v39, %v4576_v17 }
0x1afc   :  { %v2136_v40 = vsub.f32 %v2124_v32, %v2134_v18 }
0x1afe   :  { %v2138_v41 = vmul.f32 %v2136_v40, %v2136_v40 }
0x1b00   :  { %v2140_v42 = vsel %vm454_vm0, %v2138_v41, 0.0 }
0x1b01   :  { %v2133_v43 = vpop.xlane.xlu2 %2132  ;;  %2141 = vadd.xlane.f32.xlu0 %v2140_v42 }
0x1b02   :  { %v2135_v44 = vmul.f32 %v2133_v43, %v4576_v17 }
0x1b04   :  { %v2137_v45 = vsub.f32 %v2125_v37, %v2135_v44 }
0x1b06   :  { %v2139_v48 = vmul.f32 %v2137_v45, %v2137_v45 }
0x1b08   :  { %v2143_v11 = vsel %vm454_vm0, %v2139_v48, 0.0 }
0x1b09   :  { %2144 = vadd.xlane.f32.xlu2 %v2143_v11 }
0x1b74   :  { %v2142_v49 = vpop.xlane.xlu0 %2141 }
0x1b75   :  { %v2146_v12 = vmul.f32 %v2142_v49, %v4576_v17 }
0x1b77   :  { %v2148_v52 = vadd.f32 1e-12, %v2146_v12 }
0x1b79   :  { %3585 = vrsqrt.f32 %v2148_v52  ;;  %vm2156_vm3 = vweird.f32 %v2148_v52 }
0x1b7c   :  { %v2145_v56 = vpop.xlane.xlu2 %2144 }
0x1b7d   :  { %v2147_v1 = vmul.f32 %v2145_v56, %v4576_v17 }
0x1b7f   :  { %v3586_v57 = vpop.eup %3585  ;;  %v2149_v60 = vadd.f32 1e-12, %v2147_v1 }
0x1b80   :  { %v2151_v61 = vmul.f32 %v3586_v57, %v2148_v52  ;;  %vm2157_vm2 = vweird.f32 %v3586_v57 }
0x1b81   :  { %3587 = vrsqrt.f32 %v2149_v60  ;;  %vm2158_vm5 = vmor %vm2156_vm3, %vm2157_vm2  ;;  %vm2166_vm7 = vweird.f32 %v2149_v60 }
0x1b82   :  { %v2152_v63 = vmul.f32 %v3586_v57, %v2151_v61 }
0x1b84   :  { %v2153_v2 = vmul.f32 0.5, %v2152_v63 }
0x1b86   :  { %v2154_v3 = vsub.f32 1.5, %v2153_v2 }
0x1b87   :  { %v3588_v25 = vpop.eup %3587 }
0x1b88   :  { %v2155_v54 = vmul.f32 %v3586_v57, %v2154_v3  ;;  %v2161_v4 = vmul.f32 %v3588_v25, %v2149_v60  ;;  %vm2167_vm6 = vweird.f32 %v3588_v25 }
0x1b89   :  { %vm2168_vm8 = vmor %vm2166_vm7, %vm2167_vm6 }
0x1b8a   :  { %v2162_v5 = vmul.f32 %v3588_v25, %v2161_v4  ;;  %v2159_v46 = vsel %vm2158_vm5, %v3586_v57, %v2155_v54 }
0x1b8b   :  { %v2170_v24 = vmul.f32 %v2159_v46, %v2136_v40 }
0x1b8c   :  { %v2163_v29 = vmul.f32 0.5, %v2162_v5 }
0x1b8d   :  { %v2175_v16 = vmul.f32 %v3477_v8, %v2170_v24 }
0x1b8e   :  { %v2164_v6 = vsub.f32 1.5, %v2163_v29 }
0x1b8f   :  { %v4700_v22 = vadd.f32 %v3478_v15, %v2175_v16 }
0x1b90   :  { %v2165_v13 = vmul.f32 %v3588_v25, %v2164_v6 }
0x1b92   :  { %v2169_v14 = vsel %vm2168_vm8, %v3588_v25, %v2165_v13 }
0x1b93   :  { %v2171_v19 = vmul.f32 %v2169_v14, %v2137_v45 }
0x1b95   :  { %v2176_v21 = vmul.f32 %v3477_v8, %v2171_v19 }
0x1b97   :  { %v4702_v26 = vadd.f32 %v3478_v15, %v2176_v21 }
0x1b99   :  { %v2187_v23 = vpack.c.bf16 %v4702_v26, %v4700_v22 }
0x1b9b   :  { %3323 = vmatmul.msk.bf16.vlgmr.msra.gmra.mxu1 %vm454_vm0, %v2187_v23 }
0x1c18   :  { %v2207_v27 = vpop.f32.mrf.mxu1 }
0x1c19   :  { %v2208_v28 = vadd.f32 %v3479_v59, %v2207_v27 }
0x1c1b   :  { %v2255_v20 = vpack.c.bf16 %v2208_v28, %v2208_v28  ;;  %2344 = vrot.lane.b32.xlu2 %v2208_v28, %s4020_s14  ;;  %2220 = vrot.lane.b32.xlu0 %v2208_v28, %s4021_s11 }
0x1c1d   :  { %2380 = vrot.lane.b32.xlu1 %v2255_v20, %s4022_s21 }
0x1c20   :  { %v2209_v39 = vpop.f32.mrf.mxu1 }
0x1c21   :  { %v2210_v56 = vadd.f32 %v3479_v59, %v2209_v39  ;;  %v3327_v39 = vld [vmem:[%s4942_s19 + $0x38] sm:$0xff] }
0x1c23   :  { %v4723_v57 = vpack.c.bf16 %v2210_v56, %v2210_v56 }
0x1c75   :  { %v2345_v30 = vpop.permute.xlu2 %2344 }
0x1c76   :  { %2347 = vxpose.xlu2.b32.start.end [1/1] (short) (narrow) %v2345_v30, 16 }
0x1c8d   :  { %v2221_v31 = vpop.permute.xlu0 %2220 }
0x1c8e   :  { %2223 = vxpose.xlu0.b32.start.end [1/1] (short) (narrow) %v2221_v31, 16 }
0x1c8f   :  { %v2381_v36 = vpop.permute.xlu1 %2380 }
0x1d0f   :  { %v2363_v10 = vpop.trf.xlu2 }
0x1d17   :  { %v2364_v32 = vpop.trf.xlu2 }
0x1d18   :  { %v2379_v62 = vpack.c.bf16 %v2364_v32, %v2363_v10 }
0x1d1a   :  { %2392 = vmatpush.bf16.msrb.mxu1 %v2379_v62 }
0x1d1d   :  { %3332 = vmatmul.msk.bf16.vlgmr.msrb.gmra.mxu1 %vm1525_vm15, %v2381_v36 }
0x1d32   :  { %v2239_v58 = vpop.trf.xlu0 }
0x1d3a   :  { %v2240_v37 = vpop.trf.xlu0 }
0x1d3b   :  { %v2256_v38 = vpack.c.bf16 %v2240_v37, %v2239_v58 }
0x1d3d   :  { %2267 = vmatpush.bf16.msra.mxu2 %v2256_v38  ;;  %v3326_v38 = vld [vmem:[%s4942_s19 + $0x30] sm:$0xff] }
0x1d40   :  { %3329 = vmatmul.msk.bf16.vlgmr.msra.gmra.mxu2 %vm1525_vm15, %v2255_v20 }
0x1d9a   :  { %v2394_v18 = vpop.f32.mrf.mxu1 }
0x1d9b   :  { %v2398_v40 = vmul.f32 0.25, %v2394_v18  ;;  %v2447_v18 = vpack.c.bf16 %v3327_v39, %v3326_v38 }
0x1d9d   :  { %v2399_v41 = vadd.f32 %v2398_v40, %v4615_v34  ;;  %v4736_v40 = vld [vmem:[%s4948_s29 + $0x8] sm:$0xff] }
0x1d9f   :  { %v2400_v42 = vsel %vm1208_vm4, %v2399_v41, -inf }
0x1da0   :  { %2401 = vmax.xlane.f32.xlu0 %v2400_v42  ;;  %v3325_v42 = vld [vmem:[%s4942_s19 + $0x28] sm:$0xff] }
0x1da2   :  { %v2396_v43 = vpop.f32.mrf.mxu1 }
0x1dc3   :  { %v2269_v44 = vpop.f32.mrf.mxu2 }
0x1dc4   :  { %v2273_v45 = vmul.f32 0.25, %v2269_v44 }
0x1dc6   :  { %v2274_v48 = vadd.f32 %v2273_v45, %v4615_v34 }
0x1dc8   :  { %v2275_v11 = vsel %vm1208_vm4, %v2274_v48, -inf }
0x1dc9   :  { %2276 = vmax.xlane.f32.xlu1 %v2275_v11 }
0x1dcb   :  { %v2271_v33 = vpop.f32.mrf.mxu2 }
0x1e13   :  { %v2402_v35 = vpop.xlane.xlu0 %2401 }
0x1e14   :  { %v2403_v47 = vsub.f32 %v2399_v41, %v2402_v35  ;;  %v3324_v41 = vld [vmem:[%s4942_s19 + $0x20] sm:$0xff] }
0x1e15   :  { %v2323_v43 = vpack.c.bf16 %v3325_v42, %v3324_v41 }
0x1e16   :  { %v2404_v49 = vmul.f32 1.442695, %v2403_v47 }
0x1e17   :  { %2334 = vmatpush.bf16.msra.mxu0 %v2323_v43 }
0x1e18   :  { %3589 = vpow2.f32 %v2404_v49 }
0x1e1e   :  { %v3590_v12 = vpop.eup %3589 }
0x1e1f   :  { %v2406_v50 = vsel %vm1208_vm4, %v3590_v12, 0.0 }
0x1e20   :  { %2407 = vadd.xlane.f32.xlu1 %v2406_v50 }
0x1e39   :  { %2301 = vrot.lane.b32.xlu1 %v2255_v20, %s4015_s13 }
0x1e3c   :  { %v2277_v51 = vpop.xlane.xlu1 %2276 }
0x1e3d   :  { %v2278_v52 = vsub.f32 %v2274_v48, %v2277_v51 }
0x1e3f   :  { %v2279_v55 = vmul.f32 1.442695, %v2278_v52 }
0x1e41   :  { %3591 = vpow2.f32 %v2279_v55  ;;  %2425 = vrot.lane.b32.xlu1 %v2255_v20, %s4023_s0 }
0x1e47   :  { %v3592_v34 = vpop.eup %3591 }
0x1e48   :  { %v2281_v1 = vsel %vm1208_vm4, %v3592_v34, 0.0 }
0x1e49   :  { %2466 = vrot.lane.b32.xlu1 %v2210_v56, %s4021_s11  ;;  %2282 = vadd.xlane.f32.xlu2 %v2281_v1 }
0x1e51   :  { %2586 = vrot.lane.b32.xlu1 %v2210_v56, %s4020_s14 }
0x1e59   :  { %2622 = vrot.lane.b32.xlu1 %v4723_v57, %s4022_s21 }
0x1e93   :  { %v2408_v60 = vpop.xlane.xlu1 %2407 }
0x1e94   :  { %3593 = vrcp.f32 %v2408_v60  ;;  %v2420_v54 = vand.u32 2147483648, %v2408_v60  ;;  %vm2414_vm10 = vweird.f32 %v2408_v60  ;;  %v2418_v4 = vand.u32 2147483647, %v2408_v60 }
0x1e96   :  { %v2421_v6 = vor.u32 1.1754944e-38, %v2420_v54  ;;  %vm2419_vm12 = vcmp.eq.f32.partialorder %v2418_v4, 8.507059e+37 }
0x1e9a   :  { %v3594_v61 = vpop.eup %3593 }
0x1e9b   :  { %v2410_v63 = vmul.f32 %v3594_v61, %v2408_v60  ;;  %vm2415_vm9 = vweird.f32 %v3594_v61 }
0x1e9c   :  { %vm2416_vm11 = vmor %vm2414_vm10, %vm2415_vm9 }
0x1e9d   :  { %v2411_v2 = vsub.f32 1.0, %v2410_v63 }
0x1e9f   :  { %v2412_v3 = vmul.f32 %v3594_v61, %v2411_v2  ;;  %v4748_v2 = vld [vmem:[%s4943_s24 + $0x1] ss:$0 sm:$0xff] }
0x1ea1   :  { %v2413_v25 = vadd.f32 %v3594_v61, %v2412_v3 }
0x1ea3   :  { %v2417_v46 = vsel %vm2416_vm11, %v3594_v61, %v2413_v25 }
0x1ea4   :  { %v2422_v8 = vsel %vm2419_vm12, %v2421_v6, %v2417_v46 }
0x1ea5   :  { %v2423_v24 = vmul.f32 %v3590_v12, %v2422_v8 }
0x1ea7   :  { %v2424_v15 = vpack.c.bf16 %v2423_v24, %v2423_v24 }
0x1eab   :  { %v2302_v5 = vpop.permute.xlu1 %2301 }
0x1eac   :  { %v2307_v29 = vsel %vm1578_vm1, %v2302_v5, 0 }
0x1ead   :  { %2316 = vmatpush.bf16.msrb.mxu3 %v2307_v29 }
0x1eb1   :  { %2458 = vmatpush.bf16.msra.mxu3 %v2447_v18 }
0x1eb3   :  { %v2426_v13 = vpop.permute.xlu1 %2425 }
0x1eb4   :  { %v2431_v14 = vsel %vm1578_vm1, %v2426_v13, 0 }
0x1eb5   :  { %2440 = vmatpush.bf16.msrb.mxu2 %v2431_v14 }
0x1eb8   :  { %3333 = vmatmul.msk.bf16.vlgmr.msrb.gmra.mxu2 %vm1208_vm4, %v2424_v15 }
0x1eb9   :  { %2579 = vmatpush.bf16.msra.mxu2 %v2323_v43 }
0x1ebb   :  { %v2467_v16 = vpop.permute.xlu1 %2466 }
0x1ebc   :  { %v2283_v19 = vpop.xlane.xlu2 %2282 }
0x1ebd   :  { %3595 = vrcp.f32 %v2283_v19  ;;  %v2295_v20 = vand.u32 2147483648, %v2283_v19  ;;  %v2293_v31 = vand.u32 2147483647, %v2283_v19  ;;  %vm2289_vm2 = vweird.f32 %v2283_v19 }
0x1ebf   :  { %v2296_v32 = vor.u32 1.1754944e-38, %v2295_v20  ;;  %vm2294_vm5 = vcmp.eq.f32.partialorder %v2293_v31, 8.507059e+37 }
0x1ec3   :  { %v3596_v21 = vpop.eup %3595  ;;  %v2587_v23 = vpop.permute.xlu1 %2586 }
0x1ec4   :  { %v2285_v59 = vmul.f32 %v3596_v21, %v2283_v19  ;;  %v3453_v27 = vpack.i.bf16 %v2587_v23, %v2467_v16  ;;  %vm2290_vm14 = vweird.f32 %v3596_v21 }
0x1ec5   :  { %vm2291_vm3 = vmor %vm2289_vm2, %vm2290_vm14 }
0x1ec6   :  { %v2286_v28 = vsub.f32 1.0, %v2285_v59  ;;  %3454 = vxpose.xlu1.b32.start.end [1/1] (short) (narrow) %v3453_v27, 16 }
0x1ec8   :  { %v2287_v30 = vmul.f32 %v3596_v21, %v2286_v28 }
0x1eca   :  { %v2288_v10 = vadd.f32 %v3596_v21, %v2287_v30 }
0x1ecb   :  { %v2623_v47 = vpop.permute.xlu1 %2622 }
0x1ecc   :  { %v2292_v62 = vsel %vm2291_vm3, %v3596_v21, %v2288_v10 }
0x1ecd   :  { %v2297_v36 = vsel %vm2294_vm5, %v2296_v32, %v2292_v62 }
0x1ece   :  { %v2298_v58 = vmul.f32 %v3592_v34, %v2297_v36 }
0x1ed0   :  { %v2299_v37 = vpack.c.bf16 %v2298_v58, %v2298_v58 }
0x1ed2   :  { %3330 = vmatmul.msk.bf16.vlgmr.msrb.gmra.mxu3 %vm1208_vm4, %v2299_v37 }
0x1f28   :  { %2547 = vrot.lane.b32.xlu1 %v4723_v57, %s4015_s13  ;;  %s4949_s13 = sld [smem:[#allocation56_spill]] }
0x1f30   :  { %3076 = vperm.xlu1 %3440, %v4736_v40  }
0x1f3b   :  { %v2442_v44 = vpop.f32.mrf.mxu2 }
0x1f3c   :  { %v2446_v45 = vpack.c.bf16 %v2442_v44, %v2442_v44 }
0x1f3e   :  { %3334 = vmatmul.msk.bf16.vlgmr.msra.gmra.mxu3 %vm1525_vm15, %v2446_v45 }
0x1f43   :  { %v2444_v48 = vpop.f32.mrf.mxu2 }
0x1f55   :  { %v2318_v11 = vpop.f32.mrf.mxu3 }
0x1f56   :  { %v2322_v33 = vpack.c.bf16 %v2318_v11, %v2318_v11 }
0x1f58   :  { %3331 = vmatmul.msk.bf16.vlgmr.msra.gmra.mxu0 %vm1525_vm15, %v2322_v33 }
0x1f5d   :  { %v2320_v35 = vpop.f32.mrf.mxu3 }
0x1f6a   :  { %v3455_v49 = vpop.trf.xlu1 }
0x1f6b   :  { %v3459_v12 = vunpack.i.h.bf16 %v3455_v49  ;;  %v3456_v50 = vunpack.i.l.bf16 %v3455_v49 }
0x1f72   :  { %v3460_v51 = vpop.trf.xlu1 }
0x1f73   :  { %v3464_v52 = vunpack.i.h.bf16 %v3460_v51  ;;  %v3461_v55 = vunpack.i.l.bf16 %v3460_v51 }
0x1f75   :  { %v2502_v34 = vpack.c.bf16 %v3461_v55, %v3456_v50  ;;  %v2621_v56 = vpack.c.bf16 %v3464_v52, %v3459_v12 }
0x1f77   :  { %2513 = vmatpush.bf16.msrb.mxu0 %v2502_v34  ;;  %2634 = vmatpush.bf16.msrb.mxu3 %v2621_v56 }
0x1f7a   :  { %3335 = vmatmul.msk.bf16.vlgmr.msrb.gmra.mxu0 %vm1525_vm15, %v4723_v57  ;;  %3338 = vmatmul.msk.bf16.vlgmr.msrb.gmra.mxu3 %vm1525_vm15, %v2623_v47 }
0x1f9a   :  { %v2548_v1 = vpop.permute.xlu1 %2547 }
0x1f9b   :  { %v2553_v60 = vsel %vm1578_vm1, %v2548_v1, 0 }
0x1f9c   :  { %2562 = vmatpush.bf16.msra.mxu1 %v2553_v60 }
0x1fa0   :  { %2699 = vmatpush.bf16.msrb.mxu1 %v2447_v18 }
0x1fc1   :  { %v2460_v61 = vpop.f32.mrf.mxu3 }
0x1fc9   :  { %v2462_v63 = vpop.f32.mrf.mxu3 }
0x1fd5   :  { %v2336_v3 = vpop.f32.mrf.mxu0 }
0x1fd6   :  { %v2343_v25 = vadd.f32 %v4748_v2, %v2336_v3 }
0x1fd8   :  { %v2464_v54 = vadd.f32 %v2460_v61, %v2343_v25 }
0x1fdd   :  { %v2338_v4 = vpop.f32.mrf.mxu0 }
0x1ff7   :  { %v2515_v5 = vpop.f32.mrf.mxu0 }
0x1ff8   :  { %v2519_v46 = vmul.f32 0.25, %v2515_v5 }
0x1ffa   :  { %v2520_v29 = vadd.f32 %v2519_v46, %v4646_v53 }
0x1ffc   :  { %v2521_v6 = vsel %vm1208_vm4, %v2520_v29, -inf }
0x1ffd   :  { %2522 = vmax.xlane.f32.xlu0 %v2521_v6  ;;  %v2636_v8 = vpop.f32.mrf.mxu3 }
0x1ffe   :  { %v2640_v24 = vmul.f32 0.25, %v2636_v8 }
0x1fff   :  { %v2517_v13 = vpop.f32.mrf.mxu0 }
0x2000   :  { %v2641_v14 = vadd.f32 %v2640_v24, %v4646_v53  ;;  %v2706_v53 = vadd.f32 %v2464_v54, %v4700_v22 }
0x2002   :  { %v2642_v15 = vsel %vm1208_vm4, %v2641_v14, -inf  ;;  %v2712_v32 = vsel %vm454_vm0, %v2706_v53, 0.0 }
0x2005   :  { %2643 = vmax.xlane.f32.xlu0 %v2642_v15  ;;  %v2638_v16 = vpop.f32.mrf.mxu3 }
0x2070   :  { %v2523_v19 = vpop.xlane.xlu0 %2522 }
0x2071   :  { %v2524_v21 = vsub.f32 %v2520_v29, %v2523_v19 }
0x2073   :  { %v2525_v23 = vmul.f32 1.442695, %v2524_v21 }
0x2075   :  { %3597 = vpow2.f32 %v2525_v23 }
0x2078   :  { %v2644_v59 = vpop.xlane.xlu0 %2643 }
0x2079   :  { %v2645_v27 = vsub.f32 %v2641_v14, %v2644_v59 }
0x207b   :  { %v3598_v28 = vpop.eup %3597  ;;  %v2646_v20 = vmul.f32 1.442695, %v2645_v27 }
0x207c   :  { %v2527_v30 = vsel %vm1208_vm4, %v3598_v28, 0.0 }
0x207d   :  { %3599 = vpow2.f32 %v2646_v20  ;;  %2528 = vadd.xlane.f32.xlu2 %v2527_v30 }
0x2083   :  { %v3600_v31 = vpop.eup %3599 }
0x2084   :  { %v2648_v10 = vsel %vm1208_vm4, %v3600_v31, 0.0 }
0x2085   :  { %2649 = vadd.xlane.f32.xlu0 %v2648_v10  ;;  %v3345_v10 = vld [vmem:[%s4944_s30 + $0x38] sm:$0xff] }
0x208d   :  { %2713 = vadd.xlane.f32.xlu0 %v2712_v32 }
0x2095   :  { %2667 = vrot.lane.b32.xlu2 %v4723_v57, %s4023_s0 }
0x20f0   :  { %v2529_v62 = vpop.xlane.xlu2 %2528 }
0x20f1   :  { %3601 = vrcp.f32 %v2529_v62  ;;  %v2541_v41 = vand.u32 2147483648, %v2529_v62  ;;  %v2539_v22 = vand.u32 2147483647, %v2529_v62  ;;  %vm2535_vm7 = vweird.f32 %v2529_v62 }
0x20f3   :  { %v2542_v57 = vor.u32 1.1754944e-38, %v2541_v41  ;;  %vm2540_vm9 = vcmp.eq.f32.partialorder %v2539_v22, 8.507059e+37 }
0x20f7   :  { %v3602_v36 = vpop.eup %3601 }
0x20f8   :  { %v2531_v58 = vmul.f32 %v3602_v36, %v2529_v62  ;;  %v2668_v37 = vpop.permute.xlu2 %2667  ;;  %v2650_v38 = vpop.xlane.xlu0 %2649  ;;  %vm2536_vm6 = vweird.f32 %v3602_v36  ;;  %v3342_v62 = vld [vmem:[%s4944_s30 + $0x20] sm:$0xff] }
0x20f9   :  { %v2673_v39 = vsel %vm1578_vm1, %v2668_v37, 0  ;;  %3603 = vrcp.f32 %v2650_v38  ;;  %vm2537_vm8 = vmor %vm2535_vm7, %vm2536_vm6  ;;  %v2662_v47 = vand.u32 2147483648, %v2650_v38  ;;  %v2660_v12 = vand.u32 2147483647, %v2650_v38 }
0x20fa   :  { %v2532_v18 = vsub.f32 1.0, %v2531_v58  ;;  %2682 = vmatpush.bf16.msra.mxu0 %v2673_v39  ;;  %vm2656_vm10 = vweird.f32 %v2650_v38  ;;  %vm3111_vm7 = vcmp.ge.s32.totalorder %v4736_v40, 0 }
0x20fb   :  { %v2663_v52 = vor.u32 1.1754944e-38, %v2662_v47  ;;  %vm2661_vm12 = vcmp.eq.f32.partialorder %v2660_v12, 8.507059e+37 }
0x20fc   :  { %v2533_v42 = vmul.f32 %v3602_v36, %v2532_v18 }
0x20fe   :  { %v2534_v43 = vadd.f32 %v3602_v36, %v2533_v42 }
0x20ff   :  { %v3604_v44 = vpop.eup %3603 }
0x2100   :  { %v2538_v45 = vsel %vm2537_vm8, %v3602_v36, %v2534_v43  ;;  %v2652_v48 = vmul.f32 %v3604_v44, %v2650_v38  ;;  %vm2657_vm1 = vweird.f32 %v3604_v44  ;;  %v2714_v4 = vpop.xlane.xlu0 %2713  ;;  %v3343_v36 = vld [vmem:[%s4944_s30 + $0x28] sm:$0xff] }
0x2101   :  { %v2543_v11 = vsel %vm2540_vm9, %v2542_v57, %v2538_v45  ;;  %vm2658_vm11 = vmor %vm2656_vm10, %vm2657_vm1  ;;  %v2718_v6 = vmul.f32 %v2714_v4, %v4576_v17  ;;  %v2772_v58 = vpack.c.bf16 %v3343_v36, %v3342_v62  ;;  %v3349_v4 = vld [vmem:[%s4946_s22 + $0x50] sm:$0xff] }
0x2102   :  { %v2544_v33 = vmul.f32 %v3598_v28, %v2543_v11  ;;  %v2653_v35 = vsub.f32 1.0, %v2652_v48 }
0x2103   :  { %v2720_v13 = vsub.f32 %v2706_v53, %v2718_v6  ;;  %v3347_v6 = vld [vmem:[%s4946_s22 + $0x40] sm:$0xff] }
0x2104   :  { %v2654_v49 = vmul.f32 %v3604_v44, %v2653_v35  ;;  %v2545_v50 = vpack.c.bf16 %v2544_v33, %v2544_v33  ;;  %v3481_v35 = vld [vmem:[%s4945_s6 + $0x1] ss:$0 sm:$0xff] }
0x2105   :  { %v2722_v19 = vmul.f32 %v2720_v13, %v2720_v13 }
0x2106   :  { %v2655_v51 = vadd.f32 %v3604_v44, %v2654_v49  ;;  %3336 = vmatmul.msk.bf16.vlgmr.msra.gmra.mxu1 %vm1208_vm4, %v2545_v50  ;;  %v3482_v50 = vld [vmem:[#allocation11 + $0x1] ss:$0 sm:$0xff] }
0x2107   :  { %v2724_v21 = vsel %vm454_vm0, %v2722_v19, 0.0 }
0x2108   :  { %v2659_v55 = vsel %vm2658_vm11, %v3604_v44, %v2655_v51 }
0x2109   :  { %v2664_v34 = vsel %vm2661_vm12, %v2663_v52, %v2659_v55 }
0x210a   :  { %v2665_v56 = vmul.f32 %v3600_v31, %v2664_v34  ;;  %v3344_v31 = vld [vmem:[%s4944_s30 + $0x30] sm:$0xff] }
0x210b   :  { %v2773_v53 = vpack.c.bf16 %v3345_v10, %v3344_v31 }
0x210c   :  { %v2666_v1 = vpack.c.bf16 %v2665_v56, %v2665_v56 }
0x210d   :  { %2788 = vmatpush.bf16.msrb.mxu2 %v2773_v53 }
0x210e   :  { %3339 = vmatmul.msk.bf16.vlgmr.msra.gmra.mxu0 %vm1208_vm4, %v2666_v1 }
0x2111   :  { %2789 = vmatpush.bf16.msrb.mxu2 %v2772_v58 }
0x2183   :  { %v2564_v60 = vpop.f32.mrf.mxu1 }
0x2184   :  { %v2568_v61 = vpack.c.bf16 %v2564_v60, %v2564_v60  ;;  %v3353_v60 = vld [vmem:[%s4946_s22 + $0x70] sm:$0xff] }
0x2186   :  { %3337 = vmatmul.msk.bf16.vlgmr.msra.gmra.mxu2 %vm1525_vm15, %v2568_v61  ;;  %v3354_v61 = vld [vmem:[%s4946_s22 + $0x78] sm:$0xff] }
0x218b   :  { %v2566_v63 = vpop.f32.mrf.mxu1  ;;  %v2684_v3 = vpop.f32.mrf.mxu0 }
0x218c   :  { %v2688_v25 = vpack.c.bf16 %v2684_v3, %v2684_v3  ;;  %v2827_v63 = vpack.c.bf16 %v3354_v61, %v3353_v60  ;;  %v3351_v3 = vld [vmem:[%s4946_s22 + $0x60] sm:$0xff]  ;;  %v2910_v61 = vld [vmem:[#allocation17] sm:$0xff] }
0x218e   :  { %3340 = vmatmul.msk.bf16.vlgmr.msrb.gmra.mxu1 %vm1525_vm15, %v2688_v25  ;;  %2840 = vmatpush.bf16.msra.mxu3 %v2827_v63  ;;  %v3352_v25 = vld [vmem:[%s4946_s22 + $0x68] sm:$0xff]  ;;  %v2911_v63 = vld [vmem:[#allocation17 + $0x8] sm:$0xff] }
0x2193   :  { %v2686_v54 = vpop.f32.mrf.mxu0 }
0x2194   :  { %v2826_v54 = vpack.c.bf16 %v3352_v25, %v3351_v3  ;;  %v2915_v25 = vpack.c.bf16 %v2911_v63, %v2910_v61 }
0x2196   :  { %2841 = vmatpush.bf16.msra.mxu3 %v2826_v54 }
0x2209   :  { %v2581_v5 = vpop.f32.mrf.mxu2 }
0x220a   :  { %v2585_v46 = vadd.f32 %v4748_v2, %v2581_v5  ;;  %v3350_v5 = vld [vmem:[%s4946_s22 + $0x58] sm:$0xff] }
0x220b   :  { %v2701_v29 = vpop.f32.mrf.mxu1 }
0x220c   :  { %v2705_v8 = vadd.f32 %v2701_v29, %v2585_v46  ;;  %v2825_v46 = vpack.c.bf16 %v3350_v5, %v3349_v4  ;;  %v3483_v29 = vld [vmem:[#allocation13 + $0x1] ss:$0 sm:$0xff] }
0x220e   :  { %v2707_v24 = vadd.f32 %v2705_v8, %v4702_v26  ;;  %2842 = vmatpush.bf16.msra.mxu3 %v2825_v46  ;;  %v3348_v8 = vld [vmem:[%s4946_s22 + $0x48] sm:$0xff] }
0x2210   :  { %v2715_v14 = vsel %vm454_vm0, %v2707_v24, 0.0 }
0x2211   :  { %2716 = vadd.xlane.f32.xlu0 %v2715_v14  ;;  %v2583_v15 = vpop.f32.mrf.mxu2 }
0x2213   :  { %v2703_v16 = vpop.f32.mrf.mxu1 }
0x2219   :  { %2725 = vadd.xlane.f32.xlu0 %v2724_v21 }
0x2284   :  { %v2717_v2 = vpop.xlane.xlu0 %2716 }
0x2285   :  { %v2719_v23 = vmul.f32 %v2717_v2, %v4576_v17 }
0x2287   :  { %v2721_v59 = vsub.f32 %v2707_v24, %v2719_v23 }
0x2289   :  { %v2723_v27 = vmul.f32 %v2721_v59, %v2721_v59 }
0x228b   :  { %v2727_v26 = vsel %vm454_vm0, %v2723_v27, 0.0 }
0x228c   :  { %2728 = vadd.xlane.f32.xlu2 %v2727_v26  ;;  %v2726_v28 = vpop.xlane.xlu0 %2725 }
0x228d   :  { %v2730_v20 = vmul.f32 %v2726_v28, %v4576_v17 }
0x228f   :  { %v2732_v30 = vadd.f32 1e-12, %v2730_v20 }
0x2291   :  { %3605 = vrsqrt.f32 %v2732_v30  ;;  %vm2740_vm14 = vweird.f32 %v2732_v30 }
0x2297   :  { %v3606_v32 = vpop.eup %3605 }
0x2298   :  { %v2735_v37 = vmul.f32 %v3606_v32, %v2732_v30  ;;  %vm2741_vm4 = vweird.f32 %v3606_v32 }
0x2299   :  { %vm2742_vm2 = vmor %vm2740_vm14, %vm2741_vm4 }
0x229a   :  { %v2736_v38 = vmul.f32 %v3606_v32, %v2735_v37 }
0x229c   :  { %v2737_v42 = vmul.f32 0.5, %v2736_v38 }
0x229e   :  { %v2738_v22 = vsub.f32 1.5, %v2737_v42 }
0x22a0   :  { %v2739_v44 = vmul.f32 %v3606_v32, %v2738_v22 }
0x22a2   :  { %v2743_v48 = vsel %vm2742_vm2, %v3606_v32, %v2739_v44 }
0x22a3   :  { %v2754_v47 = vmul.f32 %v2743_v48, %v2720_v13  ;;  %v2824_v13 = vpack.c.bf16 %v3348_v8, %v3347_v6 }
0x22a5   :  { %v2759_v51 = vmul.f32 %v3481_v35, %v2754_v47  ;;  %2843 = vmatpush.bf16.msra.mxu3 %v2824_v13 }
0x22a7   :  { %v2764_v34 = vadd.f32 %v3482_v50, %v2759_v51 }
0x22a9   :  { %3364 = vmatpush.msk.msrb.mxu3 %vm3111_vm7, %v4018_v7 }
0x22ff   :  { %v2729_v39 = vpop.xlane.xlu2 %2728 }
0x2300   :  { %v2731_v18 = vmul.f32 %v2729_v39, %v4576_v17  ;;  %v3484_v39 = vld [vmem:[#allocation14 + $0x1] ss:$0 sm:$0xff] }
0x2302   :  { %v2733_v41 = vadd.f32 1e-12, %v2731_v18 }
0x2304   :  { %3607 = vrsqrt.f32 %v2733_v41  ;;  %vm2750_vm5 = vweird.f32 %v2733_v41 }
0x230a   :  { %v3608_v43 = vpop.eup %3607 }
0x230b   :  { %v2745_v57 = vmul.f32 %v3608_v43, %v2733_v41  ;;  %vm2751_vm3 = vweird.f32 %v3608_v43 }
0x230c   :  { %vm2752_vm6 = vmor %vm2750_vm5, %vm2751_vm3 }
0x230d   :  { %v2746_v45 = vmul.f32 %v3608_v43, %v2745_v57 }
0x230f   :  { %v2747_v11 = vmul.f32 0.5, %v2746_v45 }
0x2311   :  { %v2748_v33 = vsub.f32 1.5, %v2747_v11 }
0x2313   :  { %v2749_v49 = vmul.f32 %v3608_v43, %v2748_v33 }
0x2315   :  { %v2753_v12 = vsel %vm2752_vm6, %v3608_v43, %v2749_v49 }
0x2316   :  { %v2755_v52 = vmul.f32 %v2753_v12, %v2721_v59 }
0x2318   :  { %v2760_v55 = vmul.f32 %v3481_v35, %v2755_v52 }
0x231a   :  { %v2765_v56 = vadd.f32 %v3482_v50, %v2760_v55  ;;  %v2912_v55 = vld [vmem:[#allocation17 + $0x10] sm:$0xff] }
0x231c   :  { %v2771_v1 = vpack.c.bf16 %v2765_v56, %v2764_v34 }
0x231e   :  { %3346 = vmatmul.msk.bf16.vlgmr.msrb.gmra.mxu2 %vm454_vm0, %v2771_v1 }
0x23a1   :  { %v2791_v24 = vpop.f32.mrf.mxu2 }
0x23a2   :  { %v2792_v14 = vadd.f32 %v3483_v29, %v2791_v24 }
0x23a4   :  { %v2796_v15 = vmul.f32 %v2792_v14, %v2792_v14 }
0x23a6   :  { %v2798_v16 = vmul.f32 %v2796_v15, %v2792_v14 }
0x23a8   :  { %v2800_v19 = vmul.f32 0.044715, %v2798_v16 }
0x23a9   :  { %v2793_v21 = vpop.f32.mrf.mxu2 }
0x23aa   :  { %v2802_v2 = vadd.f32 %v2800_v19, %v2792_v14  ;;  %v2794_v23 = vadd.f32 %v3483_v29, %v2793_v21 }
0x23ac   :  { %v2804_v59 = vmul.f32 0.7978846, %v2802_v2  ;;  %v2797_v27 = vmul.f32 %v2794_v23, %v2794_v23 }
0x23ae   :  { %v2799_v26 = vmul.f32 %v2797_v27, %v2794_v23  ;;  %3609 = vtanh.f32 %v2804_v59 }
0x23b0   :  { %v2801_v28 = vmul.f32 0.044715, %v2799_v26 }
0x23b2   :  { %v2803_v20 = vadd.f32 %v2801_v28, %v2794_v23  ;;  %v3486_v28 = vld [vmem:[#allocation16 + $0x1] ss:$0 sm:$0xff] }
0x23b4   :  { %v2805_v30 = vmul.f32 0.7978846, %v2803_v20  ;;  %v3610_v31 = vpop.eup %3609 }
0x23b5   :  { %v2808_v10 = vadd.f32 1.0, %v3610_v31 }
0x23b6   :  { %3611 = vtanh.f32 %v2805_v30 }
0x23b7   :  { %v2810_v32 = vmul.f32 0.5, %v2808_v10 }
0x23b9   :  { %v2812_v58 = vmul.f32 %v2810_v32, %v2792_v14 }
0x23bc   :  { %v3612_v53 = vpop.eup %3611 }
0x23bd   :  { %v2809_v62 = vadd.f32 1.0, %v3612_v53 }
0x23bf   :  { %v2811_v36 = vmul.f32 0.5, %v2809_v62  ;;  %v3487_v62 = vld [vmem:[%s4949_s13] ss:$0 sm:$0xff] }
0x23c1   :  { %v2813_v37 = vmul.f32 %v2811_v36, %v2794_v23  ;;  %v3485_v23 = vld [vmem:[%s4947_s18 + $0x1] ss:$0 sm:$0xff] }
0x23c3   :  { %v2823_v38 = vpack.c.bf16 %v2813_v37, %v2812_v58 }
0x23c5   :  { %3355 = vmatmul.msk.bf16.vlgmr.msra.gmra.mxu3 %vm820_vm13, %v2823_v38 }
0x2448   :  { %v2845_v18 = vpop.f32.mrf.mxu3 }
0x2449   :  { %v2846_v41 = vadd.f32 %v3484_v39, %v2845_v18 }
0x244b   :  { %v2850_v42 = vadd.f32 %v2846_v41, %v2764_v34  ;;  %v2913_v34 = vld [vmem:[#allocation17 + $0x18] sm:$0xff] }
0x244d   :  { %v2856_v22 = vsel %vm454_vm0, %v2850_v42, 0.0 }
0x244e   :  { %2857 = vadd.xlane.f32.xlu0 %v2856_v22 }
0x2450   :  { %v2847_v43 = vpop.f32.mrf.mxu3 }
0x2451   :  { %v2848_v44 = vadd.f32 %v3484_v39, %v2847_v43 }
0x2453   :  { %v2851_v57 = vadd.f32 %v2848_v44, %v2765_v56  ;;  %v2916_v56 = vpack.c.bf16 %v2913_v34, %v2912_v55  ;;  %v4808_v34 = vld [vmem:[%s4948_s29] sm:$0xff] }
0x2454   :  { %vm3110_vm12 = vcmp.ge.s32.totalorder %v4808_v34, 0 }
0x2455   :  { %v2859_v45 = vsel %vm454_vm0, %v2851_v57, 0.0  ;;  %2930 = vmatpush.bf16.msrb.mxu0 %v2916_v56  ;;  %3365 = vmatpush.msk.msrb.mxu3 %vm3110_vm12, %v4018_v7 }
0x2456   :  { %2860 = vadd.xlane.f32.xlu0 %v2859_v45  ;;  %3366 = vmatmul.msk.f32.vlgmr.msrb.gmra.mxu3 %vm1525_vm15, %v4018_v7 }
0x2459   :  { %2931 = vmatpush.bf16.msrb.mxu0 %v2915_v25 }
0x24c1   :  { %v2858_v48 = vpop.xlane.xlu0 %2857 }
0x24c2   :  { %v2862_v11 = vmul.f32 %v2858_v48, %v4576_v17 }
0x24c4   :  { %v2864_v33 = vsub.f32 %v2850_v42, %v2862_v11 }
0x24c6   :  { %v2866_v35 = vmul.f32 %v2864_v33, %v2864_v33 }
0x24c8   :  { %v2868_v47 = vsel %vm454_vm0, %v2866_v35, 0.0 }
0x24c9   :  { %2869 = vadd.xlane.f32.xlu0 %v2868_v47  ;;  %v2861_v49 = vpop.xlane.xlu0 %2860 }
0x24ca   :  { %v2863_v12 = vmul.f32 %v2861_v49, %v4576_v17 }
0x24cc   :  { %v2865_v50 = vsub.f32 %v2851_v57, %v2863_v12 }
0x24ce   :  { %v2867_v51 = vmul.f32 %v2865_v50, %v2865_v50 }
0x24d0   :  { %v2871_v52 = vsel %vm454_vm0, %v2867_v51, 0.0 }
0x24d1   :  { %2872 = vadd.xlane.f32.xlu0 %v2871_v52 }
0x253c   :  { %v2870_v1 = vpop.xlane.xlu0 %2869 }
0x253d   :  { %v2874_v60 = vmul.f32 %v2870_v1, %v4576_v17 }
0x253f   :  { %v2876_v3 = vadd.f32 1e-12, %v2874_v60 }
0x2541   :  { %3613 = vrsqrt.f32 %v2876_v3  ;;  %vm2884_vm8 = vweird.f32 %v2876_v3 }
0x2544   :  { %v2873_v54 = vpop.xlane.xlu0 %2872 }
0x2545   :  { %v2875_v4 = vmul.f32 %v2873_v54, %v4576_v17 }
0x2547   :  { %v3614_v5 = vpop.eup %3613  ;;  %v2877_v46 = vadd.f32 1e-12, %v2875_v4 }
0x2548   :  { %v2879_v29 = vmul.f32 %v3614_v5, %v2876_v3  ;;  %vm2885_vm13 = vweird.f32 %v3614_v5 }
0x2549   :  { %3615 = vrsqrt.f32 %v2877_v46  ;;  %vm2886_vm9 = vmor %vm2884_vm8, %vm2885_vm13  ;;  %vm2894_vm10 = vweird.f32 %v2877_v46 }
0x254a   :  { %v2880_v6 = vmul.f32 %v3614_v5, %v2879_v29  ;;  %v3636_v29 = vld [vmem:[%s4929_s26 + $0x8] sm:$0xff] }
0x254c   :  { %v2881_v8 = vmul.f32 0.5, %v2880_v6  ;;  %v3637_v6 = vld [vmem:[%s4929_s26 + $0x10] sm:$0xff] }
0x254e   :  { %v2882_v24 = vsub.f32 1.5, %v2881_v8  ;;  %v3638_v8 = vld [vmem:[%s4929_s26 + $0x18] sm:$0xff] }
0x254f   :  { %v3616_v13 = vpop.eup %3615 }
0x2550   :  { %v2883_v14 = vmul.f32 %v3614_v5, %v2882_v24  ;;  %v2889_v15 = vmul.f32 %v3616_v13, %v2877_v46  ;;  %vm2895_vm1 = vweird.f32 %v3616_v13  ;;  %v3635_v46 = vld [vmem:[%s4929_s26] sm:$0xff] }
0x2551   :  { %vm2896_vm11 = vmor %vm2894_vm10, %vm2895_vm1  ;;  %v3639_v24 = vld [vmem:[%s4929_s26 + $0x20] sm:$0xff] }
0x2552   :  { %v2890_v16 = vmul.f32 %v3616_v13, %v2889_v15  ;;  %v2887_v19 = vsel %vm2886_vm9, %v3614_v5, %v2883_v14  ;;  %v3641_v14 = vld [vmem:[%s4929_s26 + $0x30] sm:$0xff]  ;;  %v3642_v15 = vld [vmem:[%s4929_s26 + $0x38] sm:$0xff] }
0x2553   :  { %v2898_v59 = vmul.f32 %v2887_v19, %v2864_v33  ;;  %v3644_v19 = vld [vmem:[%s4929_s26 + $0x48] sm:$0xff] }
0x2554   :  { %v2891_v21 = vmul.f32 0.5, %v2890_v16  ;;  %v3643_v16 = vld [vmem:[%s4929_s26 + $0x40] sm:$0xff] }
0x2555   :  { %v2903_v20 = vmul.f32 %v3485_v23, %v2898_v59  ;;  %v3648_v59 = vld [vmem:[%s4929_s26 + $0x68] sm:$0xff] }
0x2556   :  { %v2892_v2 = vsub.f32 1.5, %v2891_v21  ;;  %v3645_v21 = vld [vmem:[%s4929_s26 + $0x50] sm:$0xff] }
0x2557   :  { %v2908_v10 = vadd.f32 %v3486_v28, %v2903_v20 }
0x2558   :  { %v2893_v27 = vmul.f32 %v3616_v13, %v2892_v2  ;;  %v3646_v2 = vld [vmem:[%s4929_s26 + $0x58] sm:$0xff] }
0x255a   :  { %v2897_v26 = vsel %vm2896_vm11, %v3616_v13, %v2893_v27  ;;  %v3640_v13 = vld [vmem:[%s4929_s26 + $0x28] sm:$0xff]  ;;  %v3649_v27 = vld [vmem:[%s4929_s26 + $0x70] sm:$0xff] }
0x255b   :  { %v2899_v30 = vmul.f32 %v2897_v26, %v2865_v50  ;;  %v3650_v26 = vld [vmem:[%s4929_s26 + $0x78] sm:$0xff] }
0x255d   :  { %v2904_v31 = vmul.f32 %v3485_v23, %v2899_v30  ;;  %v3647_v23 = vld [vmem:[%s4929_s26 + $0x60] sm:$0xff]  ;;  %s4950_s26 = sld [smem:[#allocation57_spill]] }
0x255f   :  { %v2909_v53 = vadd.f32 %v3486_v28, %v2904_v31 }
0x2561   :  { %v2914_v32 = vpack.c.bf16 %v2909_v53, %v2908_v10 }
0x2563   :  { %3357 = vmatmul.msk.bf16.vlgmr.msrb.gmra.mxu0 %vm454_vm0, %v2914_v32 }
0x25e0   :  { %v2933_v36 = vpop.f32.mrf.mxu0 }
0x25e1   :  { %v2934_v58 = vadd.f32 %v3487_v62, %v2933_v36 }
0x25e3   :  { %v2938_v37 = vmul.f32 %v2934_v58, %v2934_v58 }
0x25e5   :  { %v2940_v38 = vmul.f32 %v2938_v37, %v2934_v58 }
0x25e7   :  { %v2942_v39 = vmul.f32 0.044715, %v2940_v38 }
0x25e8   :  { %v2935_v18 = vpop.f32.mrf.mxu0 }
0x25e9   :  { %v2936_v41 = vadd.f32 %v3487_v62, %v2935_v18  ;;  %v2944_v42 = vadd.f32 %v2942_v39, %v2934_v58 }
0x25eb   :  { %v2939_v22 = vmul.f32 %v2936_v41, %v2936_v41  ;;  %v2946_v43 = vmul.f32 0.7978846, %v2944_v42 }
0x25ed   :  { %v2941_v44 = vmul.f32 %v2939_v22, %v2936_v41  ;;  %3617 = vtanh.f32 %v2946_v43 }
0x25ef   :  { %v2943_v57 = vmul.f32 0.044715, %v2941_v44 }
0x25f1   :  { %v2945_v45 = vadd.f32 %v2943_v57, %v2936_v41 }
0x25f3   :  { %v3618_v48 = vpop.eup %3617  ;;  %v2947_v11 = vmul.f32 0.7978846, %v2945_v45 }
0x25f4   :  { %v2950_v33 = vadd.f32 1.0, %v3618_v48 }
0x25f5   :  { %3619 = vtanh.f32 %v2947_v11 }
0x25f6   :  { %v2952_v35 = vmul.f32 0.5, %v2950_v33  ;;  %v3488_v33 = vld [vmem:[%s4950_s26] ss:$0 sm:$0xff] }
0x25f8   :  { %v2954_v47 = vmul.f32 %v2952_v35, %v2934_v58 }
0x25fa   :  { %v2958_v49 = vsel %vm454_vm0, %v2954_v47, 0.0 }
0x25fb   :  { %v3620_v12 = vpop.eup %3619  ;;  %2959 = vadd.xlane.f32.xlu0 %v2958_v49 }
0x25fc   :  { %v2951_v50 = vadd.f32 1.0, %v3620_v12 }
0x25fe   :  { %v2953_v51 = vmul.f32 0.5, %v2951_v50  ;;  %v3489_v50 = vld [vmem:[%s4244_s12] ss:$0 sm:$0xff]  ;;  %s3187_s12 = sshll.u32 %s4254_s27, 4  ;;  %s3188_s12 = int_to_ptr.hbm [resolvable:$true] %s3187_s12 }
0x25ff   :  { %s3903_s16 = sshra.s32 %s3188_s12, 4  ;;  %s3904_s16 = int_to_ptr.hbm [resolvable:$true] %s3903_s16 }
0x2600   :  { %v2955_v52 = vmul.f32 %v2953_v51, %v2936_v41  ;;  %s3905_s25 = scalar_lea.hbm %s3904_s16, 16  ;;  %p3908_p9 = scmp.lt.s32.totalorder %s3904_s16, %s4254_s27 }
0x2601   :  { %p3906_p8 = scmp.ne.s32.totalorder %s3904_s16, %s3905_s25  ;;  %p3909_p10 = scmp.lt.s32.totalorder %s3907_s15, %s3905_s25 }
0x2602   :  { %v2961_v55 = vsel %vm454_vm0, %v2955_v52, 0.0 }
0x2603   :  { %2962 = vadd.xlane.f32.xlu2 %v2961_v55  ;;  %p3910_p11 = por %p3909_p10, %p3908_p9 }
0x2605   :  { %p3911_p12 = pnand %p3910_p11, %p3906_p8 }
0x266e   :  { %v2960_v56 = vpop.xlane.xlu0 %2959 }
0x266f   :  { %v2964_v1 = vmul.f32 %v2960_v56, %v4576_v17 }
0x2671   :  { %v4817_v60 = vsub.f32 %v2954_v47, %v2964_v1 }
0x2673   :  { %v2968_v61 = vmul.f32 %v4817_v60, %v4817_v60 }
0x2675   :  { %v2970_v63 = vsel %vm454_vm0, %v2968_v61, 0.0 }
0x2676   :  { %v2963_v3 = vpop.xlane.xlu2 %2962  ;;  %2971 = vadd.xlane.f32.xlu0 %v2970_v63  ;;  %v3490_v63 = vld [vmem:[%s4249_s20] ss:$0 sm:$0xff]  ;;  %s4024_s20 = smov [#allocation19]  }
0x2677   :  { %v2965_v25 = vmul.f32 %v2963_v3, %v4576_v17  ;;  %s3185_s17 = sshll.u32 %s4024_s20, 4  ;;  %s3186_s17 = int_to_ptr.vmem [resolvable:$true] %s3185_s17 }
0x2679   :  { %v4823_v54 = vsub.f32 %v2955_v52, %v2965_v25 }
0x267b   :  { %v2969_v4 = vmul.f32 %v4823_v54, %v4823_v54 }
0x267d   :  { %v2973_v5 = vsel %vm454_vm0, %v2969_v4, 0.0 }
0x267e   :  { %2974 = vadd.xlane.f32.xlu2 %v2973_v5 }
0x2696   :  { %3073 = vperm.xlu2 %3439, %v4808_v34  }
0x269f   :  { %3012 = vxpose.xlu0.b32.start [1/16] (narrow) %v3635_v46, 32  ;;  %v3077_v46 = vpop.permute.xlu1 %3076 }
0x26a0   :  { %vm3079_vm8 = vcmp.eq.s32.totalorder %v4459_v0, %v3077_v46 }
0x26a7   :  { %3013 = vxpose.xlu0.b32.cont [2/16] (narrow) %v3636_v29, 32  ;;  %v3360_v29 = vsel %vm3079_vm8, 1.0, %v4014_v9 }
0x26af   :  { %3014 = vxpose.xlu0.b32.cont [3/16] (narrow) %v3637_v6, 32 }
0x26b7   :  { %3015 = vxpose.xlu0.b32.cont [4/16] (narrow) %v3638_v8, 32 }
0x26bf   :  { %3016 = vxpose.xlu0.b32.cont [5/16] (narrow) %v3639_v24, 32 }
0x26c7   :  { %3017 = vxpose.xlu0.b32.cont [6/16] (narrow) %v3640_v13, 32 }
0x26cf   :  { %3018 = vxpose.xlu0.b32.cont [7/16] (narrow) %v3641_v14, 32 }
0x26d7   :  { %3019 = vxpose.xlu0.b32.cont [8/16] (narrow) %v3642_v15, 32 }
0x26df   :  { %3020 = vxpose.xlu0.b32.cont [9/16] (narrow) %v3643_v16, 32 }
0x26e7   :  { %3021 = vxpose.xlu0.b32.cont [10/16] (narrow) %v3644_v19, 32 }
0x26e9   :  { %v2972_v20 = vpop.xlane.xlu0 %2971 }
0x26ea   :  { %v2976_v31 = vmul.f32 %v2972_v20, %v4576_v17 }
0x26ec   :  { %v2978_v53 = vadd.f32 1e-12, %v2976_v31  ;;  %v3362_v31 = vsel %vm3111_vm7, 1.0, %v4014_v9 }
0x26ee   :  { %vm2986_vm5 = vweird.f32 %v2978_v53 }
0x26ef   :  { %3022 = vxpose.xlu0.b32.cont [11/16] (narrow) %v3645_v21, 32 }
0x26f1   :  { %v2975_v28 = vpop.xlane.xlu2 %2974 }
0x26f2   :  { %v2977_v30 = vmul.f32 %v2975_v28, %v4576_v17 }
0x26f4   :  { %v2979_v10 = vadd.f32 1e-12, %v2977_v30 }
0x26f6   :  { %3621 = vrsqrt.f32 %v2979_v10  ;;  %vm2996_vm2 = vweird.f32 %v2979_v10 }
0x26f7   :  { %3023 = vxpose.xlu0.b32.cont [12/16] (narrow) %v3646_v2, 32  ;;  %3623 = vrsqrt.f32 %v2978_v53 }
0x26f9   :  { %v3074_v61 = vpop.permute.xlu2 %3073 }
0x26fa   :  { %vm3078_vm13 = vcmp.eq.s32.totalorder %v4459_v0, %v3074_v61 }
0x26fc   :  { %v3622_v32 = vpop.eup %3621 }
0x26fd   :  { %v3624_v62 = vpop.eup %3623  ;;  %v2991_v36 = vmul.f32 %v3622_v32, %v2979_v10  ;;  %vm2997_vm4 = vweird.f32 %v3622_v32 }
0x26fe   :  { %v2981_v58 = vmul.f32 %v3624_v62, %v2978_v53  ;;  %vm2987_vm14 = vweird.f32 %v3624_v62  ;;  %vm2998_vm3 = vmor %vm2996_vm2, %vm2997_vm4 }
0x26ff   :  { %3024 = vxpose.xlu0.b32.cont [13/16] (narrow) %v3647_v23, 32  ;;  %v2992_v38 = vmul.f32 %v3622_v32, %v2991_v36  ;;  %vm2988_vm6 = vmor %vm2986_vm5, %vm2987_vm14 }
0x2700   :  { %v2982_v39 = vmul.f32 %v3624_v62, %v2981_v58 }
0x2701   :  { %v2993_v18 = vmul.f32 0.5, %v2992_v38 }
0x2702   :  { %v2983_v41 = vmul.f32 0.5, %v2982_v39 }
0x2703   :  { %v2994_v22 = vsub.f32 1.5, %v2993_v18 }
0x2704   :  { %v2984_v43 = vsub.f32 1.5, %v2983_v41 }
0x2705   :  { %v2995_v44 = vmul.f32 %v3622_v32, %v2994_v22 }
0x2706   :  { %v2985_v17 = vmul.f32 %v3624_v62, %v2984_v43 }
0x2707   :  { %3025 = vxpose.xlu0.b32.cont [14/16] (narrow) %v3648_v59, 32  ;;  %v2999_v45 = vsel %vm2998_vm3, %v3622_v32, %v2995_v44  ;;  %v3361_v32 = vsel %vm3110_vm12, 1.0, %v4014_v9 }
0x2708   :  { %v2989_v48 = vsel %vm2988_vm6, %v3624_v62, %v2985_v17  ;;  %v3001_v11 = vmul.f32 %v2999_v45, %v4823_v54 }
0x2709   :  { %v3000_v35 = vmul.f32 %v2989_v48, %v4817_v60  ;;  %v3359_v60 = vsel %vm3078_vm13, 1.0, %v4014_v9 }
0x270a   :  { %v3006_v47 = vmul.f32 %v3488_v33, %v3001_v11 }
0x270b   :  { %v3005_v51 = vmul.f32 %v3488_v33, %v3000_v35 }
0x270c   :  { %v3011_v52 = vadd.f32 %v3489_v50, %v3006_v47 }
0x270d   :  { %v3010_v56 = vadd.f32 %v3489_v50, %v3005_v51 }
0x270f   :  { %3026 = vxpose.xlu0.b32.cont [15/16] (narrow) %v3649_v27, 32  ;;  %v3044_v1 = vpack.c.bf16 %v3011_v52, %v3010_v56 }
0x2717   :  { %3027 = vxpose.xlu0.b32.end [16/16] (narrow) %v3650_v26, 32 }
0x2743   :  { %v3028_v37 = vpop.trf.xlu0 }
0x274b   :  { %v3029_v42 = vpop.trf.xlu0 }
0x274c   :  { %v3045_v55 = vpack.c.bf16 %v3029_v42, %v3028_v37 }
0x2753   :  { %v3030_v57 = vpop.trf.xlu0 }
0x275b   :  { %v3031_v49 = vpop.trf.xlu0 }
0x275c   :  { %v3046_v12 = vpack.c.bf16 %v3031_v49, %v3030_v57 }
0x275e   :  { %3060 = vmatpush.bf16.msra.mxu1 %v3046_v12 }
0x2762   :  { %3061 = vmatpush.bf16.msra.mxu1 %v3045_v55 }
0x2765   :  { %3358 = vmatmul.msk.bf16.vlgmr.msra.gmra.mxu1 %vm454_vm0, %v3044_v1 }
0x27e2   :  { %v3063_v3 = vpop.f32.mrf.mxu1 }
0x27e3   :  { %v3064_v25 = vadd.f32 %v3490_v63, %v3063_v3 }
0x27e5   :  { %3068 = vst [vmem:[#allocation19] sm:$0xff] %v3064_v25  ;;  %v3084_v54 = vmul.f32 %v3359_v60, %v3064_v25 }
0x27e7   :  { %3086 = vadd.xlane.f32.xlu2 %v3084_v54 }
0x27ea   :  { %v3065_v4 = vpop.f32.mrf.mxu1 }
0x27eb   :  { %v3066_v5 = vadd.f32 %v3490_v63, %v3065_v4 }
0x27ed   :  { %3069 = vst [vmem:[#allocation19 + $0x8] sm:$0xff] %v3066_v5  ;;  %3092 = vmax.xlane.f32.xlu1 %v3066_v5  ;;  %v3085_v6 = vmul.f32 %v3360_v29, %v3066_v5 }
0x27ef   :  { %3090 = vmax.xlane.f32.xlu2 %v3064_v25 }
0x27f5   :  { %3088 = vadd.xlane.f32.xlu1 %v3085_v6 }
0x285a   :  { %v3087_v8 = vpop.xlane.xlu2 %3086 }
0x2860   :  { %v3093_v24 = vpop.xlane.xlu1 %3092 }
0x2861   :  { %v3095_v13 = vsub.f32 %v3066_v5, %v3093_v24 }
0x2862   :  { %v3091_v14 = vpop.xlane.xlu2 %3090 }
0x2863   :  { %v3098_v15 = vmul.f32 1.442695, %v3095_v13  ;;  %v3094_v16 = vsub.f32 %v3064_v25, %v3091_v14 }
0x2865   :  { %3625 = vpow2.f32 %v3098_v15  ;;  %v3096_v19 = vmul.f32 1.442695, %v3094_v16 }
0x2867   :  { %3627 = vpow2.f32 %v3096_v19 }
0x2868   :  { %v3089_v23 = vpop.xlane.xlu1 %3088 }
0x286b   :  { %v3626_v21 = vpop.eup %3625 }
0x286c   :  { %3102 = vadd.xlane.f32.xlu1 %v3626_v21 }
0x286d   :  { %v3628_v2 = vpop.eup %3627 }
0x286e   :  { %3100 = vadd.xlane.f32.xlu2 %v3628_v2 }
0x28df   :  { %v3103_v0 = vpop.xlane.xlu1 %3102 }
0x28e0   :  { %3629 = vlog2.f32 %v3103_v0 }
0x28e1   :  { %v3101_v59 = vpop.xlane.xlu2 %3100 }
0x28e2   :  { %3631 = vlog2.f32 %v3101_v59 }
0x28e6   :  { %v3630_v27 = vpop.eup %3629 }
0x28e7   :  { %v3107_v26 = vmul.f32 0.6931472, %v3630_v27 }
0x28e8   :  { %v3632_v28 = vpop.eup %3631 }
0x28e9   :  { %v3109_v20 = vadd.f32 %v3107_v26, %v3093_v24  ;;  %v3105_v30 = vmul.f32 0.6931472, %v3632_v28 }
0x28eb   :  { %v3117_v10 = vsub.f32 %v3109_v20, %v3089_v23  ;;  %v3108_v53 = vadd.f32 %v3105_v30, %v3091_v14 }
0x28ed   :  { %v3116_v62 = vsub.f32 %v3108_v53, %v3087_v8  ;;  %v3119_v36 = vmul.f32 %v3362_v31, %v3117_v10 }
0x28ef   :  { %3137 = vmatpush.msra.mxu2 %v3119_v36  ;;  %v3118_v58 = vmul.f32 %v3361_v32, %v3116_v62 }
0x28f1   :  { %3138 = vmatpush.msra.mxu2 %v3118_v58 }
0x28f2   :  { %3363 = vmatmul.msk.f32.vlgmr.msra.gmra.mxu2 %vm1525_vm15, %v4018_v7 }
0x28f3   :  { %3914 = shalt.err (!%p3911_p12)
}
0x28f4   :  { %3193 = dma.vmem_to_hbm [thread:$0]  %s3186_s17, 256, %s3188_s12, [#allocation4], %s4002_s2, %s4002_s2, %s4003_s7   ;;  %v3160_v9 = vpop.f32.mrf.mxu3  ;;  %vm3179_vm1 = vcmask 0  }
0x28f5   :  { %v3163_v7 = vmax.f32 %v3160_v9, 1.0  ;;  %s4025_s27 = smov [#allocation20]   ;;  %s3201_s7 = sshll.u32 %s4259_s5, 4  ;;  %s3202_s7 = int_to_ptr.hbm [resolvable:$true] %s3201_s7 }
0x28f6   :  { %s3199_s2 = sshll.u32 %s4025_s27, 4  ;;  %s3927_s23 = sshra.s32 %s3202_s7, 4  ;;  %s3200_s2 = int_to_ptr.vmem [resolvable:$true] %s3199_s2  ;;  %s3928_s23 = int_to_ptr.hbm [resolvable:$true] %s3927_s23 }
0x28f7   :  { %3633 = vrcp.f32 %v3163_v7  ;;  %vm3169_vm0 = vweird.f32 %v3163_v7  ;;  %v3175_v39 = vand.u32 2147483648, %v3163_v7  ;;  %v3173_v41 = vand.u32 2147483647, %v3163_v7  ;;  %s3929_s28 = scalar_lea.hbm %s3928_s23, 1  ;;  %s3931_s3 = scalar_lea.hbm %s4259_s5, 1 }
0x28f8   :  { %p3930_p13 = scmp.ne.s32.totalorder %s3928_s23, %s3929_s28  ;;  %p3932_p0 = scmp.lt.s32.totalorder %s3928_s23, %s4259_s5 }
0x28f9   :  { %v3176_v42 = vor.u32 1.1754944e-38, %v3175_v39  ;;  %vm3174_vm9 = vcmp.eq.f32.partialorder %v3173_v41, 8.507059e+37  ;;  %p3933_p1 = scmp.lt.s32.totalorder %s3931_s3, %s3929_s28 }
0x28fb   :  { %p3934_p2 = por %p3933_p1, %p3932_p0 }
0x28fd   :  { %v3634_v40 = vpop.eup %3633  ;;  %p3935_p3 = pnand %p3934_p2, %p3930_p13 }
0x28fe   :  { %v3165_v34 = vmul.f32 %v3634_v40, %v3163_v7  ;;  %vm3170_vm15 = vweird.f32 %v3634_v40 }
0x28ff   :  { %vm3171_vm7 = vmor %vm3169_vm0, %vm3170_vm15 }
0x2900   :  { %v3166_v37 = vsub.f32 1.0, %v3165_v34 }
0x2902   :  { %v3167_v38 = vmul.f32 %v3634_v40, %v3166_v37 }
0x2904   :  { %v3168_v18 = vadd.f32 %v3634_v40, %v3167_v38 }
0x2906   :  { %v3172_v22 = vsel %vm3171_vm7, %v3634_v40, %v3168_v18 }
0x2907   :  { %v3177_v44 = vsel %vm3174_vm9, %v3176_v42, %v3172_v22 }
0x2975   :  { %v3140_v43 = vpop.f32.mrf.mxu2 }
0x2976   :  { %v3178_v17 = vmul.f32 %v3177_v44, %v3140_v43 }
0x2978   :  { %3180 = vst.msk [vmem:[#allocation20] sm:$0x1] %vm3179_vm1, %v3178_v17 }
0x2979   :  { %3938 = shalt.err (!%p3935_p3)
}
0x297a   :  { %3204 = dma.vmem_to_hbm [thread:$0]  %s3200_s2, 16, %s3202_s7, [#allocation21]  }
0x297b   :  { %3951 = dma.done.wait [#allocation4], 256  }
0x297c   :  { %3952 = vsyncadd [#allocation4], 4294967040 }
0x297d   :  { %3953 = dma.done.wait [#allocation21], 16  }
0x297e   :  { %3954 = vsyncadd [#allocation21], 4294967280 }
0x297f   :  { %3213 = vsyncpa [#allocation3], 1 }
0x2980   :  { %3214 = vsyncpa [#allocation6], 1 }
0x2981   :  { %3215 = vsyncpa [#allocation9], 1 }
0x2982   :  { %3216 = vsyncpa [#allocation12], 1 }
0x2983   :  { %3217 = vsyncpa [#allocation15], 1 }
0x2984   :  { %3218 = vsyncpa [#allocation18], 1 }
0x2985   :  { %3219 = vsyncpa [#allocation4], 1 }
0x2986   :  { %3220 = vsyncpa [#allocation21], 1 }

</bundles_post_ra>
